<compile_context>
chip_gen: v6e
topology: v6e:2x2x1
jax: 0.10.0
libtpu: 0.0.40
codegen_flags: <defaults>
</compile_context>

<pallas_src>
import functools
import math

import jax
import jax.numpy as jnp
from jax.experimental import pallas as pl
from jax.experimental.pallas import tpu as pltpu


def _vmem_limit_bytes():
    # ~48 MiB on v7x (64 MiB physical VMEM), ~96 MiB on v5e/v6e (128 MiB).
    try:
        cap = pltpu.get_tpu_info().vmem_capacity_bytes
        return int(min(96 * 2**20, max(32 * 2**20, (cap * 3) // 4)))
    except Exception:
        return 48 * 2**20


def _compiler_params():
    return pltpu.CompilerParams(
        dimension_semantics=("parallel", "arbitrary"),
        vmem_limit_bytes=_vmem_limit_bytes(),
    )


# ----------------------------------------------------------------------------
# Kernel 1: GATConv layer 1 (multi-head, concat) with flash-style masked
# softmax over source tiles, + bias + ReLU, fused with the second layer's
# linear transform (relu(h1) @ W2) and the second layer's attention logits.
# ----------------------------------------------------------------------------
def _gat1_kernel(adst_ref, asrct_ref, hsrc_ref, adj_ref, bias_ref, w2_ref,
                 att2_ref, hout_ref, a2_ref, m_ref, l_ref, acc_ref,
                 *, heads, out_ch, negative_slope):
    j = pl.program_id(1)
    ns = jnp.float32(negative_slope)

    @pl.when(j == 0)
    def _():
        m_ref[...] = jnp.full_like(m_ref, -1e30)
        l_ref[...] = jnp.zeros_like(l_ref)
        acc_ref[...] = jnp.zeros_like(acc_ref)

    # Additive neighbor mask for this (target-tile, source-tile) block,
    # built once per step and shared by all heads: 0 where edge, -1e30 where not.
    neg = (adj_ref[...].astype(jnp.float32) - 1.0) * jnp.float32(1e30)

    a_dst = adst_ref[...]                          # [T, H] f32 (precomputed)
    a_src_t = asrct_ref[...]                       # [H, S] f32 (precomputed, transposed)
    hsrc = hsrc_ref[...].astype(jnp.float32)       # [S, H*C]  (bf16 in HBM)

    for hd in range(heads):                        # heads is small & static -> unrolled
        e = a_dst[:, hd:hd + 1] + a_src_t[hd:hd + 1, :]          # [T, S]
        e = jnp.maximum(e, ns * e) + neg                         # leaky ReLU + mask
        m_old = m_ref[:, hd:hd + 1]
        m_new = jnp.maximum(m_old, jnp.max(e, axis=-1, keepdims=True))
        corr = jnp.exp(m_old - m_new)
        p = jnp.exp(e - m_new)                                   # masked entries -> 0
        l_ref[:, hd:hd + 1] = corr * l_ref[:, hd:hd + 1] + jnp.sum(
            p, axis=-1, keepdims=True)
        sl = slice(hd * out_ch, (hd + 1) * out_ch)
        acc_ref[:, sl] = corr * acc_ref[:, sl] + jnp.dot(
            p, hsrc[:, sl], preferred_element_type=jnp.float32)  # [T, C]
        m_ref[:, hd:hd + 1] = m_new

    @pl.when(j == pl.num_programs(1) - 1)
    def _():
        # Per-head softmax normalization (EUP reciprocal).
        for hd in range(heads):
            sl = slice(hd * out_ch, (hd + 1) * out_ch)
            acc_ref[:, sl] = acc_ref[:, sl] * pl.reciprocal(
                l_ref[:, hd:hd + 1], approx=True)
        h1 = jnp.maximum(acc_ref[...] + bias_ref[...], 0.0)      # bias + inter-layer ReLU
        # Fused next-layer linear transform and its per-node attention logits.
        h2 = jnp.dot(h1, w2_ref[...], preferred_element_type=jnp.float32)   # [T, C2]
        hout_ref[...] = h2.astype(hout_ref.dtype)                # bf16 activation
        a2_ref[...] = jnp.dot(h2, att2_ref[...],
                              preferred_element_type=jnp.float32)           # [T, 2]


def gat_layer1(a_dst1, a_src1_t, hsrc1, adj, bias1, w2, att2, *, heads, out_ch,
               negative_slope, tile_t, tile_s):
    n_pad, hc = hsrc1.shape
    c2 = w2.shape[1]
    grid = (n_pad // tile_t, n_pad // tile_s)
    kern = functools.partial(_gat1_kernel, heads=heads, out_ch=out_ch,
                             negative_slope=negative_slope)
    return pl.pallas_call(
        kern,
        out_shape=(jax.ShapeDtypeStruct((n_pad, c2), jnp.bfloat16),
                   jax.ShapeDtypeStruct((n_pad, 2), jnp.float32)),
        grid=grid,
        in_specs=[
            pl.BlockSpec((tile_t, heads), lambda i, j: (i, 0)),    # a_dst1  [N,H]
            pl.BlockSpec((heads, tile_s), lambda i, j: (0, j)),    # a_src1^T [H,N]
            pl.BlockSpec((tile_s, hc), lambda i, j: (j, 0)),       # hsrc1 (bf16)
            pl.BlockSpec((tile_t, tile_s), lambda i, j: (i, j)),   # adjacency (int8)
            pl.BlockSpec((1, hc), lambda i, j: (0, 0)),            # bias1
            pl.BlockSpec((hc, c2), lambda i, j: (0, 0)),           # W2
            pl.BlockSpec((c2, 2), lambda i, j: (0, 0)),            # [att_src2 | att_dst2]
        ],
        out_specs=(pl.BlockSpec((tile_t, c2), lambda i, j: (i, 0)),
                   pl.BlockSpec((tile_t, 2), lambda i, j: (i, 0))),
        scratch_shapes=[pltpu.VMEM((tile_t, heads), jnp.float32),   # running max
                        pltpu.VMEM((tile_t, heads), jnp.float32),   # running denom
                        pltpu.VMEM((tile_t, hc), jnp.float32)],     # accumulator slab
        compiler_params=_compiler_params(),
    )(a_dst1, a_src1_t, hsrc1, adj, bias1, w2, att2)


# ----------------------------------------------------------------------------
# Kernel 2: GATConv layer 2 (1 head) with flash-style masked softmax over
# source tiles, + bias + ReLU + BatchNorm1d(eval, folded) + LayerNorm.
# ----------------------------------------------------------------------------
def _gat2_kernel(adst_ref, asrct_ref, hsrc_ref, adj_ref, bias_ref,
                 bn_scale_ref, bn_shift_ref, ln_g_ref, ln_b_ref, out_ref,
                 m_ref, l_ref, acc_ref, *, negative_slope, ln_eps):
    j = pl.program_id(1)
    ns = jnp.float32(negative_slope)

    @pl.when(j == 0)
    def _():
        m_ref[...] = jnp.full_like(m_ref, -1e30)
        l_ref[...] = jnp.zeros_like(l_ref)
        acc_ref[...] = jnp.zeros_like(acc_ref)

    neg = (adj_ref[...].astype(jnp.float32) - 1.0) * jnp.float32(1e30)
    e = adst_ref[...] + asrct_ref[...]                           # [T,1]+[1,S] -> [T,S]
    e = jnp.maximum(e, ns * e) + neg                             # leaky ReLU + mask
    m_old = m_ref[...]
    m_new = jnp.maximum(m_old, jnp.max(e, axis=-1, keepdims=True))
    corr = jnp.exp(m_old - m_new)
    p = jnp.exp(e - m_new)
    l_ref[...] = corr * l_ref[...] + jnp.sum(p, axis=-1, keepdims=True)
    acc_ref[...] = corr * acc_ref[...] + jnp.dot(
        p, hsrc_ref[...].astype(jnp.float32), preferred_element_type=jnp.float32)
    m_ref[...] = m_new

    @pl.when(j == pl.num_programs(1) - 1)
    def _():
        h = acc_ref[...] * pl.reciprocal(l_ref[...], approx=True)
        h = jnp.maximum(h + bias_ref[...], 0.0)                  # bias + final ReLU
        h = h * bn_scale_ref[...] + bn_shift_ref[...]            # BatchNorm1d (eval)
        mu = jnp.mean(h, axis=-1, keepdims=True)                 # LayerNorm
        var = jnp.mean((h - mu) * (h - mu), axis=-1, keepdims=True)
        out_ref[...] = ((h - mu) * jax.lax.rsqrt(var + jnp.float32(ln_eps))
                        * ln_g_ref[...] + ln_b_ref[...])


def gat_layer2_norm(a_dst2, a_src2_t, hsrc2, adj, bias2, bn_scale, bn_shift,
                    ln_g, ln_b, *, negative_slope, ln_eps, tile_t, tile_s):
    n_pad, c2 = hsrc2.shape
    grid = (n_pad // tile_t, n_pad // tile_s)
    kern = functools.partial(_gat2_kernel, negative_slope=negative_slope,
                             ln_eps=ln_eps)
    vec = pl.BlockSpec((1, c2), lambda i, j: (0, 0))
    return pl.pallas_call(
        kern,
        out_shape=jax.ShapeDtypeStruct((n_pad, c2), jnp.float32),
        grid=grid,
        in_specs=[
            pl.BlockSpec((tile_t, 1), lambda i, j: (i, 0)),        # a_dst2 [N,1]
            pl.BlockSpec((1, tile_s), lambda i, j: (0, j)),        # a_src2^T [1,N]
            pl.BlockSpec((tile_s, c2), lambda i, j: (j, 0)),       # hsrc2 (bf16)
            pl.BlockSpec((tile_t, tile_s), lambda i, j: (i, j)),   # adjacency (int8)
            vec, vec, vec, vec, vec,    # bias2, bn_scale, bn_shift, ln_gamma, ln_beta
        ],
        out_specs=pl.BlockSpec((tile_t, c2), lambda i, j: (i, 0)),
        scratch_shapes=[pltpu.VMEM((tile_t, 1), jnp.float32),
                        pltpu.VMEM((tile_t, 1), jnp.float32),
                        pltpu.VMEM((tile_t, c2), jnp.float32)],
        compiler_params=_compiler_params(),
    )(a_dst2, a_src2_t, hsrc2, adj, bias2, bn_scale, bn_shift, ln_g, ln_b)


# ----------------------------------------------------------------------------
# Plain-JAX glue
# ----------------------------------------------------------------------------
def gat_forward(params, x, edge_index, *, nhid, noutput, nheads, negative_slope,
                tile_t=256, tile_s=512, bn_eps=1e-5, ln_eps=1e-5):
    del noutput  # implied by parameter shapes
    n, nfeat = x.shape
    blk = math.lcm(tile_t, tile_s)
    n_pad = ((n + blk - 1) // blk) * blk

    # Dense int8 adjacency mask adj[target, source] with self-loops (PyG default),
    # built directly in the streamed dtype (no f32-then-cast round trip).
    adj = jnp.zeros((n_pad, n_pad), jnp.int8)
    adj = adj.at[edge_index[1], edge_index[0]].set(1)
    diag = jnp.arange(n, dtype=jnp.int32)
    adj = adj.at[diag, diag].set(1)

    x_pad = jnp.zeros((n_pad, nfeat), jnp.float32).at[:n].set(x)

    # NOTE: inference mode -> F.dropout and GATConv attention dropout are identities.
    # Tiny layer-1 linear transform + per-node attention logits: left to XLA and
    # computed exactly once (hoisted out of the per-tile kernel loop).
    h1 = x_pad @ params["w1"]                                    # [Np, H*C] f32
    h1_heads = h1.reshape(n_pad, nheads, nhid)
    a_dst1 = jnp.einsum("nhc,hc->nh", h1_heads, params["att_dst1"])   # [Np, H]
    a_src1_t = jnp.einsum("nhc,hc->hn", h1_heads, params["att_src1"]) # [H, Np]
    hsrc1 = h1.astype(jnp.bfloat16)                              # bf16 HBM activation

    # Layer-2 attention vectors packed so the GAT-1 kernel can emit both logits
    # with a single tiny matmul: column 0 -> src logit, column 1 -> dst logit.
    att2 = jnp.stack([params["att_src2"][0], params["att_dst2"][0]], axis=1)  # [C2, 2]

    hsrc2, a2 = gat_layer1(a_dst1, a_src1_t, hsrc1, adj, params["bias1"],
                           params["w2"], att2, heads=nheads, out_ch=nhid,
                           negative_slope=negative_slope,
                           tile_t=tile_t, tile_s=tile_s)

    a_src2_t = jnp.transpose(a2[:, 0:1])                         # [1, Np]
    a_dst2 = a2[:, 1:2]                                          # [Np, 1]

    # Fold eval-mode BatchNorm1d (running stats) into a single scale/shift.
    bn_scale = params["bn_gamma"] * jax.lax.rsqrt(params["bn_var"] + bn_eps)
    bn_shift = params["bn_beta"] - params["bn_mean"] * bn_scale

    out = gat_layer2_norm(a_dst2, a_src2_t, hsrc2, adj, params["bias2"],
                          bn_scale, bn_shift, params["ln_gamma"], params["ln_beta"],
                          negative_slope=negative_slope, ln_eps=ln_eps,
                          tile_t=tile_t, tile_s=tile_s)
    return out[:n]


# ----------------------------------------------------------------------------
# Main
# ----------------------------------------------------------------------------
if __name__ == "__main__":
    N = 256          # nodes: 2 target tiles x 2 source tiles -> exercises the
    NFEAT = 16       # parallel target axis AND the online-softmax source axis.
    NHID = 8
    NHEADS = 4
    NOUTPUT = 16
    NEG_SLOPE = 0.2

    key = jax.random.PRNGKey(0)
    keys = jax.random.split(key, 10)

    params = {
        "w1": 0.1 * jax.random.normal(keys[0], (NFEAT, NHEADS * NHID), jnp.float32),
        "att_src1": 0.1 * jax.random.normal(keys[1], (NHEADS, NHID), jnp.float32),
        "att_dst1": 0.1 * jax.random.normal(keys[2], (NHEADS, NHID), jnp.float32),
        "bias1": 0.1 * jax.random.normal(keys[3], (1, NHEADS * NHID), jnp.float32),
        "w2": 0.1 * jax.random.normal(keys[4], (NHEADS * NHID, NOUTPUT), jnp.float32),
        "att_src2": 0.1 * jax.random.normal(keys[5], (1, NOUTPUT), jnp.float32),
        "att_dst2": 0.1 * jax.random.normal(keys[6], (1, NOUTPUT), jnp.float32),
        "bias2": 0.1 * jax.random.normal(keys[7], (1, NOUTPUT), jnp.float32),
        # BatchNorm1d(noutput): eval-mode running stats + affine params.
        "bn_gamma": jnp.ones((1, NOUTPUT), jnp.float32),
        "bn_beta": jnp.zeros((1, NOUTPUT), jnp.float32),
        "bn_mean": jnp.zeros((1, NOUTPUT), jnp.float32),
        "bn_var": jnp.ones((1, NOUTPUT), jnp.float32),
        # LayerNorm(noutput)
        "ln_gamma": jnp.ones((1, NOUTPUT), jnp.float32),
        "ln_beta": jnp.zeros((1, NOUTPUT), jnp.float32),
    }

    # Node features.
    x = jax.random.normal(keys[8], (N, NFEAT), jnp.float32)

    # Deterministic ring graph, both directions: edge_index is [2, E] (src, tgt).
    idx = jnp.arange(N, dtype=jnp.int32)
    src = jnp.concatenate([idx, (idx + 1) % N])
    tgt = jnp.concatenate([(idx + 1) % N, idx])
    edge_index = jnp.stack([src, tgt], axis=0)

    out = gat_forward(params, x, edge_index, nhid=NHID, noutput=NOUTPUT,
                      nheads=NHEADS, negative_slope=NEG_SLOPE,
                      tile_t=128, tile_s=128)   # grow per chip for big graphs
    out = jax.block_until_ready(out)

    assert out.shape == (N, NOUTPUT)
    assert bool(jnp.all(jnp.isfinite(out)))
    print("KERNEL_OK")
</pallas_src>

<mosaic_0001>
module attributes {stable_mosaic.version = 11 : i64} {
  func.func @_gat1_kernel(%arg0: i32, %arg1: i32, %arg2: memref<128x4xf32, #tpu.memory_space<vmem>>, %arg3: memref<4x128xf32, #tpu.memory_space<vmem>>, %arg4: memref<128x32xbf16, #tpu.memory_space<vmem>>, %arg5: memref<128x128xi8, #tpu.memory_space<vmem>>, %arg6: memref<1x32xf32, #tpu.memory_space<vmem>>, %arg7: memref<32x16xf32, #tpu.memory_space<vmem>>, %arg8: memref<16x2xf32, #tpu.memory_space<vmem>>, %arg9: memref<128x16xbf16, #tpu.memory_space<vmem>>, %arg10: memref<128x2xf32, #tpu.memory_space<vmem>>, %arg11: memref<128x4xf32, #tpu.memory_space<vmem>>, %arg12: memref<128x4xf32, #tpu.memory_space<vmem>>, %arg13: memref<128x32xf32, #tpu.memory_space<vmem>>) attributes {dimension_semantics = [#tpu.dimension_semantics<parallel>, #tpu.dimension_semantics<arbitrary>], iteration_bounds = array<i64: 2, 2>, scalar_prefetch = 0 : i64, scratch_operands = 3 : i64, tpu.core_type = #tpu.core_type<tc>, window_params = [{transform_indices = @transform_0, window_bounds = array<i64: 128, 4>}, {transform_indices = @transform_1, window_bounds = array<i64: 4, 128>}, {transform_indices = @transform_2, window_bounds = array<i64: 128, 32>}, {transform_indices = @transform_3, window_bounds = array<i64: 128, 128>}, {pipeline_mode = #tpu.pipeline_mode<synchronous>, transform_indices = @transform_4, window_bounds = array<i64: 1, 32>}, {pipeline_mode = #tpu.pipeline_mode<synchronous>, transform_indices = @transform_5, window_bounds = array<i64: 32, 16>}, {pipeline_mode = #tpu.pipeline_mode<synchronous>, transform_indices = @transform_6, window_bounds = array<i64: 16, 2>}, {transform_indices = @transform_7, window_bounds = array<i64: 128, 16>}, {transform_indices = @transform_8, window_bounds = array<i64: 128, 2>}]} {
    %c0_i32 = arith.constant 0 : i32
    %0 = arith.cmpi eq, %arg1, %c0_i32 : i32
    %1 = arith.extui %0 : i1 to i32
    %c0_i32_0 = arith.constant 0 : i32
    %2 = arith.cmpi ne, %1, %c0_i32_0 : i32
    scf.if %2 {
      %cst_68 = arith.constant -1.000000e+30 : f32
      %144 = vector.broadcast %cst_68 : f32 to vector<128x4xf32>
      %c0_69 = arith.constant 0 : index
      %c0_70 = arith.constant 0 : index
      %145 = vector.load %arg11[%c0_69, %c0_70] : memref<128x4xf32, #tpu.memory_space<vmem>>, vector<128x4xf32>
      tpu.vector_store %arg11[%c0_69, %c0_70], %144 {strides = array<i32>} : memref<128x4xf32, #tpu.memory_space<vmem>>, vector<128x4xf32>,
      %cst_71 = arith.constant 0.000000e+00 : f32
      %146 = vector.broadcast %cst_71 : f32 to vector<128x4xf32>
      %c0_72 = arith.constant 0 : index
      %c0_73 = arith.constant 0 : index
      %147 = vector.load %arg12[%c0_72, %c0_73] : memref<128x4xf32, #tpu.memory_space<vmem>>, vector<128x4xf32>
      tpu.vector_store %arg12[%c0_72, %c0_73], %146 {strides = array<i32>} : memref<128x4xf32, #tpu.memory_space<vmem>>, vector<128x4xf32>,
      %cst_74 = arith.constant 0.000000e+00 : f32
      %148 = vector.broadcast %cst_74 : f32 to vector<128x32xf32>
      %c0_75 = arith.constant 0 : index
      %c0_76 = arith.constant 0 : index
      %149 = vector.load %arg13[%c0_75, %c0_76] : memref<128x32xf32, #tpu.memory_space<vmem>>, vector<128x32xf32>
      tpu.vector_store %arg13[%c0_75, %c0_76], %148 {strides = array<i32>} : memref<128x32xf32, #tpu.memory_space<vmem>>, vector<128x32xf32>,
    } else {
    }
    %c0 = arith.constant 0 : index
    %c0_1 = arith.constant 0 : index
    %3 = vector.load %arg5[%c0, %c0_1] : memref<128x128xi8, #tpu.memory_space<vmem>>, vector<128x128xi8>
    %4 = arith.sitofp %3 : vector<128x128xi8> to vector<128x128xf32>
    %cst = arith.constant 1.000000e+00 : f32
    %5 = vector.broadcast %cst : f32 to vector<128x128xf32>
    %6 = arith.subf %4, %5 : vector<128x128xf32>
    %cst_2 = arith.constant 1.000000e+30 : f32
    %7 = vector.broadcast %cst_2 : f32 to vector<128x128xf32>
    %8 = arith.mulf %6, %7 : vector<128x128xf32>
    %c0_3 = arith.constant 0 : index
    %c0_4 = arith.constant 0 : index
    %9 = vector.load %arg2[%c0_3, %c0_4] : memref<128x4xf32, #tpu.memory_space<vmem>>, vector<128x4xf32>
    %c0_5 = arith.constant 0 : index
    %c0_6 = arith.constant 0 : index
    %10 = vector.load %arg3[%c0_5, %c0_6] : memref<4x128xf32, #tpu.memory_space<vmem>>, vector<4x128xf32>
    %c0_7 = arith.constant 0 : index
    %c0_8 = arith.constant 0 : index
    %11 = vector.load %arg4[%c0_7, %c0_8] : memref<128x32xbf16, #tpu.memory_space<vmem>>, vector<128x32xbf16>
    %12 = arith.extf %11 : vector<128x32xbf16> to vector<128x32xf32>
    %13 = vector.extract_strided_slice %9 {offsets = [0, 0], sizes = [128, 1], strides = [1, 1]} : vector<128x4xf32> to vector<128x1xf32>
    %14 = vector.extract_strided_slice %10 {offsets = [0, 0], sizes = [1, 128], strides = [1, 1]} : vector<4x128xf32> to vector<1x128xf32>
    %15 = vector.broadcast %13 : vector<128x1xf32> to vector<128x128xf32>
    %16 = vector.broadcast %14 : vector<1x128xf32> to vector<128x128xf32>
    %17 = arith.addf %15, %16 : vector<128x128xf32>
    %cst_9 = arith.constant 2.000000e-01 : f32
    %18 = vector.broadcast %cst_9 : f32 to vector<128x128xf32>
    %19 = arith.mulf %18, %17 : vector<128x128xf32>
    %20 = arith.maximumf %17, %19 : vector<128x128xf32>
    %21 = arith.addf %20, %8 : vector<128x128xf32>
    %c0_10 = arith.constant 0 : index
    %c0_11 = arith.constant 0 : index
    %22 = vector.load %arg11[%c0_10, %c0_11] : memref<128x4xf32, #tpu.memory_space<vmem>>, vector<128x1xf32>
    %cst_12 = arith.constant dense<0xFF800000> : vector<128xf32>
    %23 = vector.multi_reduction <maximumf>, %21, %cst_12 [1] : vector<128x128xf32> to vector<128xf32>
    %24 = vector.shape_cast %23 : vector<128xf32> to vector<128x1xf32>
    %25 = arith.maximumf %22, %24 : vector<128x1xf32>
    %26 = arith.subf %22, %25 : vector<128x1xf32>
    %27 = math.exp %26 : vector<128x1xf32>
    %28 = vector.broadcast %25 : vector<128x1xf32> to vector<128x128xf32>
    %29 = arith.subf %21, %28 : vector<128x128xf32>
    %30 = math.exp %29 : vector<128x128xf32>
    %c0_13 = arith.constant 0 : index
    %c0_14 = arith.constant 0 : index
    %31 = vector.load %arg12[%c0_13, %c0_14] : memref<128x4xf32, #tpu.memory_space<vmem>>, vector<128x1xf32>
    %32 = arith.mulf %27, %31 : vector<128x1xf32>
    %cst_15 = arith.constant dense<0.000000e+00> : vector<128xf32>
    %33 = vector.multi_reduction <add>, %30, %cst_15 [1] : vector<128x128xf32> to vector<128xf32>
    %34 = vector.shape_cast %33 : vector<128xf32> to vector<128x1xf32>
    %35 = arith.addf %32, %34 : vector<128x1xf32>
    %c0_16 = arith.constant 0 : index
    %c0_17 = arith.constant 0 : index
    %36 = vector.load %arg12[%c0_16, %c0_17] : memref<128x4xf32, #tpu.memory_space<vmem>>, vector<128x1xf32>
    tpu.vector_store %arg12[%c0_16, %c0_17], %35 {strides = array<i32>} : memref<128x4xf32, #tpu.memory_space<vmem>>, vector<128x1xf32>,
    %c0_18 = arith.constant 0 : index
    %c0_19 = arith.constant 0 : index
    %37 = vector.load %arg13[%c0_18, %c0_19] : memref<128x32xf32, #tpu.memory_space<vmem>>, vector<128x8xf32>
    %38 = vector.broadcast %27 : vector<128x1xf32> to vector<128x8xf32>
    %39 = arith.mulf %38, %37 : vector<128x8xf32>
    %40 = vector.extract_strided_slice %12 {offsets = [0, 0], sizes = [128, 8], strides = [1, 1]} : vector<128x32xf32> to vector<128x8xf32>
    %cst_20 = arith.constant dense<0.000000e+00> : vector<128x8xf32>
    %41 = tpu.matmul %30, %40, %cst_20 {dimension_numbers = #tpu.dot_dimension_numbers<[1], [0], [0], [1], [0, 0, 1, 1], [], []>} : vector<128x128xf32>, vector<128x8xf32>, vector<128x8xf32> -> vector<128x8xf32>
    %42 = arith.addf %39, %41 : vector<128x8xf32>
    %c0_21 = arith.constant 0 : index
    %c0_22 = arith.constant 0 : index
    %43 = vector.load %arg13[%c0_21, %c0_22] : memref<128x32xf32, #tpu.memory_space<vmem>>, vector<128x8xf32>
    tpu.vector_store %arg13[%c0_21, %c0_22], %42 {strides = array<i32>} : memref<128x32xf32, #tpu.memory_space<vmem>>, vector<128x8xf32>,
    %c0_23 = arith.constant 0 : index
    %c0_24 = arith.constant 0 : index
    %44 = vector.load %arg11[%c0_23, %c0_24] : memref<128x4xf32, #tpu.memory_space<vmem>>, vector<128x1xf32>
    tpu.vector_store %arg11[%c0_23, %c0_24], %25 {strides = array<i32>} : memref<128x4xf32, #tpu.memory_space<vmem>>, vector<128x1xf32>,
    %45 = vector.extract_strided_slice %9 {offsets = [0, 1], sizes = [128, 1], strides = [1, 1]} : vector<128x4xf32> to vector<128x1xf32>
    %46 = vector.extract_strided_slice %10 {offsets = [1, 0], sizes = [1, 128], strides = [1, 1]} : vector<4x128xf32> to vector<1x128xf32>
    %47 = vector.broadcast %45 : vector<128x1xf32> to vector<128x128xf32>
    %48 = vector.broadcast %46 : vector<1x128xf32> to vector<128x128xf32>
    %49 = arith.addf %47, %48 : vector<128x128xf32>
    %cst_25 = arith.constant 2.000000e-01 : f32
    %50 = vector.broadcast %cst_25 : f32 to vector<128x128xf32>
    %51 = arith.mulf %50, %49 : vector<128x128xf32>
    %52 = arith.maximumf %49, %51 : vector<128x128xf32>
    %53 = arith.addf %52, %8 : vector<128x128xf32>
    %c0_26 = arith.constant 0 : index
    %c1 = arith.constant 1 : index
    %54 = vector.load %arg11[%c0_26, %c1] : memref<128x4xf32, #tpu.memory_space<vmem>>, vector<128x1xf32>
    %cst_27 = arith.constant dense<0xFF800000> : vector<128xf32>
    %55 = vector.multi_reduction <maximumf>, %53, %cst_27 [1] : vector<128x128xf32> to vector<128xf32>
    %56 = vector.shape_cast %55 : vector<128xf32> to vector<128x1xf32>
    %57 = arith.maximumf %54, %56 : vector<128x1xf32>
    %58 = arith.subf %54, %57 : vector<128x1xf32>
    %59 = math.exp %58 : vector<128x1xf32>
    %60 = vector.broadcast %57 : vector<128x1xf32> to vector<128x128xf32>
    %61 = arith.subf %53, %60 : vector<128x128xf32>
    %62 = math.exp %61 : vector<128x128xf32>
    %c0_28 = arith.constant 0 : index
    %c1_29 = arith.constant 1 : index
    %63 = vector.load %arg12[%c0_28, %c1_29] : memref<128x4xf32, #tpu.memory_space<vmem>>, vector<128x1xf32>
    %64 = arith.mulf %59, %63 : vector<128x1xf32>
    %cst_30 = arith.constant dense<0.000000e+00> : vector<128xf32>
    %65 = vector.multi_reduction <add>, %62, %cst_30 [1] : vector<128x128xf32> to vector<128xf32>
    %66 = vector.shape_cast %65 : vector<128xf32> to vector<128x1xf32>
    %67 = arith.addf %64, %66 : vector<128x1xf32>
    %c0_31 = arith.constant 0 : index
    %c1_32 = arith.constant 1 : index
    %68 = vector.load %arg12[%c0_31, %c1_32] : memref<128x4xf32, #tpu.memory_space<vmem>>, vector<128x1xf32>
    tpu.vector_store %arg12[%c0_31, %c1_32], %67 {strides = array<i32>} : memref<128x4xf32, #tpu.memory_space<vmem>>, vector<128x1xf32>,
    %c0_33 = arith.constant 0 : index
    %c8 = arith.constant 8 : index
    %69 = vector.load %arg13[%c0_33, %c8] : memref<128x32xf32, #tpu.memory_space<vmem>>, vector<128x8xf32>
    %70 = vector.broadcast %59 : vector<128x1xf32> to vector<128x8xf32>
    %71 = arith.mulf %70, %69 : vector<128x8xf32>
    %72 = vector.extract_strided_slice %12 {offsets = [0, 8], sizes = [128, 8], strides = [1, 1]} : vector<128x32xf32> to vector<128x8xf32>
    %cst_34 = arith.constant dense<0.000000e+00> : vector<128x8xf32>
    %73 = tpu.matmul %62, %72, %cst_34 {dimension_numbers = #tpu.dot_dimension_numbers<[1], [0], [0], [1], [0, 0, 1, 1], [], []>} : vector<128x128xf32>, vector<128x8xf32>, vector<128x8xf32> -> vector<128x8xf32>
    %74 = arith.addf %71, %73 : vector<128x8xf32>
    %c0_35 = arith.constant 0 : index
    %c8_36 = arith.constant 8 : index
    %75 = vector.load %arg13[%c0_35, %c8_36] : memref<128x32xf32, #tpu.memory_space<vmem>>, vector<128x8xf32>
    tpu.vector_store %arg13[%c0_35, %c8_36], %74 {strides = array<i32>} : memref<128x32xf32, #tpu.memory_space<vmem>>, vector<128x8xf32>,
    %c0_37 = arith.constant 0 : index
    %c1_38 = arith.constant 1 : index
    %76 = vector.load %arg11[%c0_37, %c1_38] : memref<128x4xf32, #tpu.memory_space<vmem>>, vector<128x1xf32>
    tpu.vector_store %arg11[%c0_37, %c1_38], %57 {strides = array<i32>} : memref<128x4xf32, #tpu.memory_space<vmem>>, vector<128x1xf32>,
    %77 = vector.extract_strided_slice %9 {offsets = [0, 2], sizes = [128, 1], strides = [1, 1]} : vector<128x4xf32> to vector<128x1xf32>
    %78 = vector.extract_strided_slice %10 {offsets = [2, 0], sizes = [1, 128], strides = [1, 1]} : vector<4x128xf32> to vector<1x128xf32>
    %79 = vector.broadcast %77 : vector<128x1xf32> to vector<128x128xf32>
    %80 = vector.broadcast %78 : vector<1x128xf32> to vector<128x128xf32>
    %81 = arith.addf %79, %80 : vector<128x128xf32>
    %cst_39 = arith.constant 2.000000e-01 : f32
    %82 = vector.broadcast %cst_39 : f32 to vector<128x128xf32>
    %83 = arith.mulf %82, %81 : vector<128x128xf32>
    %84 = arith.maximumf %81, %83 : vector<128x128xf32>
    %85 = arith.addf %84, %8 : vector<128x128xf32>
    %c0_40 = arith.constant 0 : index
    %c2 = arith.constant 2 : index
    %86 = vector.load %arg11[%c0_40, %c2] : memref<128x4xf32, #tpu.memory_space<vmem>>, vector<128x1xf32>
    %cst_41 = arith.constant dense<0xFF800000> : vector<128xf32>
    %87 = vector.multi_reduction <maximumf>, %85, %cst_41 [1] : vector<128x128xf32> to vector<128xf32>
    %88 = vector.shape_cast %87 : vector<128xf32> to vector<128x1xf32>
    %89 = arith.maximumf %86, %88 : vector<128x1xf32>
    %90 = arith.subf %86, %89 : vector<128x1xf32>
    %91 = math.exp %90 : vector<128x1xf32>
    %92 = vector.broadcast %89 : vector<128x1xf32> to vector<128x128xf32>
    %93 = arith.subf %85, %92 : vector<128x128xf32>
    %94 = math.exp %93 : vector<128x128xf32>
    %c0_42 = arith.constant 0 : index
    %c2_43 = arith.constant 2 : index
    %95 = vector.load %arg12[%c0_42, %c2_43] : memref<128x4xf32, #tpu.memory_space<vmem>>, vector<128x1xf32>
    %96 = arith.mulf %91, %95 : vector<128x1xf32>
    %cst_44 = arith.constant dense<0.000000e+00> : vector<128xf32>
    %97 = vector.multi_reduction <add>, %94, %cst_44 [1] : vector<128x128xf32> to vector<128xf32>
    %98 = vector.shape_cast %97 : vector<128xf32> to vector<128x1xf32>
    %99 = arith.addf %96, %98 : vector<128x1xf32>
    %c0_45 = arith.constant 0 : index
    %c2_46 = arith.constant 2 : index
    %100 = vector.load %arg12[%c0_45, %c2_46] : memref<128x4xf32, #tpu.memory_space<vmem>>, vector<128x1xf32>
    tpu.vector_store %arg12[%c0_45, %c2_46], %99 {strides = array<i32>} : memref<128x4xf32, #tpu.memory_space<vmem>>, vector<128x1xf32>,
    %c0_47 = arith.constant 0 : index
    %c16 = arith.constant 16 : index
    %101 = vector.load %arg13[%c0_47, %c16] : memref<128x32xf32, #tpu.memory_space<vmem>>, vector<128x8xf32>
    %102 = vector.broadcast %91 : vector<128x1xf32> to vector<128x8xf32>
    %103 = arith.mulf %102, %101 : vector<128x8xf32>
    %104 = vector.extract_strided_slice %12 {offsets = [0, 16], sizes = [128, 8], strides = [1, 1]} : vector<128x32xf32> to vector<128x8xf32>
    %cst_48 = arith.constant dense<0.000000e+00> : vector<128x8xf32>
    %105 = tpu.matmul %94, %104, %cst_48 {dimension_numbers = #tpu.dot_dimension_numbers<[1], [0], [0], [1], [0, 0, 1, 1], [], []>} : vector<128x128xf32>, vector<128x8xf32>, vector<128x8xf32> -> vector<128x8xf32>
    %106 = arith.addf %103, %105 : vector<128x8xf32>
    %c0_49 = arith.constant 0 : index
    %c16_50 = arith.constant 16 : index
    %107 = vector.load %arg13[%c0_49, %c16_50] : memref<128x32xf32, #tpu.memory_space<vmem>>, vector<128x8xf32>
    tpu.vector_store %arg13[%c0_49, %c16_50], %106 {strides = array<i32>} : memref<128x32xf32, #tpu.memory_space<vmem>>, vector<128x8xf32>,
    %c0_51 = arith.constant 0 : index
    %c2_52 = arith.constant 2 : index
    %108 = vector.load %arg11[%c0_51, %c2_52] : memref<128x4xf32, #tpu.memory_space<vmem>>, vector<128x1xf32>
    tpu.vector_store %arg11[%c0_51, %c2_52], %89 {strides = array<i32>} : memref<128x4xf32, #tpu.memory_space<vmem>>, vector<128x1xf32>,
    %109 = vector.extract_strided_slice %9 {offsets = [0, 3], sizes = [128, 1], strides = [1, 1]} : vector<128x4xf32> to vector<128x1xf32>
    %110 = vector.extract_strided_slice %10 {offsets = [3, 0], sizes = [1, 128], strides = [1, 1]} : vector<4x128xf32> to vector<1x128xf32>
    %111 = vector.broadcast %109 : vector<128x1xf32> to vector<128x128xf32>
    %112 = vector.broadcast %110 : vector<1x128xf32> to vector<128x128xf32>
    %113 = arith.addf %111, %112 : vector<128x128xf32>
    %cst_53 = arith.constant 2.000000e-01 : f32
    %114 = vector.broadcast %cst_53 : f32 to vector<128x128xf32>
    %115 = arith.mulf %114, %113 : vector<128x128xf32>
    %116 = arith.maximumf %113, %115 : vector<128x128xf32>
    %117 = arith.addf %116, %8 : vector<128x128xf32>
    %c0_54 = arith.constant 0 : index
    %c3 = arith.constant 3 : index
    %118 = vector.load %arg11[%c0_54, %c3] : memref<128x4xf32, #tpu.memory_space<vmem>>, vector<128x1xf32>
    %cst_55 = arith.constant dense<0xFF800000> : vector<128xf32>
    %119 = vector.multi_reduction <maximumf>, %117, %cst_55 [1] : vector<128x128xf32> to vector<128xf32>
    %120 = vector.shape_cast %119 : vector<128xf32> to vector<128x1xf32>
    %121 = arith.maximumf %118, %120 : vector<128x1xf32>
    %122 = arith.subf %118, %121 : vector<128x1xf32>
    %123 = math.exp %122 : vector<128x1xf32>
    %124 = vector.broadcast %121 : vector<128x1xf32> to vector<128x128xf32>
    %125 = arith.subf %117, %124 : vector<128x128xf32>
    %126 = math.exp %125 : vector<128x128xf32>
    %c0_56 = arith.constant 0 : index
    %c3_57 = arith.constant 3 : index
    %127 = vector.load %arg12[%c0_56, %c3_57] : memref<128x4xf32, #tpu.memory_space<vmem>>, vector<128x1xf32>
    %128 = arith.mulf %123, %127 : vector<128x1xf32>
    %cst_58 = arith.constant dense<0.000000e+00> : vector<128xf32>
    %129 = vector.multi_reduction <add>, %126, %cst_58 [1] : vector<128x128xf32> to vector<128xf32>
    %130 = vector.shape_cast %129 : vector<128xf32> to vector<128x1xf32>
    %131 = arith.addf %128, %130 : vector<128x1xf32>
    %c0_59 = arith.constant 0 : index
    %c3_60 = arith.constant 3 : index
    %132 = vector.load %arg12[%c0_59, %c3_60] : memref<128x4xf32, #tpu.memory_space<vmem>>, vector<128x1xf32>
    tpu.vector_store %arg12[%c0_59, %c3_60], %131 {strides = array<i32>} : memref<128x4xf32, #tpu.memory_space<vmem>>, vector<128x1xf32>,
    %c0_61 = arith.constant 0 : index
    %c24 = arith.constant 24 : index
    %133 = vector.load %arg13[%c0_61, %c24] : memref<128x32xf32, #tpu.memory_space<vmem>>, vector<128x8xf32>
    %134 = vector.broadcast %123 : vector<128x1xf32> to vector<128x8xf32>
    %135 = arith.mulf %134, %133 : vector<128x8xf32>
    %136 = vector.extract_strided_slice %12 {offsets = [0, 24], sizes = [128, 8], strides = [1, 1]} : vector<128x32xf32> to vector<128x8xf32>
    %cst_62 = arith.constant dense<0.000000e+00> : vector<128x8xf32>
    %137 = tpu.matmul %126, %136, %cst_62 {dimension_numbers = #tpu.dot_dimension_numbers<[1], [0], [0], [1], [0, 0, 1, 1], [], []>} : vector<128x128xf32>, vector<128x8xf32>, vector<128x8xf32> -> vector<128x8xf32>
    %138 = arith.addf %135, %137 : vector<128x8xf32>
    %c0_63 = arith.constant 0 : index
    %c24_64 = arith.constant 24 : index
    %139 = vector.load %arg13[%c0_63, %c24_64] : memref<128x32xf32, #tpu.memory_space<vmem>>, vector<128x8xf32>
    tpu.vector_store %arg13[%c0_63, %c24_64], %138 {strides = array<i32>} : memref<128x32xf32, #tpu.memory_space<vmem>>, vector<128x8xf32>,
    %c0_65 = arith.constant 0 : index
    %c3_66 = arith.constant 3 : index
    %140 = vector.load %arg11[%c0_65, %c3_66] : memref<128x4xf32, #tpu.memory_space<vmem>>, vector<128x1xf32>
    tpu.vector_store %arg11[%c0_65, %c3_66], %121 {strides = array<i32>} : memref<128x4xf32, #tpu.memory_space<vmem>>, vector<128x1xf32>,
    %c1_i32 = arith.constant 1 : i32
    %141 = arith.cmpi eq, %arg1, %c1_i32 : i32
    %142 = arith.extui %141 : i1 to i32
    %c0_i32_67 = arith.constant 0 : i32
    %143 = arith.cmpi ne, %142, %c0_i32_67 : i32
    scf.if %143 {
      %c0_68 = arith.constant 0 : index
      %c0_69 = arith.constant 0 : index
      %144 = vector.load %arg13[%c0_68, %c0_69] : memref<128x32xf32, #tpu.memory_space<vmem>>, vector<128x8xf32>
      %c0_70 = arith.constant 0 : index
      %c0_71 = arith.constant 0 : index
      %145 = vector.load %arg12[%c0_70, %c0_71] : memref<128x4xf32, #tpu.memory_space<vmem>>, vector<128x1xf32>
      %146 = tpu.reciprocal %145 {approx = true} : vector<128x1xf32> -> vector<128x1xf32>
      %147 = vector.broadcast %146 : vector<128x1xf32> to vector<128x8xf32>
      %148 = arith.mulf %144, %147 : vector<128x8xf32>
      %c0_72 = arith.constant 0 : index
      %c0_73 = arith.constant 0 : index
      %149 = vector.load %arg13[%c0_72, %c0_73] : memref<128x32xf32, #tpu.memory_space<vmem>>, vector<128x8xf32>
      tpu.vector_store %arg13[%c0_72, %c0_73], %148 {strides = array<i32>} : memref<128x32xf32, #tpu.memory_space<vmem>>, vector<128x8xf32>,
      %c0_74 = arith.constant 0 : index
      %c8_75 = arith.constant 8 : index
      %150 = vector.load %arg13[%c0_74, %c8_75] : memref<128x32xf32, #tpu.memory_space<vmem>>, vector<128x8xf32>
      %c0_76 = arith.constant 0 : index
      %c1_77 = arith.constant 1 : index
      %151 = vector.load %arg12[%c0_76, %c1_77] : memref<128x4xf32, #tpu.memory_space<vmem>>, vector<128x1xf32>
      %152 = tpu.reciprocal %151 {approx = true} : vector<128x1xf32> -> vector<128x1xf32>
      %153 = vector.broadcast %152 : vector<128x1xf32> to vector<128x8xf32>
      %154 = arith.mulf %150, %153 : vector<128x8xf32>
      %c0_78 = arith.constant 0 : index
      %c8_79 = arith.constant 8 : index
      %155 = vector.load %arg13[%c0_78, %c8_79] : memref<128x32xf32, #tpu.memory_space<vmem>>, vector<128x8xf32>
      tpu.vector_store %arg13[%c0_78, %c8_79], %154 {strides = array<i32>} : memref<128x32xf32, #tpu.memory_space<vmem>>, vector<128x8xf32>,
      %c0_80 = arith.constant 0 : index
      %c16_81 = arith.constant 16 : index
      %156 = vector.load %arg13[%c0_80, %c16_81] : memref<128x32xf32, #tpu.memory_space<vmem>>, vector<128x8xf32>
      %c0_82 = arith.constant 0 : index
      %c2_83 = arith.constant 2 : index
      %157 = vector.load %arg12[%c0_82, %c2_83] : memref<128x4xf32, #tpu.memory_space<vmem>>, vector<128x1xf32>
      %158 = tpu.reciprocal %157 {approx = true} : vector<128x1xf32> -> vector<128x1xf32>
      %159 = vector.broadcast %158 : vector<128x1xf32> to vector<128x8xf32>
      %160 = arith.mulf %156, %159 : vector<128x8xf32>
      %c0_84 = arith.constant 0 : index
      %c16_85 = arith.constant 16 : index
      %161 = vector.load %arg13[%c0_84, %c16_85] : memref<128x32xf32, #tpu.memory_space<vmem>>, vector<128x8xf32>
      tpu.vector_store %arg13[%c0_84, %c16_85], %160 {strides = array<i32>} : memref<128x32xf32, #tpu.memory_space<vmem>>, vector<128x8xf32>,
      %c0_86 = arith.constant 0 : index
      %c24_87 = arith.constant 24 : index
      %162 = vector.load %arg13[%c0_86, %c24_87] : memref<128x32xf32, #tpu.memory_space<vmem>>, vector<128x8xf32>
      %c0_88 = arith.constant 0 : index
      %c3_89 = arith.constant 3 : index
      %163 = vector.load %arg12[%c0_88, %c3_89] : memref<128x4xf32, #tpu.memory_space<vmem>>, vector<128x1xf32>
      %164 = tpu.reciprocal %163 {approx = true} : vector<128x1xf32> -> vector<128x1xf32>
      %165 = vector.broadcast %164 : vector<128x1xf32> to vector<128x8xf32>
      %166 = arith.mulf %162, %165 : vector<128x8xf32>
      %c0_90 = arith.constant 0 : index
      %c24_91 = arith.constant 24 : index
      %167 = vector.load %arg13[%c0_90, %c24_91] : memref<128x32xf32, #tpu.memory_space<vmem>>, vector<128x8xf32>
      tpu.vector_store %arg13[%c0_90, %c24_91], %166 {strides = array<i32>} : memref<128x32xf32, #tpu.memory_space<vmem>>, vector<128x8xf32>,
      %c0_92 = arith.constant 0 : index
      %c0_93 = arith.constant 0 : index
      %168 = vector.load %arg13[%c0_92, %c0_93] : memref<128x32xf32, #tpu.memory_space<vmem>>, vector<128x32xf32>
      %c0_94 = arith.constant 0 : index
      %c0_95 = arith.constant 0 : index
      %169 = vector.load %arg6[%c0_94, %c0_95] : memref<1x32xf32, #tpu.memory_space<vmem>>, vector<1x32xf32>
      %170 = vector.broadcast %169 : vector<1x32xf32> to vector<128x32xf32>
      %171 = arith.addf %168, %170 : vector<128x32xf32>
      %cst_96 = arith.constant 0.000000e+00 : f32
      %172 = vector.broadcast %cst_96 : f32 to vector<128x32xf32>
      %173 = arith.maximumf %171, %172 : vector<128x32xf32>
      %c0_97 = arith.constant 0 : index
      %c0_98 = arith.constant 0 : index
      %174 = vector.load %arg7[%c0_97, %c0_98] : memref<32x16xf32, #tpu.memory_space<vmem>>, vector<32x16xf32>
      %cst_99 = arith.constant dense<0.000000e+00> : vector<128x16xf32>
      %175 = tpu.matmul %173, %174, %cst_99 {dimension_numbers = #tpu.dot_dimension_numbers<[1], [0], [0], [1], [0, 0, 1, 1], [], []>} : vector<128x32xf32>, vector<32x16xf32>, vector<128x16xf32> -> vector<128x16xf32>
      %176 = arith.truncf %175 : vector<128x16xf32> to vector<128x16xbf16>
      %c0_100 = arith.constant 0 : index
      %c0_101 = arith.constant 0 : index
      %177 = vector.load %arg9[%c0_100, %c0_101] : memref<128x16xbf16, #tpu.memory_space<vmem>>, vector<128x16xbf16>
      tpu.vector_store %arg9[%c0_100, %c0_101], %176 {strides = array<i32>} : memref<128x16xbf16, #tpu.memory_space<vmem>>, vector<128x16xbf16>,
      %c0_102 = arith.constant 0 : index
      %c0_103 = arith.constant 0 : index
      %178 = vector.load %arg8[%c0_102, %c0_103] : memref<16x2xf32, #tpu.memory_space<vmem>>, vector<16x2xf32>
      %cst_104 = arith.constant dense<0.000000e+00> : vector<128x2xf32>
      %179 = tpu.matmul %175, %178, %cst_104 {dimension_numbers = #tpu.dot_dimension_numbers<[1], [0], [0], [1], [0, 0, 1, 1], [], []>} : vector<128x16xf32>, vector<16x2xf32>, vector<128x2xf32> -> vector<128x2xf32>
      %c0_105 = arith.constant 0 : index
      %c0_106 = arith.constant 0 : index
      %180 = vector.load %arg10[%c0_105, %c0_106] : memref<128x2xf32, #tpu.memory_space<vmem>>, vector<128x2xf32>
      tpu.vector_store %arg10[%c0_105, %c0_106], %179 {strides = array<i32>} : memref<128x2xf32, #tpu.memory_space<vmem>>, vector<128x2xf32>,
    } else {
    }
    return
  }
  func.func @transform_0(%arg0: i32, %arg1: i32) -> (i32, i32) {
    %c0_i32 = arith.constant 0 : i32
    %c0_i32_0 = arith.constant 0 : i32
    return %arg0, %c0_i32 : i32, i32
  }
  func.func @transform_1(%arg0: i32, %arg1: i32) -> (i32, i32) {
    %c0_i32 = arith.constant 0 : i32
    %c0_i32_0 = arith.constant 0 : i32
    return %c0_i32, %arg1 : i32, i32
  }
  func.func @transform_2(%arg0: i32, %arg1: i32) -> (i32, i32) {
    %c0_i32 = arith.constant 0 : i32
    %c0_i32_0 = arith.constant 0 : i32
    return %arg1, %c0_i32 : i32, i32
  }
  func.func @transform_3(%arg0: i32, %arg1: i32) -> (i32, i32) {
    %c0_i32 = arith.constant 0 : i32
    return %arg0, %arg1 : i32, i32
  }
  func.func @transform_4(%arg0: i32, %arg1: i32) -> (i32, i32) {
    %c0_i32 = arith.constant 0 : i32
    %c0_i32_0 = arith.constant 0 : i32
    %c0_i32_1 = arith.constant 0 : i32
    return %c0_i32, %c0_i32_0 : i32, i32
  }
  func.func @transform_5(%arg0: i32, %arg1: i32) -> (i32, i32) {
    %c0_i32 = arith.constant 0 : i32
    %c0_i32_0 = arith.constant 0 : i32
    %c0_i32_1 = arith.constant 0 : i32
    return %c0_i32, %c0_i32_0 : i32, i32
  }
  func.func @transform_6(%arg0: i32, %arg1: i32) -> (i32, i32) {
    %c0_i32 = arith.constant 0 : i32
    %c0_i32_0 = arith.constant 0 : i32
    %c0_i32_1 = arith.constant 0 : i32
    return %c0_i32, %c0_i32_0 : i32, i32
  }
  func.func @transform_7(%arg0: i32, %arg1: i32) -> (i32, i32) {
    %c0_i32 = arith.constant 0 : i32
    %c0_i32_0 = arith.constant 0 : i32
    return %arg0, %c0_i32 : i32, i32
  }
  func.func @transform_8(%arg0: i32, %arg1: i32) -> (i32, i32) {
    %c0_i32 = arith.constant 0 : i32
    %c0_i32_0 = arith.constant 0 : i32
    return %arg0, %c0_i32 : i32, i32
  }
}

</mosaic_0001>

<bundles_post_ra>
// kernel: tpu_custom_call.1
= control target key start
LH: loop header
LB: loop body
LE: loop exit
PB: predicated region body
PF: predicated region fallthrough
CT: control target
= control target key end

     0   :  { %s9354_s0 = inlined_call_operand.vmem [shape: f32[256,4], index: 0, kind: input, shape index: {}]   ;;  %s9355_s1 = inlined_call_operand.vmem [shape: f32[4,256], index: 1, kind: input, shape index: {}]   ;;  %s9356_s2 = inlined_call_operand.vmem [shape: bf16[256,32], index: 2, kind: input, shape index: {}]   ;;  %s9357_s3 = inlined_call_operand.vmem [shape: s8[256,256], index: 3, kind: input, shape index: {}]   ;;  %s9358_s4 = inlined_call_operand.vmem [shape: f32[1,32], index: 4, kind: input, shape index: {}]   ;;  %s9359_s5 = inlined_call_operand.vmem [shape: f32[32,16], index: 5, kind: input, shape index: {}]   ;;  %s9360_s6 = inlined_call_operand.vmem [shape: f32[16,2], index: 6, kind: input, shape index: {}]   ;;  %s9361_s7 = inlined_call_operand.vmem [shape: bf16[256,16], index: 7, kind: output, shape index: {0}]   ;;  %s9362_s8 = inlined_call_operand.vmem [shape: f32[256,2], index: 8, kind: output, shape index: {1}]  }
   0x1   :  { %9517 = sst [smem:[#allocation72_spill]] %s9354_s0 }
   0x2   :  { %9518 = sst [smem:[#allocation73_spill]] %s9357_s3 }
   0x3   :  { %s6688_s27 = smov 0   ;;  %s6690_s28 = smov 0  }
   0x4   :  { %s6692_s29 = smov 0   ;;  %s6694_s30 = smov 0  }
   0x5   :  { %s6696_s9 = smov 0   ;;  %s6698_s10 = smov 0  }
   0x6   :  { %s6700_s11 = smov 0  }
   0x7 LB: > { %9519 = sst [smem:[#allocation6_spill]] %s6621_s10  ;;  %s28_s12 = sadd.s32 1, %s6617_s9  ;;  %s6625_s11 = sphi %s6700_s11, %s19_s11   ;;  %s6621_s10 = sphi %s6698_s10, %s9825_s10   ;;  %s6617_s9 = sphi %s6696_s9, %s9829_s9   ;;  %s6613_s30 = sphi %s6694_s30, %s9823_s30   ;;  %s6609_s29 = sphi %s6692_s29, %s9828_s29   ;;  %s6605_s28 = sphi %s6690_s28, %s9827_s28   ;;  %s6601_s27 = sphi %s6688_s27, %s9826_s27  }
   0x8   : > { %p29_p0 = scmp.ge.s32.totalorder %s28_s12, 2  ;;  %s31_s13 = sadd.s32 1, %s6621_s10 }
   0x9   : > { %p125_p1 = scmp.ne.s32.totalorder %s6605_s28, %s6601_s27  ;;  %p126_p2 = scmp.eq.s32.totalorder %s6625_s11, 0 }
   0xa   : > { %s9831_s12 = smov (%p29_p0, %s28_s12), 0  ;;  %s9833_s13 = smov (!%p29_p0, %s31_s13), %s6621_s10 }
   0xb   : > { %9520 = sst [smem:[#allocation7_spill]] %s9831_s12  ;;  %p127_p3 = por %p126_p2, %p125_p1 }
   0xc   : > { %p33_p4 = scmp.ge.s32.totalorder %s9833_s13, 2  ;;  %s114_s14 = ssub.s32 %s6617_s9, %s9831_s12 }
   0xd   : > { %s118_s17 = sadd.s32 1, %s6605_s28  ;;  %p5426_p6 = scmp.ge.s32.totalorder %s6625_s11, 4 }
   0xe   : > { %s9835_s13 = smov (%p33_p4, %s9833_s13), 0 }
   0xf   : > { %9521 = sst [smem:[#allocation8_spill]] %s9835_s13  ;;  %s113_s15 = ssub.s32 %s6621_s10, %s9835_s13 }
  0x10   : > { %s115_s16 = sor.u32 %s114_s14, %s113_s15  ;;  %275 = sbr.rel (%p5426_p6) target bundleno = 33 (0x21), region = 28 }
  0x11   : > { %p116_p5 = scmp.eq.s32.totalorder %s115_s16, 0 }
  0x13   : > { %s6739_s18 = scalar_select %p116_p5, %s6605_s28, %s118_s17  }
  0x15   : > { %303 = sbr.rel (!%p127_p3) target bundleno = 33 (0x21), region = 44  ;;  %s305_s19 = sand.u32 (%p127_p3), 1, %s6605_s28  }
  0x16   : > { %s5511_s20 = sshll.u32 (%p127_p3), %s6621_s10, 3  ;;  %s5427_s21 = sshll.u32 (%p127_p3), %s305_s19, 5 }
  0x17   : > { %s310_s22 = sadd.s32 (%p127_p3), %s6617_s9, %s5511_s20  ;;  %s9522_s3 = sld [smem:[#allocation73_spill]] (%p127_p3) }
  0x18   : > { %s5430_s23 = sshll.u32 (%p127_p3), %s310_s22, 3  ;;  %s307_s14 = scalar_lea.vmem (%p127_p3), [#allocation5], %s5427_s21 }
  0x1d   : > { %s312_s26 = scalar_lea.vmem %s9522_s3, %s5430_s23 }
  0x1e   : > { %v347_v0 = vld [vmem:[%s312_s26] sm:$0xff]  ;;  %v349_v1 = vld [vmem:[%s312_s26 + $0x10] sm:$0xff] }
  0x1f   : > { %v351_v2 = vld [vmem:[%s312_s26 + $0x20] sm:$0xff]  ;;  %348 = vst [vmem:[%s307_s14] sm:$0xff] %v347_v0  ;;  %350 = vst [vmem:[%s307_s14 + $0x8] sm:$0xff] %v349_v1  ;;  %v353_v3 = vld [vmem:[%s312_s26 + $0x30] sm:$0xff] }
  0x20   : > { %352 = vst [vmem:[%s307_s14 + $0x10] sm:$0xff] %v351_v2  ;;  %354 = vst [vmem:[%s307_s14 + $0x18] sm:$0xff] %v353_v3 }
  0x21 PF: > { %p5431_p7 = scmp.ge.s32.totalorder %s6625_s11, 1  ;;  %p359_p8 = scmp.lt.s32.totalorder %s6625_s11, 5 }
  0x23   : > { %p360_p9 = pnand %p5431_p7, %p359_p8 }
  0x25   : > { %363 = sbr.rel (%p360_p9) target bundleno = 3018 (0xbca), region = 82 }
  0x2a   : > { %s366_s15 = sand.u32 1, %s6601_s27   ;;  %s5433_s16 = sshll.u32 %s6613_s30, 4 }
  0x2b   : > { %s5432_s17 = sshll.u32 %s366_s15, 5  ;;  %p419_p10 = scmp.lt.s32.totalorder %s5433_s16, 31 }
  0x2c   : > { %p424_p11 = scmp.lt.s32.totalorder %s6609_s29, 1  ;;  %s5436_s21 = sshll.u32 %s6609_s29, 4 }
  0x2d   : > { %s9837_s16 = smov (!%p419_p10, %s5433_s16), 31  ;;  %s9523_s0 = sld [smem:[#allocation72_spill]] }
  0x2e   : > { %s425_s19 = scalar_select %p424_p11, %s6609_s29, 1 }
  0x2f   : > { %s5434_s20 = sshll.u32 %s9837_s16, 3  ;;  %p429_p12 = scmp.lt.s32.totalorder %s5436_s21, 31 }
  0x30   : > { %s5435_s25 = sshll.u32 %s425_s19, 2  ;;  %s5439_s27 = sshll.u32 %s9837_s16, 2 }
  0x31   : > { %s6763_s3 = scalar_lea.vmem %s9355_s1, %s5435_s25  ;;  %s6768_s13 = scalar_lea.vmem %s9362_s8, %s5434_s20 }
  0x32   : > { %s9839_s21 = smov (!%p429_p12, %s5436_s21), 31  ;;  %s6773_s22 = scalar_lea.vmem %s9361_s7, %s5439_s27 }
  0x33   : > { %s6758_s24 = scalar_lea.vmem %s9523_s0, %s5434_s20  ;;  %s5437_s23 = sshll.u32 %s9839_s21, 2 }
  0x34   : > { %s6778_s26 = scalar_lea.vmem %s9356_s2, %s5437_s23  ;;  %s6780_s25 = scalar_lea.vmem [#allocation5], %s5432_s17 }
  0x35   : > { %p5442_p13 = scmp.ne.s32.totalorder %s6609_s29, 0 }
  0x37   : > { %450 = sbr.rel (%p5442_p13) target bundleno = 85 (0x55), region = 90 }
  0x3c   : > { %vm451_vm0 = vcmask 31744   ;;  %vm484_vm1 = vcmask 261120   ;;  %v6627_v4 = vmov -1e+30   ;;  %v6628_v5 = vmov 0.0  }
  0x3d   : > { %452 = vst.msk [vmem:[#allocation2] sm:$0xff] %vm451_vm0, %v6627_v4  ;;  %453 = vst.msk [vmem:[#allocation2 + $0x8] sm:$0xff] %vm451_vm0, %v6627_v4 }
  0x3e   : > { %454 = vst.msk [vmem:[#allocation2 + $0x10] sm:$0xff] %vm451_vm0, %v6627_v4  ;;  %455 = vst.msk [vmem:[#allocation2 + $0x18] sm:$0xff] %vm451_vm0, %v6627_v4 }
  0x3f   : > { %456 = vst.msk [vmem:[#allocation2 + $0x20] sm:$0xff] %vm451_vm0, %v6627_v4  ;;  %457 = vst.msk [vmem:[#allocation2 + $0x28] sm:$0xff] %vm451_vm0, %v6627_v4 }
  0x40   : > { %458 = vst.msk [vmem:[#allocation2 + $0x30] sm:$0xff] %vm451_vm0, %v6627_v4  ;;  %459 = vst.msk [vmem:[#allocation2 + $0x38] sm:$0xff] %vm451_vm0, %v6627_v4 }
  0x41   : > { %460 = vst.msk [vmem:[#allocation2 + $0x40] sm:$0xff] %vm451_vm0, %v6627_v4  ;;  %461 = vst.msk [vmem:[#allocation2 + $0x48] sm:$0xff] %vm451_vm0, %v6627_v4 }
  0x42   : > { %462 = vst.msk [vmem:[#allocation2 + $0x50] sm:$0xff] %vm451_vm0, %v6627_v4  ;;  %463 = vst.msk [vmem:[#allocation2 + $0x58] sm:$0xff] %vm451_vm0, %v6627_v4 }
  0x43   : > { %464 = vst.msk [vmem:[#allocation2 + $0x60] sm:$0xff] %vm451_vm0, %v6627_v4  ;;  %465 = vst.msk [vmem:[#allocation2 + $0x68] sm:$0xff] %vm451_vm0, %v6627_v4 }
  0x44   : > { %466 = vst.msk [vmem:[#allocation2 + $0x70] sm:$0xff] %vm451_vm0, %v6627_v4  ;;  %467 = vst.msk [vmem:[#allocation2 + $0x78] sm:$0xff] %vm451_vm0, %v6627_v4 }
  0x45   : > { %468 = vst.msk [vmem:[#allocation3] sm:$0xff] %vm451_vm0, %v6628_v5  ;;  %469 = vst.msk [vmem:[#allocation3 + $0x8] sm:$0xff] %vm451_vm0, %v6628_v5 }
  0x46   : > { %470 = vst.msk [vmem:[#allocation3 + $0x10] sm:$0xff] %vm451_vm0, %v6628_v5  ;;  %471 = vst.msk [vmem:[#allocation3 + $0x18] sm:$0xff] %vm451_vm0, %v6628_v5 }
  0x47   : > { %472 = vst.msk [vmem:[#allocation3 + $0x20] sm:$0xff] %vm451_vm0, %v6628_v5  ;;  %473 = vst.msk [vmem:[#allocation3 + $0x28] sm:$0xff] %vm451_vm0, %v6628_v5 }
  0x48   : > { %474 = vst.msk [vmem:[#allocation3 + $0x30] sm:$0xff] %vm451_vm0, %v6628_v5  ;;  %475 = vst.msk [vmem:[#allocation3 + $0x38] sm:$0xff] %vm451_vm0, %v6628_v5 }
  0x49   : > { %476 = vst.msk [vmem:[#allocation3 + $0x40] sm:$0xff] %vm451_vm0, %v6628_v5  ;;  %477 = vst.msk [vmem:[#allocation3 + $0x48] sm:$0xff] %vm451_vm0, %v6628_v5 }
  0x4a   : > { %478 = vst.msk [vmem:[#allocation3 + $0x50] sm:$0xff] %vm451_vm0, %v6628_v5  ;;  %479 = vst.msk [vmem:[#allocation3 + $0x58] sm:$0xff] %vm451_vm0, %v6628_v5 }
  0x4b   : > { %480 = vst.msk [vmem:[#allocation3 + $0x60] sm:$0xff] %vm451_vm0, %v6628_v5  ;;  %481 = vst.msk [vmem:[#allocation3 + $0x68] sm:$0xff] %vm451_vm0, %v6628_v5 }
  0x4c   : > { %482 = vst.msk [vmem:[#allocation3 + $0x70] sm:$0xff] %vm451_vm0, %v6628_v5  ;;  %483 = vst.msk [vmem:[#allocation3 + $0x78] sm:$0xff] %vm451_vm0, %v6628_v5 }
  0x4d   : > { %485 = vst.msk [vmem:[#allocation4] sm:$0xff] %vm484_vm1, %v6628_v5  ;;  %486 = vst.msk [vmem:[#allocation4 + $0x8] sm:$0xff] %vm484_vm1, %v6628_v5 }
  0x4e   : > { %487 = vst.msk [vmem:[#allocation4 + $0x10] sm:$0xff] %vm484_vm1, %v6628_v5  ;;  %488 = vst.msk [vmem:[#allocation4 + $0x18] sm:$0xff] %vm484_vm1, %v6628_v5 }
  0x4f   : > { %489 = vst.msk [vmem:[#allocation4 + $0x20] sm:$0xff] %vm484_vm1, %v6628_v5  ;;  %490 = vst.msk [vmem:[#allocation4 + $0x28] sm:$0xff] %vm484_vm1, %v6628_v5 }
  0x50   : > { %491 = vst.msk [vmem:[#allocation4 + $0x30] sm:$0xff] %vm484_vm1, %v6628_v5  ;;  %492 = vst.msk [vmem:[#allocation4 + $0x38] sm:$0xff] %vm484_vm1, %v6628_v5 }
  0x51   : > { %493 = vst.msk [vmem:[#allocation4 + $0x40] sm:$0xff] %vm484_vm1, %v6628_v5  ;;  %494 = vst.msk [vmem:[#allocation4 + $0x48] sm:$0xff] %vm484_vm1, %v6628_v5 }
  0x52   : > { %495 = vst.msk [vmem:[#allocation4 + $0x50] sm:$0xff] %vm484_vm1, %v6628_v5  ;;  %496 = vst.msk [vmem:[#allocation4 + $0x58] sm:$0xff] %vm484_vm1, %v6628_v5 }
  0x53   : > { %497 = vst.msk [vmem:[#allocation4 + $0x60] sm:$0xff] %vm484_vm1, %v6628_v5  ;;  %498 = vst.msk [vmem:[#allocation4 + $0x68] sm:$0xff] %vm484_vm1, %v6628_v5 }
  0x54   : > { %499 = vst.msk [vmem:[#allocation4 + $0x70] sm:$0xff] %vm484_vm1, %v6628_v5  ;;  %500 = vst.msk [vmem:[#allocation4 + $0x78] sm:$0xff] %vm484_vm1, %v6628_v5 }
  0x55 PF: > { %v569_v6 = vld [vmem:[%s6758_s24] sm:$0xff]  ;;  %v571_v7 = vld [vmem:[%s6758_s24 + $0x10] sm:$0xff]  ;;  %v9366_v8 = vmov 1   ;;  %v6630_v9 = vmov 0   ;;  %v572_v10 = vld [vmem:[%s6758_s24 + $0x18] sm:$0xff]  ;;  %v698_v33 = vlaneseq  ;;  %vm1086_vm2 = vcmask 7168  }
  0x56   : > { %6090 = vset.pattern.permute.xlu0 %v9366_v8  ;;  %6089 = vset.pattern.permute.xlu1 %v6630_v9  ;;  %v574_v11 = vld [vmem:[%s6758_s24 + $0x28] sm:$0xff]  ;;  %v576_v12 = vld [vmem:[%s6758_s24 + $0x38] sm:$0xff]  ;;  %v573_v18 = vld [vmem:[%s6758_s24 + $0x20] sm:$0xff]  ;;  %vm1861_vm3 = vcmask 15368   ;;  %s6631_s0 = smov 120   ;;  %vm1376_vm4 = vcmask 64512  }
  0x57   : > { %1410 = vperm.xlu0 %6090, %v569_v6   ;;  %630 = vperm.xlu1 %6089, %v571_v7   ;;  %v578_v13 = vld [vmem:[%s6758_s24 + $0x48] sm:$0xff]  ;;  %v580_v14 = vld [vmem:[%s6758_s24 + $0x58] sm:$0xff]  ;;  %v575_v19 = vld [vmem:[%s6758_s24 + $0x30] sm:$0xff]  ;;  %v6864_v36 = vshrl.u32 %v698_v33, 7  ;;  %vm2764_vm5 = vcmask 23568   ;;  %s6633_s10 = smov 8  }
  0x58   : > { %v582_v15 = vld [vmem:[%s6758_s24 + $0x68] sm:$0xff]  ;;  %v584_v16 = vld [vmem:[%s6758_s24 + $0x78] sm:$0xff]  ;;  %v577_v20 = vld [vmem:[%s6758_s24 + $0x40] sm:$0xff]  ;;  %vm2279_vm6 = vcmask 130112   ;;  %s6636_s12 = smov 104   ;;  %vm3651_vm7 = vcmask 31768  }
  0x59   : > { %v570_v17 = vld [vmem:[%s6758_s24 + $0x8] sm:$0xff]  ;;  %v579_v21 = vld [vmem:[%s6758_s24 + $0x50] sm:$0xff]  ;;  %v581_v22 = vld [vmem:[%s6758_s24 + $0x60] sm:$0xff]  ;;  %9524 = vst [vmem:[#allocation9_spill] sm:$0xff] %v6864_v36  ;;  %v700_v39 = vsub.s32 0, %v6864_v36  ;;  %s6637_s16 = smov 16  }
  0x5a   : > { %v583_v23 = vld [vmem:[%s6758_s24 + $0x70] sm:$0xff]  ;;  %v501_v35 = vld [vmem:[%s6780_s25] sm:$0xff]  ;;  %v502_v48 = vld [vmem:[%s6780_s25 + $0x8] sm:$0xff]  ;;  %vm3166_vm8 = vcmask 195712   ;;  %s6638_s17 = smov 24   ;;  %vm4053_vm9 = vcmask 261312  }
  0x5b   : > { %1422 = vperm.xlu0 %6090, %v572_v10   ;;  %635 = vperm.xlu1 %6089, %v572_v10   ;;  %v505_v40 = vunpack.c.0.s8 %v501_v35  ;;  %v507_v41 = vunpack.c.2.s8 %v501_v35  ;;  %v6872_v42 = vld [vmem:[%s6763_s3] sm:$0xf]  ;;  %v506_v44 = vunpack.c.1.s8 %v501_v35  ;;  %v509_v49 = vunpack.c.0.s8 %v502_v48  ;;  %v6890_v5 = vld [vmem:[%s6780_s25 + $0x10] sm:$0xff]  ;;  %p5459_p0 = scmp.ne.s32.totalorder %s6609_s29, 1 }
  0x5c   : > { %v6877_v45 = vrot.slane %v6872_v42, %v700_v39  ;;  %v508_v55 = vunpack.c.3.s8 %v501_v35  ;;  %v511_v62 = vunpack.c.2.s8 %v502_v48  ;;  %v510_v4 = vunpack.c.1.s8 %v502_v48 }
  0x5d   : > { %v521_v47 = vcvt.s32.f32 %v505_v40  ;;  %v523_v51 = vcvt.s32.f32 %v507_v41  ;;  %v522_v52 = vcvt.s32.f32 %v506_v44  ;;  %v525_v57 = vcvt.s32.f32 %v509_v49 }
  0x5e   : > { %v524_v3 = vcvt.s32.f32 %v508_v55  ;;  %v513_v10 = vunpack.c.0.s8 %v6890_v5  ;;  %v515_v44 = vunpack.c.2.s8 %v6890_v5  ;;  %v514_v55 = vunpack.c.1.s8 %v6890_v5 }
  0x5f   : > { %1430 = vperm.xlu0 %6090, %v574_v11   ;;  %645 = vperm.xlu1 %6089, %v574_v11   ;;  %v5443_v54 = vadd.f32 -1.0, %v521_v47  ;;  %v5445_v61 = vadd.f32 -1.0, %v523_v51  ;;  %v5444_v0 = vadd.f32 -1.0, %v522_v52 }
  0x60   : > { %v529_v35 = vcvt.s32.f32 %v513_v10 }
  0x61   : > { %v6887_v2 = vmul.f32 1e+30, %v5443_v54 }
  0x63   : > { %1438 = vperm.xlu0 %6090, %v576_v12   ;;  %655 = vperm.xlu1 %6089, %v576_v12   ;;  %9525 = vst [vmem:[#allocation10_spill] sm:$0xff] %v6887_v2  ;;  %v6894_v12 = vmul.f32 1e+30, %v5445_v61 }
  0x65   : > { %9526 = vst [vmem:[#allocation11_spill] sm:$0xff] %v6894_v12 }
  0x67   : > { %1446 = vperm.xlu0 %6090, %v578_v13   ;;  %665 = vperm.xlu1 %6089, %v578_v13  }
  0x6b   : > { %1454 = vperm.xlu0 %6090, %v580_v14   ;;  %675 = vperm.xlu1 %6089, %v580_v14   ;;  %v527_v14 = vcvt.s32.f32 %v511_v62 }
  0x6d   : > { %v5449_v41 = vadd.f32 -1.0, %v527_v14 }
  0x6f   : > { %1462 = vperm.xlu0 %6090, %v582_v15   ;;  %685 = vperm.xlu1 %6089, %v582_v15  }
  0x73   : > { %1470 = vperm.xlu0 %6090, %v584_v16   ;;  %695 = vperm.xlu1 %6089, %v584_v16  }
  0x77   : > { %6092 = vset.pattern.permute.xlu0 %v6630_v9  ;;  %6091 = vset.pattern.permute.xlu1 %v9366_v8 }
  0x78   : > { %620 = vperm.xlu0 %6092, %v569_v6   ;;  %1414 = vperm.xlu1 %6091, %v570_v17  }
  0x7c   : > { %625 = vperm.xlu0 %6092, %v570_v17   ;;  %1418 = vperm.xlu1 %6091, %v571_v7  }
  0x80   : > { %640 = vperm.xlu0 %6092, %v573_v18   ;;  %1426 = vperm.xlu1 %6091, %v573_v18   ;;  %v6902_v18 = vmul.f32 1e+30, %v5444_v0  ;;  %v6940_v0 = vmul.f32 1e+30, %v5449_v41 }
  0x82   : > { %9527 = vst [vmem:[#allocation12_spill] sm:$0xff] %v6902_v18  ;;  %9530 = vst [vmem:[#allocation15_spill] sm:$0xff] %v6940_v0 }
  0x84   : > { %650 = vperm.xlu0 %6092, %v575_v19   ;;  %1434 = vperm.xlu1 %6091, %v575_v19   ;;  %v1475_v19 = vsub.s32 1, %v6864_v36  ;;  %v7212_v36 = vld [vmem:[#allocation2 + $0x40] sm:$0xff] }
  0x88   : > { %660 = vperm.xlu0 %6092, %v577_v20   ;;  %1442 = vperm.xlu1 %6091, %v577_v20  }
  0x8c   : > { %670 = vperm.xlu0 %6092, %v579_v21   ;;  %1450 = vperm.xlu1 %6091, %v579_v21  }
  0x90   : > { %680 = vperm.xlu0 %6092, %v581_v22   ;;  %1458 = vperm.xlu1 %6091, %v581_v22   ;;  %v5446_v22 = vadd.f32 -1.0, %v524_v3 }
  0x92   : > { %v6923_v52 = vmul.f32 1e+30, %v5446_v22 }
  0x94   : > { %690 = vperm.xlu0 %6092, %v583_v23   ;;  %1466 = vperm.xlu1 %6091, %v583_v23   ;;  %v526_v23 = vcvt.s32.f32 %v510_v4  ;;  %9529 = vst [vmem:[#allocation14_spill] sm:$0xff] %v6923_v52 }
  0x98   : > { %6093 = vset.pattern.permute.xlu1 %v6630_v9  ;;  %v5447_v9 = vadd.f32 -1.0, %v525_v57 }
  0x9a   : > { %v6909_v33 = vmul.f32 1e+30, %v5447_v9 }
  0x9c   : > { %9528 = vst [vmem:[#allocation13_spill] sm:$0xff] %v6909_v33 }
  0xd2   : > { %v6849_v24 = vpop.permute.xlu0 %1410  ;;  %v631_v25 = vpop.permute.xlu1 %630 }
  0xd3   : > { %v704_v50 = vadd.f32 %v6877_v45, %v631_v25  ;;  %v512_v25 = vunpack.c.3.s8 %v502_v48 }
  0xd5   : > { %v720_v58 = vmul.f32 0.2, %v704_v50  ;;  %v528_v54 = vcvt.s32.f32 %v512_v25 }
  0xd6   : > { %v6851_v26 = vpop.permute.xlu0 %1422  ;;  %v636_v27 = vpop.permute.xlu1 %635 }
  0xd7   : > { %v705_v59 = vadd.f32 %v6877_v45, %v636_v27  ;;  %v736_v13 = vmax.f32 %v704_v50, %v720_v58 }
  0xd9   : > { %v721_v11 = vmul.f32 0.2, %v705_v59  ;;  %v6912_v39 = vadd.f32 %v736_v13, %v6894_v12  ;;  %v530_v13 = vcvt.s32.f32 %v514_v55 }
  0xda   : > { %v6853_v28 = vpop.permute.xlu0 %1430  ;;  %v646_v29 = vpop.permute.xlu1 %645 }
  0xdb   : > { %v6897_v15 = vadd.f32 %v6877_v45, %v646_v29  ;;  %v737_v40 = vmax.f32 %v705_v59, %v721_v11  ;;  %v5451_v59 = vadd.f32 -1.0, %v529_v35  ;;  %v5450_v11 = vadd.f32 -1.0, %v528_v54 }
  0xdd   : > { %v723_v47 = vmul.f32 0.2, %v6897_v15  ;;  %v6974_v55 = vmul.f32 1e+30, %v5450_v11 }
  0xde   : > { %v6855_v30 = vpop.permute.xlu0 %1438  ;;  %v6859_v32 = vpop.permute.xlu1 %655 }
  0xdf   : > { %v6918_v48 = vadd.f32 %v6877_v45, %v6859_v32  ;;  %9533 = vst [vmem:[#allocation18_spill] sm:$0xff] %v6974_v55 }
  0xe1   : > { %v725_v3 = vmul.f32 0.2, %v6918_v48 }
  0xe2   : > { %v6857_v31 = vpop.permute.xlu0 %1446  ;;  %v6866_v37 = vpop.permute.xlu1 %665 }
  0xe3   : > { %v711_v62 = vadd.f32 %v6877_v45, %v6866_v37  ;;  %v516_v37 = vunpack.c.3.s8 %v6890_v5  ;;  %v741_v41 = vmax.f32 %v6918_v48, %v725_v3 }
  0xe5   : > { %v6984_v3 = vadd.f32 %v741_v41, %v6974_v55 }
  0xe6   : > { %v6861_v34 = vpop.permute.xlu0 %1454  ;;  %v6879_v46 = vpop.permute.xlu1 %675 }
  0xea   : > { %v6868_v38 = vpop.permute.xlu0 %1462  ;;  %v6885_v60 = vpop.permute.xlu1 %685 }
  0xee   : > { %v6874_v43 = vpop.permute.xlu0 %1470  ;;  %v6905_v20 = vpop.permute.xlu1 %695 }
  0xf3   : > { %v621_v53 = vpop.permute.xlu0 %620  ;;  %v6929_v57 = vpop.permute.xlu1 %1414 }
  0xf4   : > { %v702_v56 = vadd.f32 %v6877_v45, %v621_v53  ;;  %v5448_v53 = vadd.f32 -1.0, %v526_v23  ;;  %v727_v23 = vmul.f32 0.2, %v711_v62 }
  0xf6   : > { %v718_v63 = vmul.f32 0.2, %v702_v56  ;;  %v6947_v10 = vmul.f32 1e+30, %v5448_v53 }
  0xf7   : > { %v626_v1 = vpop.permute.xlu0 %625 }
  0xf8   : > { %v703_v6 = vadd.f32 %v6877_v45, %v626_v1  ;;  %v734_v7 = vmax.f32 %v702_v56, %v718_v63  ;;  %v6927_v56 = vld [vmem:[%s6780_s25 + $0x18] sm:$0xff]  ;;  %v6938_v63 = vadd.f32 %v737_v40, %v6923_v52  ;;  %v531_v1 = vcvt.s32.f32 %v515_v44  ;;  %9531 = vst [vmem:[#allocation16_spill] sm:$0xff] %v6947_v10 }
  0xf9   : > { %v517_v61 = vunpack.c.0.s8 %v6927_v56  ;;  %v6968_v44 = vrot.slane %v6872_v42, %v1475_v19  ;;  %v743_v42 = vmax.f32 %v711_v62, %v727_v23 }
  0xfa   : > { %v719_v16 = vmul.f32 0.2, %v703_v6  ;;  %v6900_v17 = vadd.f32 %v734_v7, %v6887_v2  ;;  %v739_v7 = vmax.f32 %v6897_v15, %v723_v47  ;;  %v713_v15 = vadd.f32 %v6877_v45, %v6879_v46 }
  0xfb   : > { %v641_v21 = vpop.permute.xlu0 %640  ;;  %v533_v22 = vcvt.s32.f32 %v517_v61  ;;  %v5453_v25 = vadd.f32 -1.0, %v531_v1  ;;  %v532_v46 = vcvt.s32.f32 %v516_v37 }
  0xfc   : > { %v706_v27 = vadd.f32 %v6877_v45, %v641_v21  ;;  %782 = vmax.xlane.f32.xlu0 %v6900_v17  ;;  %v735_v29 = vmax.f32 %v703_v6, %v719_v16  ;;  %v6953_v21 = vmul.f32 1e+30, %v5451_v59  ;;  %v6964_v40 = vadd.f32 %v739_v7, %v6947_v10 }
  0xfd   : > { %v6976_v48 = vmul.f32 1e+30, %v5453_v25  ;;  %v715_v59 = vadd.f32 %v6877_v45, %v6885_v60 }
  0xfe   : > { %v722_v49 = vmul.f32 0.2, %v706_v27  ;;  %v6921_v50 = vadd.f32 %v735_v29, %v6902_v18  ;;  %9532 = vst [vmem:[#allocation17_spill] sm:$0xff] %v6953_v21  ;;  %v6958_v29 = vpop.permute.xlu1 %1418 }
  0xff   : > { %v651_v51 = vpop.permute.xlu0 %650  ;;  %9534 = vst [vmem:[#allocation19_spill] sm:$0xff] %v6976_v48 }
 0x100   : > { %v708_v58 = vadd.f32 %v6877_v45, %v651_v51  ;;  %784 = vmax.xlane.f32.xlu1 %v6921_v50  ;;  %786 = vmax.xlane.f32.xlu0 %v6912_v39  ;;  %v738_v32 = vmax.f32 %v706_v27, %v722_v49  ;;  %v519_v27 = vunpack.c.2.s8 %v6927_v56  ;;  %v5452_v49 = vadd.f32 -1.0, %v530_v13 }
 0x101   : > { %v518_v51 = vunpack.c.1.s8 %v6927_v56 }
 0x102   : > { %v724_v4 = vmul.f32 0.2, %v708_v58  ;;  %v6944_v6 = vadd.f32 %v738_v32, %v6909_v33  ;;  %v729_v32 = vmul.f32 0.2, %v713_v15  ;;  %v535_v19 = vcvt.s32.f32 %v519_v27  ;;  %v1427_v13 = vpop.permute.xlu1 %1426 }
 0x103   : > { %v661_v9 = vpop.permute.xlu0 %660  ;;  %v6986_v7 = vmul.f32 1e+30, %v5452_v49  ;;  %v534_v11 = vcvt.s32.f32 %v518_v51  ;;  %v731_v27 = vmul.f32 0.2, %v715_v59 }
 0x104   : > { %v710_v14 = vadd.f32 %v6877_v45, %v661_v9  ;;  %790 = vmax.xlane.f32.xlu1 %v6944_v6  ;;  %788 = vmax.xlane.f32.xlu0 %v6938_v63  ;;  %v740_v16 = vmax.f32 %v708_v58, %v724_v4  ;;  %v5455_v58 = vadd.f32 -1.0, %v533_v22  ;;  %v5454_v9 = vadd.f32 -1.0, %v532_v46 }
 0x105   : > { %9535 = vst [vmem:[#allocation20_spill] sm:$0xff] %v6986_v7  ;;  %v6997_v22 = vadd.f32 %v743_v42, %v6986_v7  ;;  %v745_v23 = vmax.f32 %v713_v15, %v729_v32  ;;  %v5457_v25 = vadd.f32 -1.0, %v535_v19  ;;  %v1478_v15 = vadd.f32 %v6968_v44, %v6929_v57 }
 0x106   : > { %v726_v5 = vmul.f32 0.2, %v710_v14  ;;  %v6961_v35 = vadd.f32 %v740_v16, %v6940_v0  ;;  %v6991_v62 = vmul.f32 1e+30, %v5455_v58  ;;  %v1477_v16 = vadd.f32 %v6968_v44, %v6849_v24  ;;  %v1435_v42 = vpop.permute.xlu1 %1434 }
 0x107   : > { %v671_v47 = vpop.permute.xlu0 %670  ;;  %v7004_v46 = vmul.f32 1e+30, %v5454_v9  ;;  %v7016_v32 = vmul.f32 1e+30, %v5457_v25  ;;  %v1494_v57 = vmul.f32 0.2, %v1478_v15 }
 0x108   : > { %v712_v53 = vadd.f32 %v6877_v45, %v671_v47  ;;  %794 = vmax.xlane.f32.xlu1 %v6961_v35  ;;  %792 = vmax.xlane.f32.xlu0 %v6964_v40  ;;  %v742_v54 = vmax.f32 %v710_v14, %v726_v5  ;;  %9536 = vst [vmem:[#allocation21_spill] sm:$0xff] %v6991_v62  ;;  %v520_v14 = vunpack.c.3.s8 %v6927_v56  ;;  %v5456_v56 = vadd.f32 -1.0, %v534_v11 }
 0x109   : > { %v717_v5 = vadd.f32 %v6877_v45, %v6905_v20  ;;  %9537 = vst [vmem:[#allocation22_spill] sm:$0xff] %v7004_v46  ;;  %v1493_v20 = vmul.f32 0.2, %v1477_v16  ;;  %v7014_v58 = vadd.f32 %v745_v23, %v7004_v46  ;;  %9538 = vst [vmem:[#allocation23_spill] sm:$0xff] %v7016_v32  ;;  %v1479_v11 = vadd.f32 %v6968_v44, %v6958_v29 }
 0x10a   : > { %v728_v61 = vmul.f32 0.2, %v712_v53  ;;  %v6981_v1 = vadd.f32 %v742_v54, %v6953_v21  ;;  %v1480_v54 = vadd.f32 %v6968_v44, %v6851_v26  ;;  %v7021_v9 = vmul.f32 1e+30, %v5456_v56 }
 0x10b   : > { %v681_v4 = vpop.permute.xlu0 %680  ;;  %v1482_v23 = vadd.f32 %v6968_v44, %v6853_v28  ;;  %v1510_v56 = vmax.f32 %v1478_v15, %v1494_v57 }
 0x10c   : > { %v714_v37 = vadd.f32 %v6877_v45, %v681_v4  ;;  %798 = vmax.xlane.f32.xlu1 %v6981_v1  ;;  %796 = vmax.xlane.f32.xlu0 %v6984_v3  ;;  %v744_v60 = vmax.f32 %v712_v53, %v728_v61  ;;  %v536_v53 = vcvt.s32.f32 %v520_v14  ;;  %v747_v4 = vmax.f32 %v715_v59, %v731_v27 }
 0x10d   : > { %9539 = vst [vmem:[#allocation24_spill] sm:$0xff] %v7021_v9  ;;  %v1509_v14 = vmax.f32 %v1477_v16, %v1493_v20  ;;  %v1481_v16 = vadd.f32 %v6968_v44, %v1427_v13  ;;  %v1483_v13 = vadd.f32 %v6968_v44, %v1435_v42 }
 0x10e   : > { %v730_v41 = vmul.f32 0.2, %v714_v37  ;;  %v7002_v47 = vadd.f32 %v744_v60, %v6976_v48  ;;  %v1496_v60 = vmul.f32 0.2, %v1480_v54  ;;  %v7033_v59 = vadd.f32 %v747_v4, %v7021_v9 }
 0x10f   : > { %v691_v49 = vpop.permute.xlu0 %690  ;;  %v7041_v28 = vadd.f32 %v1509_v14, %v6887_v2  ;;  %v1497_v20 = vmul.f32 0.2, %v1481_v16  ;;  %v1488_v14 = vadd.f32 %v6968_v44, %v6861_v34  ;;  %v1490_v34 = vadd.f32 %v6968_v44, %v6868_v38 }
 0x110   : > { %v716_v51 = vadd.f32 %v6877_v45, %v691_v49  ;;  %802 = vmax.xlane.f32.xlu1 %v7002_v47  ;;  %800 = vmax.xlane.f32.xlu0 %v6997_v22  ;;  %v746_v24 = vmax.f32 %v714_v37, %v730_v41  ;;  %v733_v45 = vmul.f32 0.2, %v717_v5  ;;  %v5458_v37 = vadd.f32 -1.0, %v536_v53  ;;  %v1443_v41 = vpop.permute.xlu1 %1442 }
 0x111   : > { %v1495_v49 = vmul.f32 0.2, %v1479_v11  ;;  %v1512_v53 = vmax.f32 %v1480_v54, %v1496_v60  ;;  %v1485_v42 = vadd.f32 %v6968_v44, %v1443_v41  ;;  %v1492_v38 = vadd.f32 %v6968_v44, %v6874_v43 }
 0x112   : > { %v732_v19 = vmul.f32 0.2, %v716_v51  ;;  %v7019_v61 = vadd.f32 %v746_v24, %v6991_v62  ;;  %v749_v27 = vmax.f32 %v717_v5, %v733_v45  ;;  %v7037_v29 = vmul.f32 1e+30, %v5458_v37 }
 0x113   : > { %v1484_v24 = vadd.f32 %v6968_v44, %v6855_v30  ;;  %v7051_v45 = vadd.f32 %v1510_v56, %v6902_v18  ;;  %v1511_v15 = vmax.f32 %v1479_v11, %v1495_v49  ;;  %v1486_v30 = vadd.f32 %v6968_v44, %v6857_v31 }
 0x114   : > { %806 = vmax.xlane.f32.xlu1 %v7019_v61  ;;  %804 = vmax.xlane.f32.xlu0 %v7014_v58  ;;  %v748_v26 = vmax.f32 %v716_v51, %v732_v19  ;;  %9540 = vst [vmem:[#allocation25_spill] sm:$0xff] %v7037_v29  ;;  %v1498_v51 = vmul.f32 0.2, %v1482_v23  ;;  %v7046_v5 = vadd.f32 %v749_v27, %v7037_v29  ;;  %v1451_v19 = vpop.permute.xlu1 %1450  ;;  %v1501_v49 = vmul.f32 0.2, %v1485_v42 }
 0x115   : > { %v1500_v4 = vmul.f32 0.2, %v1484_v24  ;;  %v7057_v57 = vadd.f32 %v1512_v53, %v6923_v52  ;;  %v7062_v37 = vadd.f32 %v1511_v15, %v6894_v12  ;;  %v1513_v11 = vmax.f32 %v1481_v16, %v1497_v20 }
 0x116   : > { %v7030_v25 = vadd.f32 %v748_v26, %v7016_v32  ;;  %v1514_v54 = vmax.f32 %v1482_v23, %v1498_v51  ;;  %v1499_v26 = vmul.f32 0.2, %v1483_v13  ;;  %v1502_v60 = vmul.f32 0.2, %v1486_v30 }
 0x117   : > { %v1516_v27 = vmax.f32 %v1484_v24, %v1500_v4  ;;  %v7073_v56 = vadd.f32 %v1513_v11, %v6909_v33  ;;  %v1487_v41 = vadd.f32 %v6968_v44, %v1451_v19  ;;  %v1504_v51 = vmul.f32 0.2, %v1488_v14 }
 0x118   : > { %810 = vmax.xlane.f32.xlu1 %v7030_v25  ;;  %808 = vmax.xlane.f32.xlu0 %v7033_v59  ;;  %v7068_v31 = vadd.f32 %v1514_v54, %v6947_v10  ;;  %v1459_v23 = vpop.permute.xlu1 %1458  ;;  %v1515_v16 = vmax.f32 %v1483_v13, %v1499_v26  ;;  %v1518_v24 = vmax.f32 %v1486_v30, %v1502_v60  ;;  %v1506_v54 = vmul.f32 0.2, %v1490_v34 }
 0x119   : > { %v7079_v53 = vadd.f32 %v1516_v27, %v6974_v55  ;;  %v1503_v20 = vmul.f32 0.2, %v1487_v41  ;;  %v1489_v4 = vadd.f32 %v6968_v44, %v1459_v23  ;;  %v1517_v19 = vmax.f32 %v1485_v42, %v1501_v49  ;;  %v7175_v55 = vld [vmem:[#allocation2 + $0x18] sm:$0xff] }
 0x11a   : > { %v7084_v15 = vadd.f32 %v1515_v16, %v6940_v0  ;;  %v7090_v26 = vadd.f32 %v1518_v24, %v6986_v7  ;;  %v1520_v30 = vmax.f32 %v1488_v14, %v1504_v51  ;;  %v1508_v23 = vmul.f32 0.2, %v1492_v38 }
 0x11b   : > { %v1505_v11 = vmul.f32 0.2, %v1489_v4  ;;  %v7095_v60 = vadd.f32 %v1517_v19, %v6953_v21  ;;  %v1519_v42 = vmax.f32 %v1487_v41, %v1503_v20  ;;  %v1522_v43 = vmax.f32 %v1490_v34, %v1506_v54  ;;  %v5566_v19 = vld [vmem:[%s6778_s26 + $0x38] sm:$0xff]  }
 0x11c   : > { %1557 = vmax.xlane.f32.xlu1 %v7041_v28  ;;  %812 = vmax.xlane.f32.xlu0 %v7046_v5  ;;  %v1467_v13 = vpop.permute.xlu1 %1466  ;;  %v7099_v49 = vadd.f32 %v1520_v30, %v7004_v46  ;;  %v7125_v54 = vunpack.c.h.bf16 %v5566_v19 }
 0x11d   : > { %v1491_v27 = vadd.f32 %v6968_v44, %v1467_v13  ;;  %v7104_v16 = vadd.f32 %v1519_v42, %v6976_v48  ;;  %v1521_v51 = vmax.f32 %v1489_v4, %v1505_v11  ;;  %v7107_v24 = vadd.f32 %v1522_v43, %v7021_v9  ;;  %v5565_v13 = vld [vmem:[%s6778_s26 + $0x30] sm:$0xff]   ;;  %v5564_v11 = vld [vmem:[%s6778_s26 + $0x28] sm:$0xff]  }
 0x11e   : > { %v1524_v44 = vmax.f32 %v1492_v38, %v1508_v23  ;;  %9542 = vst [vmem:[#allocation27_spill] sm:$0xff] %v7125_v54  ;;  %v7127_v38 = vunpack.c.l.bf16 %v5566_v19  ;;  %5733 = vmatprep.subr.mxu0 %v7125_v54  ;;  %v7130_v30 = vunpack.c.h.bf16 %v5565_v13  ;;  %v7139_v42 = vunpack.c.h.bf16 %v5564_v11  ;;  %v7146_v23 = vld [vmem:[#allocation2] sm:$0xff]  ;;  %v767_v19 = vld [vmem:[#allocation2 + $0x8] sm:$0xff] }
 0x11f   : > { %v1507_v14 = vmul.f32 0.2, %v1491_v27  ;;  %v7112_v41 = vadd.f32 %v1521_v51, %v6991_v62  ;;  %5734 = vmatpush3.msra.mxu0 %v7125_v54  ;;  %v7148_v43 = vunpack.c.l.bf16 %v5564_v11  ;;  %v5562_v11 = vld [vmem:[%s6778_s26 + $0x18] sm:$0xff]   ;;  %v7194_v62 = vld [vmem:[#allocation2 + $0x28] sm:$0xff] }
 0x120   : > { %1563 = vmax.xlane.f32.xlu1 %v7057_v57  ;;  %1559 = vmax.xlane.f32.xlu0 %v7051_v45  ;;  %v7115_v20 = vadd.f32 %v1524_v44, %v7037_v29  ;;  %9543 = vst [vmem:[#allocation28_spill] sm:$0xff] %v7127_v38  ;;  %9544 = vst [vmem:[#allocation29_spill] sm:$0xff] %v7130_v30  ;;  %v7169_v9 = vunpack.c.h.bf16 %v5562_v11  ;;  %v7178_v10 = vunpack.c.l.bf16 %v5562_v11 }
 0x121   : > { %v1523_v34 = vmax.f32 %v1491_v27, %v1507_v14  ;;  %5735 = vmatprep.subr.mxu0 %v7127_v38  ;;  %v7135_v27 = vunpack.c.l.bf16 %v5565_v13  ;;  %9546 = vst [vmem:[#allocation31_spill] sm:$0xff] %v7139_v42  ;;  %9547 = vst [vmem:[#allocation32_spill] sm:$0xff] %v7148_v43  ;;  %v5563_v14 = vld [vmem:[%s6778_s26 + $0x20] sm:$0xff]   ;;  %v7158_v13 = vld [vmem:[#allocation2 + $0x10] sm:$0xff] }
 0x122   : > { %9541 = vst [vmem:[#allocation26_spill] sm:$0xff] %v7115_v20  ;;  %5736 = vmatpush3.msra.mxu0 %v7127_v38  ;;  %v7152_v44 = vunpack.c.h.bf16 %v5563_v14  ;;  %v7161_v8 = vunpack.c.l.bf16 %v5563_v14  ;;  %9550 = vst [vmem:[#allocation35_spill] sm:$0xff] %v7169_v9  ;;  %v770_v14 = vld [vmem:[#allocation2 + $0x20] sm:$0xff] }
 0x123   : > { %v7120_v4 = vadd.f32 %v1523_v34, %v7016_v32  ;;  %9545 = vst [vmem:[#allocation30_spill] sm:$0xff] %v7135_v27  ;;  %5737 = vmatprep.subr.mxu0 %v7130_v30  ;;  %9551 = vst [vmem:[#allocation36_spill] sm:$0xff] %v7178_v10  ;;  %v7192_v32 = vld [vmem:[#allocation2 + $0x30] sm:$0xff] }
 0x124   : > { %1567 = vmax.xlane.f32.xlu1 %v7068_v31  ;;  %1561 = vmax.xlane.f32.xlu0 %v7062_v37  ;;  %9548 = vst [vmem:[#allocation33_spill] sm:$0xff] %v7152_v44  ;;  %9549 = vst [vmem:[#allocation34_spill] sm:$0xff] %v7161_v8 }
 0x125   : > { %5738 = vmatpush3.msra.mxu0 %v7130_v30  ;;  %v7214_v30 = vld [vmem:[#allocation2 + $0x38] sm:$0xff] }
 0x126   : > { %5739 = vmatprep.subr.mxu0 %v7135_v27 }
 0x127   : > { %5740 = vmatpush3.msra.mxu0 %v7135_v27 }
 0x128   : > { %1571 = vmax.xlane.f32.xlu1 %v7079_v53  ;;  %1565 = vmax.xlane.f32.xlu0 %v7073_v56 }
 0x129   : > { %5741 = vmatprep.subr.mxu0 %v7139_v42 }
 0x12a   : > { %5742 = vmatpush3.msra.mxu0 %v7139_v42  ;;  %v7256_v42 = vld [vmem:[#allocation2 + $0x58] sm:$0xff] }
 0x12b   : > { %5743 = vmatprep.subr.mxu0 %v7148_v43 }
 0x12c   : > { %1575 = vmax.xlane.f32.xlu1 %v7090_v26  ;;  %1569 = vmax.xlane.f32.xlu0 %v7084_v15 }
 0x12d   : > { %5744 = vmatpush3.msra.mxu0 %v7148_v43 }
 0x12e   : > { %5745 = vmatprep.subr.mxu0 %v7152_v44 }
 0x12f   : > { %5746 = vmatpush3.msra.mxu0 %v7152_v44 }
 0x130   : > { %1579 = vmax.xlane.f32.xlu1 %v7099_v49  ;;  %1573 = vmax.xlane.f32.xlu0 %v7095_v60 }
 0x131   : > { %5747 = vmatprep.subr.mxu0 %v7161_v8 }
 0x132   : > { %5748 = vmatpush3.msra.mxu0 %v7161_v8 }
 0x133   : > { %5749 = vmatprep.subr.mxu0 %v7169_v9 }
 0x134   : > { %1583 = vmax.xlane.f32.xlu1 %v7107_v24  ;;  %1577 = vmax.xlane.f32.xlu0 %v7104_v16 }
 0x135   : > { %5750 = vmatpush3.msra.mxu0 %v7169_v9 }
 0x136   : > { %5751 = vmatprep.subr.mxu0 %v7178_v10 }
 0x137   : > { %5752 = vmatpush3.msra.mxu0 %v7178_v10 }
 0x138   : > { %1587 = vmax.xlane.f32.xlu1 %v7115_v20  ;;  %1581 = vmax.xlane.f32.xlu0 %v7112_v41  ;;  %v7234_v20 = vld [vmem:[#allocation2 + $0x48] sm:$0xff] }
 0x13c   : > { %1585 = vmax.xlane.f32.xlu0 %v7120_v4 }
 0x185   : > { %v783_v51 = vpop.xlane.xlu0 %782 }
 0x186   : > { %v7155_v34 = vmax.f32 %v7146_v23, %v783_v51 }
 0x188   : > { %1393 = vst.msk [vmem:[#allocation2] sm:$0xff] %vm1086_vm2, %v7155_v34  ;;  %880 = vperm.xlu1 %6093, %v7155_v34  }
 0x189   : > { %v785_v51 = vpop.xlane.xlu1 %784  ;;  %v787_v29 = vpop.xlane.xlu0 %786 }
 0x18a   : > { %v815_v46 = vmax.f32 %v767_v19, %v785_v51  ;;  %v7172_v7 = vmax.f32 %v7158_v13, %v787_v29  ;;  %v5561_v51 = vld [vmem:[%s6778_s26 + $0x10] sm:$0xff]  }
 0x18b   : > { %v7186_v12 = vunpack.c.h.bf16 %v5561_v51  ;;  %v7197_v48 = vunpack.c.l.bf16 %v5561_v51 }
 0x18c   : > { %1394 = vst.msk [vmem:[#allocation2 + $0x8] sm:$0xff] %vm1086_vm2, %v815_v46  ;;  %1395 = vst.msk [vmem:[#allocation2 + $0x10] sm:$0xff] %vm1086_vm2, %v7172_v7  ;;  %885 = vperm.xlu0 %6092, %v815_v46   ;;  %890 = vperm.xlu1 %6093, %v7172_v7  }
 0x18d   : > { %v791_v29 = vpop.xlane.xlu1 %790  ;;  %v789_v52 = vpop.xlane.xlu0 %788  ;;  %9552 = vst [vmem:[#allocation37_spill] sm:$0xff] %v7186_v12  ;;  %9553 = vst [vmem:[#allocation38_spill] sm:$0xff] %v7197_v48  ;;  %5753 = vmatprep.subr.mxu0 %v7186_v12 }
 0x18e   : > { %v818_v2 = vmax.f32 %v770_v14, %v791_v29  ;;  %v7189_v11 = vmax.f32 %v7175_v55, %v789_v52  ;;  %v5560_v52 = vld [vmem:[%s6778_s26 + $0x8] sm:$0xff]   ;;  %v831_v29 = vsub.f32 %v767_v19, %v815_v46  ;;  %5754 = vmatpush3.msra.mxu0 %v7186_v12  ;;  %v830_v46 = vsub.f32 %v7146_v23, %v7155_v34  ;;  %v7232_v34 = vld [vmem:[#allocation2 + $0x50] sm:$0xff] }
 0x18f   : > { %v7210_v18 = vunpack.c.h.bf16 %v5560_v52  ;;  %5755 = vmatprep.subr.mxu0 %v7197_v48  ;;  %v7225_v8 = vunpack.c.l.bf16 %v5560_v52 }
 0x190   : > { %1397 = vst.msk [vmem:[#allocation2 + $0x20] sm:$0xff] %vm1086_vm2, %v818_v2  ;;  %1396 = vst.msk [vmem:[#allocation2 + $0x18] sm:$0xff] %vm1086_vm2, %v7189_v11  ;;  %900 = vperm.xlu0 %6092, %v818_v2   ;;  %895 = vperm.xlu1 %6093, %v7189_v11   ;;  %v834_v19 = vsub.f32 %v770_v14, %v818_v2  ;;  %v846_v14 = vmul.f32 1.442695, %v830_v46 }
 0x191   : > { %v795_v21 = vpop.xlane.xlu1 %794  ;;  %v793_v0 = vpop.xlane.xlu0 %792  ;;  %9554 = vst [vmem:[#allocation39_spill] sm:$0xff] %v7210_v18  ;;  %5756 = vmatpush3.msra.mxu0 %v7197_v48  ;;  %9555 = vst [vmem:[#allocation40_spill] sm:$0xff] %v7225_v8 }
 0x192   : > { %v820_v33 = vmax.f32 %v7192_v32, %v795_v21  ;;  %v7207_v51 = vmax.f32 %v7194_v62, %v793_v0  ;;  %v5529_v0 = vld [vmem:[%s6778_s26] sm:$0xff]   ;;  %v848_v21 = vmul.f32 1.442695, %v831_v29  ;;  %5757 = vmatprep.subr.mxu0 %v7210_v18 }
 0x193   : > { %5758 = vmatpush3.msra.mxu0 %v7210_v18  ;;  %v7237_v2 = vunpack.c.h.bf16 %v5529_v0  ;;  %v7252_v38 = vunpack.c.l.bf16 %v5529_v0 }
 0x194   : > { %1399 = vst.msk [vmem:[#allocation2 + $0x30] sm:$0xff] %vm1086_vm2, %v820_v33  ;;  %1398 = vst.msk [vmem:[#allocation2 + $0x28] sm:$0xff] %vm1086_vm2, %v7207_v51  ;;  %910 = vperm.xlu0 %6092, %v820_v33   ;;  %905 = vperm.xlu1 %6093, %v7207_v51   ;;  %6226 = vpow2.f32 %v848_v21  ;;  %v836_v48 = vsub.f32 %v7192_v32, %v820_v33  ;;  %v7254_v21 = vld [vmem:[#allocation2 + $0x60] sm:$0xff] }
 0x195   : > { %v799_v27 = vpop.xlane.xlu1 %798  ;;  %v797_v44 = vpop.xlane.xlu0 %796  ;;  %9556 = vst [vmem:[#allocation41_spill] sm:$0xff] %v7237_v2  ;;  %5759 = vmatprep.subr.mxu0 %v7225_v8  ;;  %9557 = vst [vmem:[#allocation42_spill] sm:$0xff] %v7252_v38  ;;  %6228 = vpow2.f32 %v846_v14 }
 0x196   : > { %v822_v12 = vmax.f32 %v7212_v36, %v799_v27  ;;  %v7229_v23 = vmax.f32 %v7214_v30, %v797_v44  ;;  %v832_v27 = vsub.f32 %v7158_v13, %v7172_v7  ;;  %v854_v44 = vmul.f32 1.442695, %v834_v19  ;;  %5760 = vmatpush3.msra.mxu0 %v7225_v8 }
 0x197   : > { %5761 = vmatprep.subr.mxu0 %v7237_v2  ;;  %v833_v7 = vsub.f32 %v7175_v55, %v7189_v11  ;;  %v858_v0 = vmul.f32 1.442695, %v836_v48  ;;  %v835_v55 = vsub.f32 %v7194_v62, %v7207_v51  ;;  %v7288_v51 = vld [vmem:[#allocation2 + $0x78] sm:$0xff] }
 0x198   : > { %1401 = vst.msk [vmem:[#allocation2 + $0x40] sm:$0xff] %vm1086_vm2, %v822_v12  ;;  %1400 = vst.msk [vmem:[#allocation2 + $0x38] sm:$0xff] %vm1086_vm2, %v7229_v23  ;;  %920 = vperm.xlu0 %6092, %v822_v12   ;;  %915 = vperm.xlu1 %6093, %v7229_v23   ;;  %v850_v33 = vmul.f32 1.442695, %v832_v27  ;;  %6230 = vpow2.f32 %v854_v44  ;;  %v838_v19 = vsub.f32 %v7212_v36, %v822_v12  ;;  %v7274_v27 = vld [vmem:[#allocation2 + $0x68] sm:$0xff] }
 0x199   : > { %v803_v52 = vpop.xlane.xlu1 %802  ;;  %v801_v29 = vpop.xlane.xlu0 %800  ;;  %5762 = vmatpush3.msra.mxu0 %v7237_v2  ;;  %v852_v36 = vmul.f32 1.442695, %v833_v7  ;;  %v7296_v7 = vld [vmem:[#allocation2] sm:$0xff] }
 0x19a   : > { %v824_v46 = vmax.f32 %v7232_v34, %v803_v52  ;;  %v7249_v54 = vmax.f32 %v7234_v20, %v801_v29  ;;  %5763 = vmatprep.subr.mxu0 %v7252_v38  ;;  %v7272_v29 = vld [vmem:[#allocation2 + $0x70] sm:$0xff]  ;;  %6232 = vpow2.f32 %v850_v33  ;;  %v862_v44 = vmul.f32 1.442695, %v838_v19 }
 0x19b   : > { %5764 = vmatpush3.msra.mxu0 %v7252_v38  ;;  %6234 = vpow2.f32 %v858_v0 }
 0x19c   : > { %1403 = vst.msk [vmem:[#allocation2 + $0x50] sm:$0xff] %vm1086_vm2, %v824_v46  ;;  %1402 = vst.msk [vmem:[#allocation2 + $0x48] sm:$0xff] %vm1086_vm2, %v7249_v54  ;;  %930 = vperm.xlu0 %6092, %v824_v46   ;;  %925 = vperm.xlu1 %6093, %v7249_v54   ;;  %v840_v12 = vsub.f32 %v7232_v34, %v824_v46  ;;  %6236 = vpow2.f32 %v852_v36  ;;  %v837_v34 = vsub.f32 %v7214_v30, %v7229_v23 }
 0x19d   : > { %v807_v32 = vpop.xlane.xlu1 %806  ;;  %v805_v13 = vpop.xlane.xlu0 %804  ;;  %6238 = vpow2.f32 %v862_v44  ;;  %v7321_v44 = vld [vmem:[#allocation2 + $0x8] sm:$0xff] }
 0x19e   : > { %v826_v14 = vmax.f32 %v7254_v21, %v807_v32  ;;  %v7269_v52 = vmax.f32 %v7256_v42, %v805_v13  ;;  %v856_v13 = vmul.f32 1.442695, %v835_v55  ;;  %v866_v46 = vmul.f32 1.442695, %v840_v12  ;;  %v7319_v12 = vld [vmem:[#allocation2 + $0x18] sm:$0xff]  ;;  %9559 = vst [vmem:[#allocation44_spill] sm:$0xff] %v7321_v44 }
 0x1a0   : > { %1405 = vst.msk [vmem:[#allocation2 + $0x60] sm:$0xff] %vm1086_vm2, %v826_v14  ;;  %1404 = vst.msk [vmem:[#allocation2 + $0x58] sm:$0xff] %vm1086_vm2, %v7269_v52  ;;  %940 = vperm.xlu0 %6092, %v826_v14   ;;  %935 = vperm.xlu1 %6093, %v7269_v52   ;;  %v842_v55 = vsub.f32 %v7254_v21, %v826_v14  ;;  %6240 = vpow2.f32 %v856_v13  ;;  %v860_v21 = vmul.f32 1.442695, %v837_v34 }
 0x1a1   : > { %v811_v48 = vpop.xlane.xlu1 %810  ;;  %v809_v11 = vpop.xlane.xlu0 %808  ;;  %6242 = vpow2.f32 %v866_v46  ;;  %v839_v14 = vsub.f32 %v7234_v20, %v7249_v54 }
 0x1a2   : > { %v828_v32 = vmax.f32 %v7272_v29, %v811_v48  ;;  %v7286_v62 = vmax.f32 %v7274_v27, %v809_v11  ;;  %v7298_v19 = vpop.eup %6226  ;;  %6244 = vpow2.f32 %v860_v21 }
 0x1a3   : > { %9558 = vst [vmem:[#allocation43_spill] sm:$0xff] %v7298_v19  ;;  %v7315_v23 = vpop.eup %6228 }
 0x1a4   : > { %1407 = vst.msk [vmem:[#allocation2 + $0x70] sm:$0xff] %vm1086_vm2, %v828_v32  ;;  %1406 = vst.msk [vmem:[#allocation2 + $0x68] sm:$0xff] %vm1086_vm2, %v7286_v62  ;;  %950 = vperm.xlu0 %6092, %v828_v32   ;;  %945 = vperm.xlu1 %6093, %v7286_v62   ;;  %v844_v30 = vsub.f32 %v7272_v29, %v828_v32  ;;  %v864_v29 = vmul.f32 1.442695, %v839_v14  ;;  %v841_v32 = vsub.f32 %v7256_v42, %v7269_v52 }
 0x1a5   : > { %v1558_v33 = vpop.xlane.xlu1 %1557  ;;  %v813_v0 = vpop.xlane.xlu0 %812  ;;  %v843_v52 = vsub.f32 %v7274_v27, %v7286_v62 }
 0x1a6   : > { %v7302_v48 = vmax.f32 %v7296_v7, %v1558_v33  ;;  %v7305_v11 = vmax.f32 %v7288_v51, %v813_v0  ;;  %v7323_v33 = vpop.eup %6230  ;;  %v870_v0 = vmul.f32 1.442695, %v842_v55  ;;  %v7344_v55 = vld [vmem:[#allocation2 + $0x28] sm:$0xff]  ;;  %v874_v54 = vmul.f32 1.442695, %v844_v30 }
 0x1a7   : > { %9560 = vst [vmem:[#allocation45_spill] sm:$0xff] %v7323_v33  ;;  %v7348_v20 = vpop.eup %6232  ;;  %v868_v30 = vmul.f32 1.442695, %v841_v32  ;;  %v872_v10 = vmul.f32 1.442695, %v843_v52  ;;  %v7422_v52 = vld [vmem:[#allocation2 + $0x40] sm:$0xff] }
 0x1a8   : > { %2296 = vst.msk [vmem:[#allocation2] sm:$0xff] %vm1861_vm3, %v7302_v48  ;;  %1126 = vperm.xlu0 %6092, %v7298_v19   ;;  %955 = vperm.xlu1 %6093, %v7305_v11   ;;  %6246 = vpow2.f32 %v870_v0  ;;  %v7356_v21 = vpop.eup %6234  ;;  %v7368_v0 = vld [vmem:[#allocation2 + $0x38] sm:$0xff]  ;;  %9573 = vst [vmem:[#allocation58_spill] sm:$0xff] %v7422_v52 }
 0x1a9   : > { %1408 = vst.msk [vmem:[#allocation2 + $0x78] sm:$0xff] %vm1086_vm2, %v7305_v11  ;;  %v1564_v36 = vpop.xlane.xlu1 %1563  ;;  %v1560_v13 = vpop.xlane.xlu0 %1559  ;;  %9564 = vst [vmem:[#allocation49_spill] sm:$0xff] %v7356_v21  ;;  %6248 = vpow2.f32 %v864_v29 }
 0x1aa   : > { %v7327_v2 = vmax.f32 %v7319_v12, %v1564_v36  ;;  %v7330_v34 = vmax.f32 %v7321_v44, %v1560_v13  ;;  %v7346_v36 = vld [vmem:[#allocation2 + $0x10] sm:$0xff]  ;;  %v7372_v42 = vpop.eup %6236  ;;  %6250 = vpow2.f32 %v874_v54  ;;  %v845_v54 = vsub.f32 %v7288_v51, %v7305_v11  ;;  %v7420_v11 = vld [vmem:[#allocation2 + $0x58] sm:$0xff] }
 0x1ab   : > { %9562 = vst [vmem:[#allocation47_spill] sm:$0xff] %v7346_v36  ;;  %9566 = vst [vmem:[#allocation51_spill] sm:$0xff] %v7372_v42  ;;  %v7382_v29 = vpop.eup %6238  ;;  %6252 = vpow2.f32 %v868_v30 }
 0x1ac   : > { %9561 = vst [vmem:[#allocation46_spill] sm:$0xff] %v7330_v34  ;;  %2299 = vst.msk [vmem:[#allocation2 + $0x18] sm:$0xff] %vm1861_vm3, %v7327_v2  ;;  %1141 = vperm.xlu0 %6092, %v7323_v33   ;;  %1121 = vperm.xlu1 %6093, %v7315_v23   ;;  %6254 = vpow2.f32 %v872_v10  ;;  %v876_v30 = vmul.f32 1.442695, %v845_v54  ;;  %v7444_v54 = vld [vmem:[#allocation2 + $0x68] sm:$0xff] }
 0x1ad   : > { %2297 = vst.msk [vmem:[#allocation2 + $0x8] sm:$0xff] %vm1861_vm3, %v7330_v34  ;;  %v1568_v46 = vpop.xlane.xlu1 %1567  ;;  %v1562_v13 = vpop.xlane.xlu0 %1561  ;;  %9568 = vst [vmem:[#allocation53_spill] sm:$0xff] %v7382_v29 }
 0x1ae   : > { %v7351_v38 = vmax.f32 %v7344_v55, %v1568_v46  ;;  %v7354_v44 = vmax.f32 %v7346_v36, %v1562_v13  ;;  %v7370_v46 = vld [vmem:[#allocation2 + $0x20] sm:$0xff]  ;;  %v7394_v27 = vpop.eup %6240  ;;  %6256 = vpow2.f32 %v876_v30 }
 0x1af   : > { %9565 = vst [vmem:[#allocation50_spill] sm:$0xff] %v7370_v46  ;;  %9569 = vst [vmem:[#allocation54_spill] sm:$0xff] %v7394_v27  ;;  %v7400_v9 = vpop.eup %6242 }
 0x1b0   : > { %9563 = vst [vmem:[#allocation48_spill] sm:$0xff] %v7354_v44  ;;  %2301 = vst.msk [vmem:[#allocation2 + $0x28] sm:$0xff] %vm1861_vm3, %v7351_v38  ;;  %1151 = vperm.xlu0 %6092, %v7356_v21   ;;  %1131 = vperm.xlu1 %6093, %v7348_v20  }
 0x1b1   : > { %2298 = vst.msk [vmem:[#allocation2 + $0x10] sm:$0xff] %vm1861_vm3, %v7354_v44  ;;  %v1572_v14 = vpop.xlane.xlu1 %1571  ;;  %v1566_v13 = vpop.xlane.xlu0 %1565  ;;  %9571 = vst [vmem:[#allocation56_spill] sm:$0xff] %v7400_v9 }
 0x1b2   : > { %v7377_v36 = vmax.f32 %v7368_v0, %v1572_v14  ;;  %v7380_v43 = vmax.f32 %v7370_v46, %v1566_v13  ;;  %v7396_v14 = vld [vmem:[#allocation2 + $0x48] sm:$0xff]  ;;  %v7398_v13 = vld [vmem:[#allocation2 + $0x30] sm:$0xff] }
 0x1b3   : > { %9570 = vst [vmem:[#allocation55_spill] sm:$0xff] %v7398_v13 }
 0x1b4   : > { %9567 = vst [vmem:[#allocation52_spill] sm:$0xff] %v7380_v43  ;;  %2303 = vst.msk [vmem:[#allocation2 + $0x38] sm:$0xff] %vm1861_vm3, %v7377_v36  ;;  %1161 = vperm.xlu0 %6092, %v7382_v29   ;;  %1136 = vperm.xlu1 %6093, %v7372_v42  }
 0x1b5   : > { %2300 = vst.msk [vmem:[#allocation2 + $0x20] sm:$0xff] %vm1861_vm3, %v7380_v43  ;;  %v1576_v62 = vpop.xlane.xlu1 %1575  ;;  %v1570_v32 = vpop.xlane.xlu0 %1569 }
 0x1b6   : > { %v7405_v46 = vmax.f32 %v7396_v14, %v1576_v62  ;;  %v7408_v18 = vmax.f32 %v7398_v13, %v1570_v32  ;;  %v7424_v62 = vpop.eup %6244 }
 0x1b7   : > { %9574 = vst [vmem:[#allocation59_spill] sm:$0xff] %v7424_v62  ;;  %v7432_v13 = vpop.eup %6246 }
 0x1b8   : > { %9572 = vst [vmem:[#allocation57_spill] sm:$0xff] %v7408_v18  ;;  %2305 = vst.msk [vmem:[#allocation2 + $0x48] sm:$0xff] %vm1861_vm3, %v7405_v46  ;;  %1171 = vperm.xlu0 %6092, %v7400_v9   ;;  %1146 = vperm.xlu1 %6093, %v7394_v27   ;;  %v7448_v9 = vpop.eup %6248 }
 0x1b9   : > { %2302 = vst.msk [vmem:[#allocation2 + $0x30] sm:$0xff] %vm1861_vm3, %v7408_v18  ;;  %v1580_v51 = vpop.xlane.xlu1 %1579  ;;  %v1574_v32 = vpop.xlane.xlu0 %1573  ;;  %9576 = vst [vmem:[#allocation61_spill] sm:$0xff] %v7432_v13 }
 0x1ba   : > { %v7427_v29 = vmax.f32 %v7420_v11, %v1580_v51  ;;  %v7430_v8 = vmax.f32 %v7422_v52, %v1574_v32  ;;  %v7446_v51 = vld [vmem:[#allocation2 + $0x50] sm:$0xff]  ;;  %9578 = vst [vmem:[#allocation63_spill] sm:$0xff] %v7448_v9  ;;  %v7456_v52 = vpop.eup %6250 }
 0x1bb   : > { %9577 = vst [vmem:[#allocation62_spill] sm:$0xff] %v7446_v51  ;;  %9580 = vst [vmem:[#allocation65_spill] sm:$0xff] %v7456_v52 }
 0x1bc   : > { %9575 = vst [vmem:[#allocation60_spill] sm:$0xff] %v7430_v8  ;;  %2307 = vst.msk [vmem:[#allocation2 + $0x58] sm:$0xff] %vm1861_vm3, %v7427_v29  ;;  %1181 = vperm.xlu0 %6092, %v7432_v13   ;;  %1156 = vperm.xlu1 %6093, %v7424_v62   ;;  %v7472_v13 = vpop.eup %6252 }
 0x1bd   : > { %2304 = vst.msk [vmem:[#allocation2 + $0x40] sm:$0xff] %vm1861_vm3, %v7430_v8  ;;  %v1584_v10 = vpop.xlane.xlu1 %1583  ;;  %v1578_v32 = vpop.xlane.xlu0 %1577 }
 0x1be   : > { %v7451_v27 = vmax.f32 %v7444_v54, %v1584_v10  ;;  %v7454_v21 = vmax.f32 %v7446_v51, %v1578_v32  ;;  %v7468_v10 = vld [vmem:[#allocation2 + $0x78] sm:$0xff]  ;;  %v7470_v32 = vld [vmem:[#allocation2 + $0x60] sm:$0xff]  ;;  %v7494_v19 = vpop.eup %6254 }
 0x1bf   : > { %9581 = vst [vmem:[#allocation66_spill] sm:$0xff] %v7470_v32  ;;  %9586 = vst [vmem:[#allocation70_spill] sm:$0xff] %v7494_v19 }
 0x1c0   : > { %9579 = vst [vmem:[#allocation64_spill] sm:$0xff] %v7454_v21  ;;  %2309 = vst.msk [vmem:[#allocation2 + $0x68] sm:$0xff] %vm1861_vm3, %v7451_v27  ;;  %1191 = vperm.xlu0 %6092, %v7456_v52   ;;  %1166 = vperm.xlu1 %6093, %v7448_v9   ;;  %v9583_v52 = vmov 1  }
 0x1c1   : > { %2306 = vst.msk [vmem:[#allocation2 + $0x50] sm:$0xff] %vm1861_vm3, %v7454_v21  ;;  %v1588_v30 = vpop.xlane.xlu1 %1587  ;;  %v1582_v33 = vpop.xlane.xlu0 %1581 }
 0x1c2   : > { %v7475_v42 = vmax.f32 %v7468_v10, %v1588_v30  ;;  %v7478_v62 = vmax.f32 %v7470_v32, %v1582_v33  ;;  %v7489_v30 = vld [vmem:[#allocation2 + $0x70] sm:$0xff]  ;;  %v7502_v32 = vpop.eup %6256 }
 0x1c3   : > { %9584 = vst [vmem:[#allocation68_spill] sm:$0xff] %v7489_v30  ;;  %9587 = vst [vmem:[#allocation71_spill] sm:$0xff] %v7502_v32 }
 0x1c4   : > { %9582 = vst [vmem:[#allocation67_spill] sm:$0xff] %v7478_v62  ;;  %2311 = vst.msk [vmem:[#allocation2 + $0x78] sm:$0xff] %vm1861_vm3, %v7475_v42  ;;  %6094 = vset.pattern.permute.xlu0 %v9583_v52  ;;  %1176 = vperm.xlu1 %6093, %v7472_v13  }
 0x1c5   : > { %2308 = vst.msk [vmem:[#allocation2 + $0x60] sm:$0xff] %vm1861_vm3, %v7478_v62  ;;  %1655 = vperm.xlu0 %6094, %v7302_v48   ;;  %v1586_v9 = vpop.xlane.xlu0 %1585 }
 0x1c6   : > { %v7492_v33 = vmax.f32 %v7489_v30, %v1586_v9 }
 0x1c8   : > { %9585 = vst [vmem:[#allocation69_spill] sm:$0xff] %v7492_v33  ;;  %2310 = vst.msk [vmem:[#allocation2 + $0x70] sm:$0xff] %vm1861_vm3, %v7492_v33  ;;  %1186 = vperm.xlu1 %6093, %v7494_v19  }
 0x1c9   : > { %1670 = vperm.xlu0 %6094, %v7327_v2  }
 0x1cc   : > { %1196 = vperm.xlu1 %6093, %v7502_v32  }
 0x1cd   : > { %1680 = vperm.xlu0 %6094, %v7351_v38  }
 0x1d0   : > { %6095 = vset.pattern.permute.xlu1 %v9583_v52 }
 0x1d1   : > { %1690 = vperm.xlu0 %6094, %v7377_v36   ;;  %1660 = vperm.xlu1 %6095, %v7330_v34  }
 0x1d5   : > { %1700 = vperm.xlu0 %6094, %v7405_v46   ;;  %1665 = vperm.xlu1 %6095, %v7354_v44  }
 0x1d9   : > { %1710 = vperm.xlu0 %6094, %v7427_v29   ;;  %1675 = vperm.xlu1 %6095, %v7380_v43  }
 0x1dd   : > { %1720 = vperm.xlu0 %6094, %v7451_v27   ;;  %1685 = vperm.xlu1 %6095, %v7408_v18  }
 0x1e1   : > { %1695 = vperm.xlu1 %6095, %v7430_v8  }
 0x1e5   : > { %1705 = vperm.xlu1 %6095, %v7454_v21  }
 0x1e9   : > { %1715 = vperm.xlu1 %6095, %v7478_v62  }
 0x1ed   : > { %1725 = vperm.xlu1 %6095, %v7492_v33  }
 0x203   : > { %v881_v9 = vpop.permute.xlu1 %880 }
 0x204   : > { %v958_v52 = vsub.f32 %v6900_v17, %v881_v9 }
 0x206   : > { %v974_v51 = vmul.f32 1.442695, %v958_v52 }
 0x207   : > { %v891_v30 = vpop.permute.xlu1 %890  ;;  %v886_v44 = vpop.permute.xlu0 %885 }
 0x208   : > { %6258 = vpow2.f32 %v974_v51  ;;  %v960_v43 = vsub.f32 %v6912_v39, %v891_v30  ;;  %v959_v34 = vsub.f32 %v6921_v50, %v886_v44 }
 0x20a   : > { %v978_v18 = vmul.f32 1.442695, %v960_v43  ;;  %v976_v32 = vmul.f32 1.442695, %v959_v34 }
 0x20b   : > { %v896_v8 = vpop.permute.xlu1 %895  ;;  %v901_v19 = vpop.permute.xlu0 %900 }
 0x20c   : > { %6260 = vpow2.f32 %v978_v18  ;;  %v961_v62 = vsub.f32 %v6938_v63, %v896_v8  ;;  %v962_v33 = vsub.f32 %v6944_v6, %v901_v19 }
 0x20d   : > { %6262 = vpow2.f32 %v976_v32 }
 0x20e   : > { %v980_v21 = vmul.f32 1.442695, %v961_v62  ;;  %v982_v17 = vmul.f32 1.442695, %v962_v33 }
 0x20f   : > { %v906_v9 = vpop.permute.xlu1 %905  ;;  %v911_v52 = vpop.permute.xlu0 %910 }
 0x210   : > { %6264 = vpow2.f32 %v980_v21  ;;  %v963_v51 = vsub.f32 %v6964_v40, %v906_v9  ;;  %v964_v39 = vsub.f32 %v6961_v35, %v911_v52 }
 0x211   : > { %6266 = vpow2.f32 %v982_v17 }
 0x212   : > { %v984_v50 = vmul.f32 1.442695, %v963_v51  ;;  %v986_v43 = vmul.f32 1.442695, %v964_v39 }
 0x213   : > { %v916_v44 = vpop.permute.xlu1 %915  ;;  %v921_v34 = vpop.permute.xlu0 %920 }
 0x214   : > { %6268 = vpow2.f32 %v984_v50  ;;  %v965_v8 = vsub.f32 %v6984_v3, %v916_v44  ;;  %v966_v18 = vsub.f32 %v6981_v1, %v921_v34 }
 0x215   : > { %v6259_v63 = vpop.eup %6258  ;;  %6270 = vpow2.f32 %v986_v43 }
 0x216   : > { %v988_v6 = vmul.f32 1.442695, %v965_v8  ;;  %v990_v19 = vmul.f32 1.442695, %v966_v18  ;;  %5765 = vmatprep.mubr.f32.mxu0 %v6259_v63  ;;  %1038 = vadd.xlane.f32.xlu0 %v6259_v63 }
 0x217   : > { %v926_v21 = vpop.permute.xlu1 %925  ;;  %v931_v40 = vpop.permute.xlu0 %930 }
 0x218   : > { %6272 = vpow2.f32 %v988_v6  ;;  %v967_v35 = vsub.f32 %v6997_v22, %v926_v21  ;;  %v968_v62 = vsub.f32 %v7002_v47, %v931_v40 }
 0x219   : > { %v6261_v32 = vpop.eup %6260  ;;  %6274 = vpow2.f32 %v990_v19 }
 0x21a   : > { %v6263_v30 = vpop.eup %6262  ;;  %v992_v33 = vmul.f32 1.442695, %v967_v35  ;;  %v994_v3 = vmul.f32 1.442695, %v968_v62  ;;  %1042 = vadd.xlane.f32.xlu0 %v6261_v32 }
 0x21b   : > { %1040 = vadd.xlane.f32.xlu1 %v6263_v30  ;;  %5766 = vmatmul.mubr.f32.vlgmr.msra.gmra.mxu0 %v6263_v30  ;;  %v936_v1 = vpop.permute.xlu1 %935  ;;  %v941_v17 = vpop.permute.xlu0 %940 }
 0x21c   : > { %6276 = vpow2.f32 %v992_v33  ;;  %v969_v9 = vsub.f32 %v7014_v58, %v936_v1  ;;  %5768 = vmatprep.mubr.f32.mxu0 %v6261_v32  ;;  %v970_v52 = vsub.f32 %v7019_v61, %v941_v17 }
 0x21d   : > { %v6265_v51 = vpop.eup %6264  ;;  %6278 = vpow2.f32 %v994_v3 }
 0x21e   : > { %v6267_v22 = vpop.eup %6266  ;;  %v996_v47 = vmul.f32 1.442695, %v969_v9  ;;  %v998_v39 = vmul.f32 1.442695, %v970_v52  ;;  %1044 = vadd.xlane.f32.xlu0 %v6265_v51 }
 0x21f   : > { %5769 = vmatmul.mubr.f32.gmra.mxu0 %v6265_v51  ;;  %1046 = vadd.xlane.f32.xlu1 %v6267_v22  ;;  %v946_v50 = vpop.permute.xlu1 %945  ;;  %v951_v43 = vpop.permute.xlu0 %950 }
 0x220   : > { %6280 = vpow2.f32 %v996_v47  ;;  %v971_v44 = vsub.f32 %v7033_v59, %v946_v50  ;;  %5771 = vmatprep.mubr.f32.mxu0 %v6267_v22  ;;  %v972_v34 = vsub.f32 %v7030_v25, %v951_v43 }
 0x221   : > { %v6269_v58 = vpop.eup %6268  ;;  %6282 = vpow2.f32 %v998_v39 }
 0x222   : > { %v6271_v8 = vpop.eup %6270  ;;  %v1000_v61 = vmul.f32 1.442695, %v971_v44  ;;  %v1002_v18 = vmul.f32 1.442695, %v972_v34  ;;  %1048 = vadd.xlane.f32.xlu0 %v6269_v58 }
 0x223   : > { %5772 = vmatmul.mubr.f32.gmra.mxu0 %v6269_v58  ;;  %1050 = vadd.xlane.f32.xlu1 %v6271_v8  ;;  %v956_v63 = vpop.permute.xlu1 %955  ;;  %v7534_v6 = vpop.permute.xlu0 %1126 }
 0x224   : > { %6284 = vpow2.f32 %v1000_v61  ;;  %v973_v19 = vsub.f32 %v7046_v5, %v956_v63  ;;  %5774 = vmatprep.mubr.f32.mxu0 %v6271_v8 }
 0x225   : > { %v6273_v21 = vpop.eup %6272  ;;  %6286 = vpow2.f32 %v1002_v18 }
 0x226   : > { %v6275_v59 = vpop.eup %6274  ;;  %v1004_v40 = vmul.f32 1.442695, %v973_v19  ;;  %1052 = vadd.xlane.f32.xlu0 %v6273_v21 }
 0x227   : > { %5775 = vmatmul.mubr.f32.gmra.mxu0 %v6273_v21  ;;  %1054 = vadd.xlane.f32.xlu1 %v6275_v59  ;;  %v7537_v25 = vpop.permute.xlu1 %1121  ;;  %v7539_v35 = vpop.permute.xlu0 %1141 }
 0x228   : > { %6288 = vpow2.f32 %v1004_v40  ;;  %5777 = vmatprep.mubr.f32.mxu0 %v6275_v59 }
 0x229   : > { %v6277_v62 = vpop.eup %6276 }
 0x22a   : > { %v6279_v32 = vpop.eup %6278  ;;  %1056 = vadd.xlane.f32.xlu0 %v6277_v62 }
 0x22b   : > { %5778 = vmatmul.mubr.f32.gmra.mxu0 %v6277_v62  ;;  %1058 = vadd.xlane.f32.xlu1 %v6279_v32  ;;  %v7541_v5 = vpop.permute.xlu1 %1131  ;;  %v7543_v30 = vpop.permute.xlu0 %1151 }
 0x22c   : > { %5780 = vmatprep.mubr.f32.mxu0 %v6279_v32 }
 0x22d   : > { %v6281_v33 = vpop.eup %6280 }
 0x22e   : > { %v6283_v3 = vpop.eup %6282  ;;  %1060 = vadd.xlane.f32.xlu0 %v6281_v33 }
 0x22f   : > { %5781 = vmatmul.mubr.f32.gmra.mxu0 %v6281_v33  ;;  %1062 = vadd.xlane.f32.xlu1 %v6283_v3  ;;  %v7545_v1 = vpop.permute.xlu1 %1136  ;;  %v7547_v17 = vpop.permute.xlu0 %1161 }
 0x230   : > { %5783 = vmatprep.mubr.f32.mxu0 %v6283_v3 }
 0x231   : > { %v6285_v9 = vpop.eup %6284 }
 0x232   : > { %v6287_v52 = vpop.eup %6286  ;;  %1064 = vadd.xlane.f32.xlu0 %v6285_v9 }
 0x233   : > { %5784 = vmatmul.mubr.f32.gmra.mxu0 %v6285_v9  ;;  %1066 = vadd.xlane.f32.xlu1 %v6287_v52  ;;  %v7549_v51 = vpop.permute.xlu1 %1146  ;;  %v7551_v22 = vpop.permute.xlu0 %1171 }
 0x234   : > { %5786 = vmatprep.mubr.f32.mxu0 %v6287_v52 }
 0x235   : > { %v6289_v47 = vpop.eup %6288 }
 0x236   : > { %1068 = vadd.xlane.f32.xlu0 %v6289_v47 }
 0x237   : > { %5787 = vmatmul.mubr.f32.gmra.mxu0 %v6289_v47  ;;  %v7553_v39 = vpop.permute.xlu1 %1156  ;;  %v7555_v50 = vpop.permute.xlu0 %1181 }
 0x23b   : > { %v7557_v43 = vpop.permute.xlu1 %1166  ;;  %v7559_v44 = vpop.permute.xlu0 %1191 }
 0x23f   : > { %v7561_v34 = vpop.permute.xlu1 %1176 }
 0x240   : > { %v1656_v58 = vpop.permute.xlu0 %1655 }
 0x241   : > { %v1733_v8 = vsub.f32 %v7041_v28, %v1656_v58 }
 0x243   : > { %v1749_v61 = vmul.f32 1.442695, %v1733_v8  ;;  %v7564_v18 = vpop.permute.xlu1 %1186 }
 0x244   : > { %v1671_v63 = vpop.permute.xlu0 %1670 }
 0x245   : > { %6290 = vpow2.f32 %v1749_v61  ;;  %v1736_v19 = vsub.f32 %v7057_v57, %v1671_v63 }
 0x247   : > { %v1755_v21 = vmul.f32 1.442695, %v1736_v19  ;;  %v7567_v59 = vpop.permute.xlu1 %1196 }
 0x248   : > { %v1681_v40 = vpop.permute.xlu0 %1680 }
 0x249   : > { %6292 = vpow2.f32 %v1755_v21  ;;  %v1738_v62 = vsub.f32 %v7068_v31, %v1681_v40 }
 0x24b   : > { %v1759_v32 = vmul.f32 1.442695, %v1738_v62 }
 0x24c   : > { %v1661_v33 = vpop.permute.xlu1 %1660  ;;  %v1691_v3 = vpop.permute.xlu0 %1690 }
 0x24d   : > { %6294 = vpow2.f32 %v1759_v32  ;;  %v1734_v28 = vsub.f32 %v7051_v45, %v1661_v33  ;;  %v1740_v9 = vsub.f32 %v7079_v53, %v1691_v3 }
 0x24f   : > { %v1751_v52 = vmul.f32 1.442695, %v1734_v28  ;;  %v1763_v47 = vmul.f32 1.442695, %v1740_v9 }
 0x250   : > { %v1666_v58 = vpop.permute.xlu1 %1665  ;;  %v1701_v8 = vpop.permute.xlu0 %1700 }
 0x251   : > { %6296 = vpow2.f32 %v1751_v52  ;;  %v1735_v57 = vsub.f32 %v7062_v37, %v1666_v58  ;;  %v1742_v61 = vsub.f32 %v7090_v26, %v1701_v8 }
 0x252   : > { %v6291_v63 = vpop.eup %6290  ;;  %6298 = vpow2.f32 %v1763_v47 }
 0x253   : > { %v1753_v31 = vmul.f32 1.442695, %v1735_v57  ;;  %v1767_v19 = vmul.f32 1.442695, %v1742_v61  ;;  %1813 = vadd.xlane.f32.xlu1 %v6291_v63  ;;  %5821 = vmatprep.mubr.f32.mxu1 %v6291_v63 }
 0x254   : > { %v1676_v21 = vpop.permute.xlu1 %1675  ;;  %v1711_v40 = vpop.permute.xlu0 %1710 }
 0x255   : > { %6300 = vpow2.f32 %v1753_v31  ;;  %v1737_v45 = vsub.f32 %v7073_v56, %v1676_v21  ;;  %v1744_v53 = vsub.f32 %v7099_v49, %v1711_v40 }
 0x256   : > { %v7576_v62 = vpop.eup %6292  ;;  %6302 = vpow2.f32 %v1767_v19 }
 0x257   : > { %v1757_v32 = vmul.f32 1.442695, %v1737_v45  ;;  %v1771_v37 = vmul.f32 1.442695, %v1744_v53  ;;  %1819 = vadd.xlane.f32.xlu1 %v7576_v62 }
 0x258   : > { %v1686_v26 = vpop.permute.xlu1 %1685  ;;  %v1721_v33 = vpop.permute.xlu0 %1720 }
 0x259   : > { %6304 = vpow2.f32 %v1757_v32  ;;  %v1739_v3 = vsub.f32 %v7084_v15, %v1686_v26  ;;  %v1746_v28 = vsub.f32 %v7107_v24, %v1721_v33 }
 0x25a   : > { %v7581_v9 = vpop.eup %6294  ;;  %6306 = vpow2.f32 %v1771_v37 }
 0x25b   : > { %v1761_v56 = vmul.f32 1.442695, %v1739_v3  ;;  %v1775_v52 = vmul.f32 1.442695, %v1746_v28  ;;  %1823 = vadd.xlane.f32.xlu1 %v7581_v9  ;;  %v9588_v28 = vsub.f32 %v7296_v7, %v7302_v48  ;;  %v9592_v7 = vsub.f32 %v7396_v14, %v7405_v46  ;;  %v1006_v46 = vld [vmem:[#allocation3] sm:$0xff] }
 0x25c   : > { %v1696_v49 = vpop.permute.xlu1 %1695 }
 0x25d   : > { %6308 = vpow2.f32 %v1761_v56  ;;  %v1741_v47 = vsub.f32 %v7095_v60, %v1696_v49  ;;  %v1621_v56 = vmul.f32 1.442695, %v9588_v28  ;;  %v1639_v48 = vmul.f32 1.442695, %v9592_v7  ;;  %v1011_v7 = vld [vmem:[#allocation3 + $0x28] sm:$0xff] }
 0x25e   : > { %v7585_v58 = vpop.eup %6296  ;;  %6310 = vpow2.f32 %v1775_v52  ;;  %v9589_v52 = vsub.f32 %v7319_v12, %v7327_v2 }
 0x25f   : > { %v7587_v8 = vpop.eup %6298  ;;  %v1765_v57 = vmul.f32 1.442695, %v1741_v47  ;;  %1815 = vadd.xlane.f32.xlu0 %v7585_v58  ;;  %v9590_v47 = vsub.f32 %v7344_v55, %v7351_v38  ;;  %v9593_v38 = vsub.f32 %v7420_v11, %v7427_v29  ;;  %v9594_v55 = vsub.f32 %v7444_v54, %v7451_v27  ;;  %v9595_v27 = vld [vmem:[#allocation43_spill] sm:$0xff] }
 0x260   : > { %1827 = vadd.xlane.f32.xlu1 %v7587_v8  ;;  %v1706_v15 = vpop.permute.xlu1 %1705  ;;  %v1627_v49 = vmul.f32 1.442695, %v9589_v52  ;;  %v1022_v29 = vmul.f32 %v7315_v23, %v1006_v46  ;;  %v1010_v52 = vld [vmem:[#allocation3 + $0x20] sm:$0xff] }
 0x261   : > { %6312 = vpow2.f32 %v1765_v57  ;;  %v1743_v24 = vsub.f32 %v7104_v16, %v1706_v15  ;;  %v1631_v57 = vmul.f32 1.442695, %v9590_v47  ;;  %v9591_v15 = vsub.f32 %v7368_v0, %v7377_v36  ;;  %v9596_v47 = vld [vmem:[#allocation51_spill] sm:$0xff] }
 0x262   : > { %v7592_v61 = vpop.eup %6300  ;;  %v1643_v2 = vmul.f32 1.442695, %v9593_v38  ;;  %v1647_v36 = vmul.f32 1.442695, %v9594_v55  ;;  %v1620_v0 = vsub.f32 %v7468_v10, %v7475_v42  ;;  %v1012_v55 = vld [vmem:[#allocation3 + $0x30] sm:$0xff] }
 0x263   : > { %v7594_v63 = vpop.eup %6302  ;;  %v1769_v31 = vmul.f32 1.442695, %v1743_v24  ;;  %1817 = vadd.xlane.f32.xlu0 %v7592_v61  ;;  %v1635_v24 = vmul.f32 1.442695, %v9591_v15 }
 0x264   : > { %1831 = vadd.xlane.f32.xlu1 %v7594_v63  ;;  %v1716_v60 = vpop.permute.xlu1 %1715  ;;  %v1651_v11 = vmul.f32 1.442695, %v1620_v0  ;;  %v9598_v0 = vld [vmem:[#allocation54_spill] sm:$0xff] }
 0x265   : > { %6314 = vpow2.f32 %v1769_v31  ;;  %v1745_v19 = vsub.f32 %v7112_v41, %v1716_v60  ;;  %v1027_v46 = vmul.f32 %v9598_v0, %v1011_v7  ;;  %v9602_v7 = vld [vmem:[#allocation40_spill] sm:$0xff] }
 0x266   : > { %v7599_v21 = vpop.eup %6304  ;;  %v9605_v0 = vld [vmem:[#allocation56_spill] sm:$0xff] }
 0x267   : > { %v7601_v40 = vpop.eup %6306  ;;  %v1773_v45 = vmul.f32 1.442695, %v1745_v19  ;;  %1821 = vadd.xlane.f32.xlu0 %v7599_v21  ;;  %v1008_v19 = vld [vmem:[#allocation3 + $0x10] sm:$0xff] }
 0x268   : > { %1835 = vadd.xlane.f32.xlu1 %v7601_v40  ;;  %v1726_v16 = vpop.permute.xlu1 %1725 }
 0x269   : > { %6316 = vpow2.f32 %v1773_v45  ;;  %v1747_v53 = vsub.f32 %v7120_v4, %v1726_v16 }
 0x26a   : > { %v7606_v32 = vpop.eup %6308 }
 0x26b   : > { %v7608_v37 = vpop.eup %6310  ;;  %v1777_v26 = vmul.f32 1.442695, %v1747_v53  ;;  %1825 = vadd.xlane.f32.xlu0 %v7606_v32  ;;  %v1007_v53 = vld [vmem:[#allocation3 + $0x8] sm:$0xff] }
 0x26c   : > { %1839 = vadd.xlane.f32.xlu1 %v7608_v37  ;;  %v1023_v54 = vmul.f32 %v9595_v27, %v1007_v53  ;;  %v1014_v27 = vld [vmem:[#allocation3 + $0x40] sm:$0xff] }
 0x26d   : > { %6318 = vpow2.f32 %v1777_v26  ;;  %v1009_v26 = vld [vmem:[#allocation3 + $0x18] sm:$0xff] }
 0x26e   : > { %v7612_v41 = vpop.eup %6312  ;;  %6320 = vpow2.f32 %v1621_v56 }
 0x26f   : > { %1829 = vadd.xlane.f32.xlu0 %v7612_v41  ;;  %6322 = vpow2.f32 %v1627_v49 }
 0x270   : > { %6324 = vpow2.f32 %v1631_v57  ;;  %v1025_v57 = vmul.f32 %v9596_v47, %v1009_v26 }
 0x271   : > { %6326 = vpow2.f32 %v1635_v24 }
 0x272   : > { %v7615_v33 = vpop.eup %6314  ;;  %6328 = vpow2.f32 %v1639_v48 }
 0x273   : > { %1833 = vadd.xlane.f32.xlu0 %v7615_v33  ;;  %6330 = vpow2.f32 %v1643_v2 }
 0x274   : > { %6332 = vpow2.f32 %v1647_v36 }
 0x275   : > { %6334 = vpow2.f32 %v1651_v11 }
 0x276   : > { %v7618_v3 = vpop.eup %6316 }
 0x277   : > { %1837 = vadd.xlane.f32.xlu0 %v7618_v3 }
 0x27a   : > { %v7621_v4 = vpop.eup %6318 }
 0x27b   : > { %1841 = vadd.xlane.f32.xlu0 %v7621_v4  ;;  %v7640_v31 = vpop.eup %6320 }
 0x27c   : > { %v7646_v12 = vpop.eup %6322 }
 0x27d   : > { %v7654_v14 = vpop.eup %6324 }
 0x27e   : > { %v7658_v45 = vpop.eup %6326 }
 0x27f   : > { %v7664_v23 = vpop.eup %6328 }
 0x280   : > { %v7671_v48 = vpop.eup %6330 }
 0x291   : > { %1730 = vperm.xlu0 %6094, %v7475_v42   ;;  %v1024_v42 = vmul.f32 %v7348_v20, %v1008_v19  ;;  %v9597_v20 = vld [vmem:[#allocation45_spill] sm:$0xff]  ;;  %v1013_v19 = vld [vmem:[#allocation3 + $0x38] sm:$0xff] }
 0x292   : > { %v1026_v15 = vmul.f32 %v9597_v20, %v1010_v52 }
 0x295   : > { %1896 = vperm.xlu0 %6094, %v7640_v31  }
 0x299   : > { %1911 = vperm.xlu0 %6094, %v7646_v12  }
 0x29d   : > { %1921 = vperm.xlu0 %6094, %v7654_v14  }
 0x29f   : > { %v1039_v60 = vpop.xlane.xlu0 %1038 }
 0x2a0   : > { %v1070_v16 = vadd.f32 %v1039_v60, %v1022_v29  ;;  %v9599_v29 = vld [vmem:[#allocation49_spill] sm:$0xff] }
 0x2a1   : > { %1931 = vperm.xlu0 %6094, %v7658_v45   ;;  %v1028_v11 = vmul.f32 %v9599_v29, %v1012_v55  ;;  %v9604_v55 = vld [vmem:[#allocation63_spill] sm:$0xff] }
 0x2a2   : > { %1087 = vst.msk [vmem:[#allocation3] sm:$0xff] %vm1086_vm2, %v1070_v16  ;;  %v7678_v16 = vpop.eup %6332 }
 0x2a3   : > { %v1043_v10 = vpop.xlane.xlu0 %1042  ;;  %v7685_v47 = vpop.eup %6334 }
 0x2a4   : > { %v1041_v28 = vpop.xlane.xlu1 %1040  ;;  %v1072_v56 = vadd.f32 %v1043_v10, %v1024_v42  ;;  %v9600_v10 = vld [vmem:[#allocation59_spill] sm:$0xff] }
 0x2a5   : > { %v1071_v49 = vadd.f32 %v1041_v28, %v1023_v54  ;;  %1941 = vperm.xlu0 %6094, %v7664_v23   ;;  %v1029_v26 = vmul.f32 %v9600_v10, %v1013_v19  ;;  %v9601_v28 = vld [vmem:[#allocation53_spill] sm:$0xff] }
 0x2a6   : > { %1089 = vst.msk [vmem:[#allocation3 + $0x10] sm:$0xff] %vm1086_vm2, %v1072_v56  ;;  %v1030_v56 = vmul.f32 %v9601_v28, %v1014_v27  ;;  %v9606_v27 = vld [vmem:[#allocation36_spill] sm:$0xff]  ;;  %v9464_v28 = vmov 2  }
 0x2a7   : > { %1088 = vst.msk [vmem:[#allocation3 + $0x8] sm:$0xff] %vm1086_vm2, %v1071_v49  ;;  %v1045_v24 = vpop.xlane.xlu0 %1044  ;;  %v1015_v49 = vld [vmem:[#allocation3 + $0x48] sm:$0xff] }
 0x2a8   : > { %v1047_v38 = vpop.xlane.xlu1 %1046  ;;  %v1073_v2 = vadd.f32 %v1045_v24, %v1025_v57 }
 0x2a9   : > { %v1074_v36 = vadd.f32 %v1047_v38, %v1026_v15  ;;  %1951 = vperm.xlu0 %6094, %v7671_v48   ;;  %v1016_v15 = vld [vmem:[#allocation3 + $0x50] sm:$0xff] }
 0x2aa   : > { %1090 = vst.msk [vmem:[#allocation3 + $0x18] sm:$0xff] %vm1086_vm2, %v1073_v2  ;;  %v9603_v38 = vld [vmem:[#allocation39_spill] sm:$0xff] }
 0x2ab   : > { %1091 = vst.msk [vmem:[#allocation3 + $0x20] sm:$0xff] %vm1086_vm2, %v1074_v36  ;;  %v1049_v60 = vpop.xlane.xlu0 %1048  ;;  %v6101_v2 = vpack.i.bf16 %v9603_v38, %v9602_v7  ;;  %v1031_v36 = vmul.f32 %v9604_v55, %v1015_v49  ;;  %v9609_v55 = vld [vmem:[#allocation32_spill] sm:$0xff]  ;;  %v6488_v38 = vld [vmem:[%s6758_s24 + $0x70] sm:$0xff] }
 0x2ac   : > { %v1051_v53 = vpop.xlane.xlu1 %1050  ;;  %v1075_v42 = vadd.f32 %v1049_v60, %v1027_v46  ;;  %v1032_v46 = vmul.f32 %v9605_v0, %v1016_v15 }
 0x2ad   : > { %v1076_v54 = vadd.f32 %v1051_v53, %v1028_v11  ;;  %1961 = vperm.xlu0 %6094, %v7678_v16   ;;  %v1017_v11 = vld [vmem:[#allocation3 + $0x58] sm:$0xff]  ;;  %v1018_v53 = vld [vmem:[#allocation3 + $0x60] sm:$0xff] }
 0x2ae   : > { %1092 = vst.msk [vmem:[#allocation3 + $0x28] sm:$0xff] %vm1086_vm2, %v1075_v42 }
 0x2af   : > { %1093 = vst.msk [vmem:[#allocation3 + $0x30] sm:$0xff] %vm1086_vm2, %v1076_v54  ;;  %v1053_v52 = vpop.xlane.xlu0 %1052  ;;  %v9607_v54 = vld [vmem:[#allocation35_spill] sm:$0xff] }
 0x2b0   : > { %v1055_v57 = vpop.xlane.xlu1 %1054  ;;  %v1077_v20 = vadd.f32 %v1053_v52, %v1029_v26  ;;  %v6111_v10 = vpack.i.bf16 %v9607_v54, %v9606_v27  ;;  %v1033_v26 = vmul.f32 %v7472_v13, %v1017_v11  ;;  %v9611_v13 = vld [vmem:[#allocation70_spill] sm:$0xff]  ;;  %v9658_v54 = vld [vmem:[#allocation17_spill] sm:$0xff] }
 0x2b1   : > { %v1078_v24 = vadd.f32 %v1055_v57, %v1030_v56  ;;  %1971 = vperm.xlu0 %6094, %v7685_v47   ;;  %v9608_v56 = vld [vmem:[#allocation61_spill] sm:$0xff]  ;;  %v1019_v57 = vld [vmem:[#allocation3 + $0x68] sm:$0xff] }
 0x2b2   : > { %1094 = vst.msk [vmem:[#allocation3 + $0x38] sm:$0xff] %vm1086_vm2, %v1077_v20  ;;  %v1034_v52 = vmul.f32 %v9608_v56, %v1018_v53  ;;  %v9614_v56 = vld [vmem:[#allocation27_spill] sm:$0xff] }
 0x2b3   : > { %1095 = vst.msk [vmem:[#allocation3 + $0x40] sm:$0xff] %vm1086_vm2, %v1078_v24  ;;  %v1057_v29 = vpop.xlane.xlu0 %1056  ;;  %v1020_v24 = vld [vmem:[#allocation3 + $0x70] sm:$0xff] }
 0x2b4   : > { %v1059_v60 = vpop.xlane.xlu1 %1058  ;;  %v1079_v19 = vadd.f32 %v1057_v29, %v1031_v36  ;;  %v9610_v36 = vld [vmem:[#allocation31_spill] sm:$0xff]  ;;  %v9612_v29 = vld [vmem:[#allocation65_spill] sm:$0xff] }
 0x2b5   : > { %v1080_v42 = vadd.f32 %v1059_v60, %v1032_v46  ;;  %6102 = vrot.lane.b32.xlu0 %v6101_v2, %s6631_s0  ;;  %v6121_v0 = vpack.i.bf16 %v9610_v36, %v9609_v55  ;;  %v1035_v46 = vmul.f32 %v9611_v13, %v1019_v57  ;;  %v1036_v11 = vmul.f32 %v9612_v29, %v1020_v24  ;;  %v6482_v24 = vld [vmem:[%s6758_s24 + $0x8] sm:$0xff]  ;;  %v6485_v13 = vld [vmem:[%s6758_s24 + $0x40] sm:$0xff]  ;;  %v9655_v36 = vld [vmem:[#allocation12_spill] sm:$0xff] }
 0x2b6   : > { %1096 = vst.msk [vmem:[#allocation3 + $0x48] sm:$0xff] %vm1086_vm2, %v1079_v19  ;;  %6137 = vset.pattern.permute.xlu0 %v9464_v28  ;;  %v1021_v19 = vld [vmem:[#allocation3 + $0x78] sm:$0xff]  ;;  %v9617_v29 = vld [vmem:[#allocation46_spill] sm:$0xff]  ;;  %v1105_v28 = vld [vmem:[#allocation4 + $0x10] sm:$0xff] }
 0x2b7   : > { %1097 = vst.msk [vmem:[#allocation3 + $0x50] sm:$0xff] %vm1086_vm2, %v1080_v42  ;;  %v1061_v49 = vpop.xlane.xlu0 %1060 }
 0x2b8   : > { %v1063_v20 = vpop.xlane.xlu1 %1062  ;;  %v1081_v15 = vadd.f32 %v1061_v49, %v1033_v26  ;;  %v9615_v49 = vld [vmem:[#allocation71_spill] sm:$0xff] }
 0x2b9   : > { %v1082_v2 = vadd.f32 %v1063_v20, %v1034_v52  ;;  %6112 = vrot.lane.b32.xlu0 %v6111_v10, %s6631_s0  ;;  %v9613_v10 = vld [vmem:[#allocation28_spill] sm:$0xff]  ;;  %v1037_v57 = vmul.f32 %v9615_v49, %v1021_v19  ;;  %v6486_v19 = vld [vmem:[%s6758_s24 + $0x50] sm:$0xff] }
 0x2ba   : > { %1098 = vst.msk [vmem:[#allocation3 + $0x58] sm:$0xff] %vm1086_vm2, %v1081_v15  ;;  %v6131_v52 = vpack.i.bf16 %v9614_v56, %v9613_v10 }
 0x2bb   : > { %1099 = vst.msk [vmem:[#allocation3 + $0x60] sm:$0xff] %vm1086_vm2, %v1082_v2  ;;  %v1065_v60 = vpop.xlane.xlu0 %1064  ;;  %v6483_v2 = vld [vmem:[%s6758_s24 + $0x20] sm:$0xff] }
 0x2bc   : > { %v1067_v53 = vpop.xlane.xlu1 %1066  ;;  %v1083_v42 = vadd.f32 %v1065_v60, %v1035_v46  ;;  %v9616_v46 = vld [vmem:[#allocation44_spill] sm:$0xff] }
 0x2bd   : > { %v1084_v26 = vadd.f32 %v1067_v53, %v1036_v11  ;;  %6122 = vrot.lane.b32.xlu0 %v6121_v0, %s6631_s0  ;;  %v6484_v0 = vld [vmem:[%s6758_s24 + $0x30] sm:$0xff]  ;;  %v9618_v11 = vsub.f32 %v9616_v46, %v9617_v29  ;;  %v1104_v53 = vld [vmem:[#allocation4 + $0x8] sm:$0xff] }
 0x2be   : > { %1100 = vst.msk [vmem:[#allocation3 + $0x68] sm:$0xff] %vm1086_vm2, %v1083_v42  ;;  %v1781_v42 = vld [vmem:[#allocation3] sm:$0xff] }
 0x2bf   : > { %1101 = vst.msk [vmem:[#allocation3 + $0x70] sm:$0xff] %vm1086_vm2, %v1084_v26  ;;  %v1069_v20 = vpop.xlane.xlu0 %1068  ;;  %v1623_v60 = vmul.f32 1.442695, %v9618_v11  ;;  %v9619_v26 = vld [vmem:[#allocation47_spill] sm:$0xff] }
 0x2c0   : > { %v1085_v15 = vadd.f32 %v1069_v20, %v1037_v57  ;;  %v1103_v20 = vld [vmem:[#allocation4] sm:$0xff] }
 0x2c1   : > { %6132 = vrot.lane.b32.xlu0 %v6131_v52, %s6631_s0  ;;  %6336 = vpow2.f32 %v1623_v60  ;;  %v9620_v52 = vld [vmem:[#allocation48_spill] sm:$0xff]  ;;  %v1199_v46 = vmul.f32 %v7537_v25, %v1103_v20 }
 0x2c2   : > { %1102 = vst.msk [vmem:[#allocation3 + $0x78] sm:$0xff] %vm1086_vm2, %v1085_v15  ;;  %v9621_v49 = vsub.f32 %v9619_v26, %v9620_v52  ;;  %v6487_v15 = vld [vmem:[%s6758_s24 + $0x60] sm:$0xff]  ;;  %v1784_v60 = vld [vmem:[#allocation3 + $0x18] sm:$0xff] }
 0x2c3   : > { %v9623_v26 = vld [vmem:[#allocation52_spill] sm:$0xff] }
 0x2c4   : > { %v1625_v57 = vmul.f32 1.442695, %v9621_v49 }
 0x2c5   : > { %2317 = vperm.xlu0 %6137, %v6482_v24   ;;  %v1200_v24 = vmul.f32 %v7534_v6, %v1104_v53  ;;  %v1108_v53 = vld [vmem:[#allocation4 + $0x28] sm:$0xff] }
 0x2c6   : > { %6338 = vpow2.f32 %v1625_v57  ;;  %v1201_v57 = vmul.f32 %v7541_v5, %v1105_v28 }
 0x2c9   : > { %2329 = vperm.xlu0 %6137, %v6483_v2   ;;  %v1106_v2 = vld [vmem:[#allocation4 + $0x18] sm:$0xff] }
 0x2ca   : > { %v1202_v6 = vmul.f32 %v7545_v1, %v1106_v2 }
 0x2cd   : > { %2337 = vperm.xlu0 %6137, %v6484_v0  }
 0x2d1   : > { %2345 = vperm.xlu0 %6137, %v6485_v13   ;;  %v1797_v13 = vmul.f32 %v7640_v31, %v1781_v42  ;;  %v1800_v42 = vmul.f32 %v7646_v12, %v1784_v60  ;;  %v1110_v60 = vld [vmem:[#allocation4 + $0x38] sm:$0xff] }
 0x2d5   : > { %2353 = vperm.xlu0 %6137, %v6486_v19   ;;  %v9622_v19 = vld [vmem:[#allocation50_spill] sm:$0xff] }
 0x2d6   : > { %v9624_v52 = vsub.f32 %v9622_v19, %v9623_v26 }
 0x2d8   : > { %v1629_v49 = vmul.f32 1.442695, %v9624_v52 }
 0x2d9   : > { %2361 = vperm.xlu0 %6137, %v6487_v15  }
 0x2da   : > { %6340 = vpow2.f32 %v1629_v49  ;;  %v1782_v49 = vld [vmem:[#allocation3 + $0x8] sm:$0xff] }
 0x2db   : > { %v5767_v0 = vpop.f32.mrf.mxu0 }
 0x2dc   : > { %v1361_v29 = vadd.f32 %v5767_v0, %v1200_v24  ;;  %v1814_v11 = vpop.xlane.xlu1 %1813  ;;  %v1786_v0 = vld [vmem:[#allocation3 + $0x28] sm:$0xff] }
 0x2dd   : > { %v1281_v7 = vpop.f32.mrf.mxu0  ;;  %v1845_v15 = vadd.f32 %v1814_v11, %v1797_v13  ;;  %2369 = vperm.xlu0 %6137, %v6488_v38   ;;  %v9625_v38 = vld [vmem:[#allocation55_spill] sm:$0xff]  ;;  %v9626_v13 = vld [vmem:[#allocation57_spill] sm:$0xff]  ;;  %v1204_v11 = vmul.f32 %v7549_v51, %v1108_v53  ;;  %v1802_v28 = vmul.f32 %v7654_v14, %v1786_v0  ;;  %v1206_v14 = vmul.f32 %v7553_v39, %v1110_v60  ;;  %v9631_v39 = vld [vmem:[#allocation62_spill] sm:$0xff] }
 0x2de   : > { %1378 = vst.msk [vmem:[#allocation4 + $0x8] sm:$0xff] %vm1376_vm4, %v1361_v29  ;;  %v1360_v31 = vadd.f32 %v1281_v7, %v1199_v46  ;;  %v9627_v1 = vsub.f32 %v9625_v38, %v9626_v13  ;;  %v1107_v29 = vld [vmem:[#allocation4 + $0x20] sm:$0xff]  ;;  %v1109_v53 = vld [vmem:[#allocation4 + $0x30] sm:$0xff] }
 0x2df   : > { %1862 = vst.msk [vmem:[#allocation3] sm:$0xff] %vm1861_vm3, %v1845_v15  ;;  %v5770_v25 = vpop.f32.mrf.mxu0  ;;  %v1203_v19 = vmul.f32 %v7539_v35, %v1107_v29  ;;  %v9628_v15 = vld [vmem:[#allocation58_spill] sm:$0xff]  ;;  %v1205_v13 = vmul.f32 %v7543_v30, %v1109_v53  ;;  %v1111_v60 = vld [vmem:[#allocation4 + $0x40] sm:$0xff] }
 0x2e0   : > { %1377 = vst.msk [vmem:[#allocation4] sm:$0xff] %vm1376_vm4, %v1360_v31  ;;  %v1363_v20 = vadd.f32 %v5770_v25, %v1202_v6  ;;  %v1820_v24 = vpop.xlane.xlu1 %1819  ;;  %v1633_v2 = vmul.f32 1.442695, %v9627_v1  ;;  %v9629_v6 = vld [vmem:[#allocation60_spill] sm:$0xff] }
 0x2e1   : > { %v1291_v7 = vpop.f32.mrf.mxu0  ;;  %v1848_v46 = vadd.f32 %v1820_v24, %v1800_v42  ;;  %v9630_v51 = vsub.f32 %v9628_v15, %v9629_v6  ;;  %v1112_v24 = vld [vmem:[#allocation4 + $0x48] sm:$0xff]  ;;  %v1114_v15 = vld [vmem:[#allocation4 + $0x58] sm:$0xff] }
 0x2e2   : > { %1380 = vst.msk [vmem:[#allocation4 + $0x18] sm:$0xff] %vm1376_vm4, %v1363_v20  ;;  %v1362_v12 = vadd.f32 %v1291_v7, %v1201_v57  ;;  %6342 = vpow2.f32 %v1633_v2  ;;  %v1788_v57 = vld [vmem:[#allocation3 + $0x38] sm:$0xff]  ;;  %v7754_v20 = vpop.eup %6336  ;;  %v1783_v7 = vld [vmem:[#allocation3 + $0x10] sm:$0xff]  ;;  %v1208_v30 = vmul.f32 %v7557_v43, %v1112_v24 }
 0x2e3   : > { %1865 = vst.msk [vmem:[#allocation3 + $0x18] sm:$0xff] %vm1861_vm3, %v1848_v46  ;;  %v5773_v5 = vpop.f32.mrf.mxu0  ;;  %v1637_v31 = vmul.f32 1.442695, %v9630_v51  ;;  %v1798_v38 = vmul.f32 %v7754_v20, %v1782_v49  ;;  %v1804_v2 = vmul.f32 %v7658_v45, %v1788_v57  ;;  %v9632_v46 = vld [vmem:[#allocation64_spill] sm:$0xff]  ;;  %v9634_v57 = vld [vmem:[#allocation66_spill] sm:$0xff] }
 0x2e4   : > { %1379 = vst.msk [vmem:[#allocation4 + $0x10] sm:$0xff] %vm1376_vm4, %v1362_v12  ;;  %v1365_v26 = vadd.f32 %v5773_v5, %v1204_v11  ;;  %v1824_v52 = vpop.xlane.xlu1 %1823  ;;  %v9633_v11 = vsub.f32 %v9631_v39, %v9632_v46  ;;  %v1116_v39 = vld [vmem:[#allocation4 + $0x68] sm:$0xff] }
 0x2e5   : > { %v1301_v25 = vpop.f32.mrf.mxu0  ;;  %v1850_v42 = vadd.f32 %v1824_v52, %v1802_v28  ;;  %6344 = vpow2.f32 %v1637_v31  ;;  %v7766_v52 = vpop.eup %6338  ;;  %v1207_v31 = vmul.f32 %v7547_v17, %v1111_v60 }
 0x2e6   : > { %1382 = vst.msk [vmem:[#allocation4 + $0x28] sm:$0xff] %vm1376_vm4, %v1365_v26  ;;  %v1364_v35 = vadd.f32 %v1301_v25, %v1203_v19  ;;  %v1641_v12 = vmul.f32 1.442695, %v9633_v11  ;;  %v1790_v26 = vld [vmem:[#allocation3 + $0x48] sm:$0xff]  ;;  %v1799_v51 = vmul.f32 %v7766_v52, %v1783_v7 }
 0x2e7   : > { %1867 = vst.msk [vmem:[#allocation3 + $0x28] sm:$0xff] %vm1861_vm3, %v1850_v42  ;;  %v5776_v0 = vpop.f32.mrf.mxu0  ;;  %v1806_v25 = vmul.f32 %v7664_v23, %v1790_v26  ;;  %v1785_v42 = vld [vmem:[#allocation3 + $0x20] sm:$0xff]  ;;  %v7779_v17 = vpop.eup %6340 }
 0x2e8   : > { %1381 = vst.msk [vmem:[#allocation4 + $0x20] sm:$0xff] %vm1376_vm4, %v1364_v35  ;;  %v1367_v1 = vadd.f32 %v5776_v0, %v1206_v14  ;;  %v1816_v29 = vpop.xlane.xlu0 %1815  ;;  %6346 = vpow2.f32 %v1641_v12  ;;  %v9635_v14 = vld [vmem:[#allocation67_spill] sm:$0xff]  ;;  %v1801_v11 = vmul.f32 %v7779_v17, %v1785_v42  ;;  %v9638_v26 = vld [vmem:[#allocation69_spill] sm:$0xff] }
 0x2e9   : > { %v1311_v5 = vpop.f32.mrf.mxu0  ;;  %v1828_v28 = vpop.xlane.xlu1 %1827  ;;  %v1846_v19 = vadd.f32 %v1816_v29, %v1798_v38  ;;  %v9636_v35 = vsub.f32 %v9634_v57, %v9635_v14  ;;  %v1113_v0 = vld [vmem:[#allocation4 + $0x50] sm:$0xff]  ;;  %v1210_v29 = vmul.f32 %v7561_v34, %v1114_v15 }
 0x2ea   : > { %1384 = vst.msk [vmem:[#allocation4 + $0x38] sm:$0xff] %vm1376_vm4, %v1367_v1  ;;  %v1366_v49 = vadd.f32 %v1311_v5, %v1205_v13  ;;  %v1852_v45 = vadd.f32 %v1828_v28, %v1804_v2  ;;  %v1792_v2 = vld [vmem:[#allocation3 + $0x58] sm:$0xff]  ;;  %v1209_v12 = vmul.f32 %v7551_v22, %v1113_v0  ;;  %v1787_v28 = vld [vmem:[#allocation3 + $0x30] sm:$0xff]  ;;  %v1789_v0 = vld [vmem:[#allocation3 + $0x40] sm:$0xff] }
 0x2eb   : > { %1863 = vst.msk [vmem:[#allocation3 + $0x8] sm:$0xff] %vm1861_vm3, %v1846_v19  ;;  %v5779_v6 = vpop.f32.mrf.mxu0  ;;  %v1645_v24 = vmul.f32 1.442695, %v9636_v35  ;;  %v1808_v5 = vmul.f32 %v7671_v48, %v1792_v2  ;;  %v9637_v19 = vld [vmem:[#allocation68_spill] sm:$0xff] }
 0x2ec   : > { %1383 = vst.msk [vmem:[#allocation4 + $0x30] sm:$0xff] %vm1376_vm4, %v1366_v49  ;;  %v1369_v53 = vadd.f32 %v5779_v6, %v1208_v30  ;;  %v1818_v43 = vpop.xlane.xlu0 %1817  ;;  %v9639_v30 = vsub.f32 %v9637_v19, %v9638_v26 }
 0x2ed   : > { %1869 = vst.msk [vmem:[#allocation3 + $0x38] sm:$0xff] %vm1861_vm3, %v1852_v45  ;;  %v1321_v38 = vpop.f32.mrf.mxu0  ;;  %v1832_v13 = vpop.xlane.xlu1 %1831  ;;  %v1847_v1 = vadd.f32 %v1818_v43, %v1799_v51  ;;  %6348 = vpow2.f32 %v1645_v24  ;;  %v1115_v45 = vld [vmem:[#allocation4 + $0x60] sm:$0xff]  ;;  %v1118_v43 = vld [vmem:[#allocation4 + $0x78] sm:$0xff] }
 0x2ee   : > { %1386 = vst.msk [vmem:[#allocation4 + $0x48] sm:$0xff] %vm1376_vm4, %v1369_v53  ;;  %v1368_v7 = vadd.f32 %v1321_v38, %v1207_v31  ;;  %v1854_v23 = vadd.f32 %v1832_v13, %v1806_v25  ;;  %v1649_v49 = vmul.f32 1.442695, %v9639_v30  ;;  %v1794_v31 = vld [vmem:[#allocation3 + $0x68] sm:$0xff]  ;;  %v1212_v53 = vmul.f32 %v7564_v18, %v1116_v39  ;;  %v1117_v38 = vld [vmem:[#allocation4 + $0x70] sm:$0xff] }
 0x2ef   : > { %1864 = vst.msk [vmem:[#allocation3 + $0x10] sm:$0xff] %vm1861_vm3, %v1847_v1  ;;  %v5782_v46 = vpop.f32.mrf.mxu0  ;;  %v7792_v22 = vpop.eup %6342  ;;  %v1211_v14 = vmul.f32 %v7555_v50, %v1115_v45  ;;  %v1810_v24 = vmul.f32 %v7678_v16, %v1794_v31  ;;  %v1213_v16 = vmul.f32 %v7559_v44, %v1117_v38  ;;  %v1793_v44 = vld [vmem:[#allocation3 + $0x60] sm:$0xff] }
 0x2f0   : > { %1385 = vst.msk [vmem:[#allocation4 + $0x40] sm:$0xff] %vm1376_vm4, %v1368_v7  ;;  %v1371_v60 = vadd.f32 %v5782_v46, %v1210_v29  ;;  %v1822_v34 = vpop.xlane.xlu0 %1821  ;;  %v1803_v57 = vmul.f32 %v7792_v22, %v1787_v28  ;;  %6350 = vpow2.f32 %v1649_v49  ;;  %v1214_v7 = vmul.f32 %v7567_v59, %v1118_v43 }
 0x2f1   : > { %1871 = vst.msk [vmem:[#allocation3 + $0x48] sm:$0xff] %vm1861_vm3, %v1854_v23  ;;  %v1331_v15 = vpop.f32.mrf.mxu0  ;;  %v1836_v6 = vpop.xlane.xlu1 %1835  ;;  %v1849_v51 = vadd.f32 %v1822_v34, %v1801_v11 }
 0x2f2   : > { %1388 = vst.msk [vmem:[#allocation4 + $0x58] sm:$0xff] %vm1376_vm4, %v1371_v60  ;;  %v1370_v25 = vadd.f32 %v1331_v15, %v1209_v12  ;;  %v1856_v48 = vadd.f32 %v1836_v6, %v1808_v5  ;;  %v6345_v29 = vpop.eup %6344  ;;  %v1791_v60 = vld [vmem:[#allocation3 + $0x50] sm:$0xff] }
 0x2f3   : > { %1866 = vst.msk [vmem:[#allocation3 + $0x20] sm:$0xff] %vm1861_vm3, %v1849_v51  ;;  %v5785_v42 = vpop.f32.mrf.mxu0  ;;  %v1805_v46 = vmul.f32 %v6345_v29, %v1789_v0  ;;  %v1795_v6 = vld [vmem:[#allocation3 + $0x70] sm:$0xff] }
 0x2f4   : > { %1387 = vst.msk [vmem:[#allocation4 + $0x50] sm:$0xff] %vm1376_vm4, %v1370_v25  ;;  %v1373_v35 = vadd.f32 %v5785_v42, %v1212_v53  ;;  %v1826_v18 = vpop.xlane.xlu0 %1825  ;;  %v9640_v42 = vld [vmem:[#allocation26_spill] sm:$0xff] }
 0x2f5   : > { %1873 = vst.msk [vmem:[#allocation3 + $0x58] sm:$0xff] %vm1861_vm3, %v1856_v48  ;;  %v1341_v13 = vpop.f32.mrf.mxu0  ;;  %v1840_v1 = vpop.xlane.xlu1 %1839  ;;  %v1851_v2 = vadd.f32 %v1826_v18, %v1803_v57 }
 0x2f6   : > { %1390 = vst.msk [vmem:[#allocation4 + $0x68] sm:$0xff] %vm1376_vm4, %v1373_v35  ;;  %v1372_v50 = vadd.f32 %v1341_v13, %v1211_v14  ;;  %v1858_v23 = vadd.f32 %v1840_v1, %v1810_v24  ;;  %v6347_v59 = vpop.eup %6346 }
 0x2f7   : > { %1868 = vst.msk [vmem:[#allocation3 + $0x30] sm:$0xff] %vm1861_vm3, %v1851_v2  ;;  %v5788_v39 = vpop.f32.mrf.mxu0  ;;  %v1807_v19 = vmul.f32 %v6347_v59, %v1791_v60 }
 0x2f8   : > { %1389 = vst.msk [vmem:[#allocation4 + $0x60] sm:$0xff] %vm1376_vm4, %v1372_v50  ;;  %v1375_v11 = vadd.f32 %v5788_v39, %v1214_v7  ;;  %v1830_v12 = vpop.xlane.xlu0 %1829 }
 0x2f9   : > { %1875 = vst.msk [vmem:[#allocation3 + $0x68] sm:$0xff] %vm1861_vm3, %v1858_v23  ;;  %v1351_v5 = vpop.f32.mrf.mxu0  ;;  %v1853_v34 = vadd.f32 %v1830_v12, %v1805_v46  ;;  %v9644_v12 = vld [vmem:[#allocation37_spill] sm:$0xff] }
 0x2fa   : > { %1392 = vst.msk [vmem:[#allocation4 + $0x78] sm:$0xff] %vm1376_vm4, %v1375_v11  ;;  %v1374_v28 = vadd.f32 %v1351_v5, %v1213_v16  ;;  %v6349_v49 = vpop.eup %6348  ;;  %v9646_v5 = vld [vmem:[#allocation34_spill] sm:$0xff] }
 0x2fb   : > { %1870 = vst.msk [vmem:[#allocation3 + $0x40] sm:$0xff] %vm1861_vm3, %v1853_v34  ;;  %v1809_v45 = vmul.f32 %v6349_v49, %v1793_v44  ;;  %v9647_v34 = vld [vmem:[#allocation33_spill] sm:$0xff] }
 0x2fc   : > { %1391 = vst.msk [vmem:[#allocation4 + $0x70] sm:$0xff] %vm1376_vm4, %v1374_v28  ;;  %v1834_v26 = vpop.xlane.xlu0 %1833  ;;  %v9648_v28 = vld [vmem:[#allocation30_spill] sm:$0xff]  ;;  %v7858_v44 = vld [vmem:[%s6758_s24] sm:$0xff] }
 0x2fd   : > { %v1855_v30 = vadd.f32 %v1834_v26, %v1807_v19  ;;  %v6351_v31 = vpop.eup %6350  ;;  %v9649_v19 = vld [vmem:[#allocation29_spill] sm:$0xff] }
 0x2fe   : > { %v1811_v53 = vmul.f32 %v6351_v31, %v1795_v6  ;;  %v6126_v26 = vpack.i.bf16 %v9649_v19, %v9648_v28  ;;  %v7878_v6 = vld [vmem:[%s6758_s24 + $0x48] sm:$0xff]  ;;  %v9656_v28 = vld [vmem:[#allocation13_spill] sm:$0xff] }
 0x2ff   : > { %1872 = vst.msk [vmem:[#allocation3 + $0x50] sm:$0xff] %vm1861_vm3, %v1855_v30  ;;  %v7862_v30 = vld [vmem:[%s6758_s24 + $0x10] sm:$0xff]  ;;  %9651 = vst [vmem:[#allocation51_spill] sm:$0xff] %v7878_v6 }
 0x300   : > { %v1838_v15 = vpop.xlane.xlu0 %1837 }
 0x301   : > { %v1857_v51 = vadd.f32 %v1838_v15, %v1809_v45  ;;  %v7870_v45 = vld [vmem:[%s6758_s24 + $0x28] sm:$0xff]  ;;  %v7874_v15 = vld [vmem:[%s6758_s24 + $0x38] sm:$0xff] }
 0x302   : > { %9650 = vst [vmem:[#allocation43_spill] sm:$0xff] %v7874_v15 }
 0x303   : > { %1874 = vst.msk [vmem:[#allocation3 + $0x60] sm:$0xff] %vm1861_vm3, %v1857_v51  ;;  %v7882_v51 = vld [vmem:[%s6758_s24 + $0x58] sm:$0xff] }
 0x304   : > { %v1842_v25 = vpop.xlane.xlu0 %1841  ;;  %9652 = vst [vmem:[#allocation45_spill] sm:$0xff] %v7882_v51 }
 0x305   : > { %v1859_v48 = vadd.f32 %v1842_v25, %v1811_v53 }
 0x307   : > { %1876 = vst.msk [vmem:[#allocation3 + $0x70] sm:$0xff] %vm1861_vm3, %v1859_v48  ;;  %v9654_v48 = vld [vmem:[#allocation9_spill] sm:$0xff] }
 0x30c   : > { %v1731_v43 = vpop.permute.xlu0 %1730 }
 0x30d   : > { %v1748_v57 = vsub.f32 %v9640_v42, %v1731_v43  ;;  %v2378_v43 = vsub.s32 2, %v9654_v48  ;;  %v6497_v42 = vld [vmem:[%s6763_s3] sm:$0xf] }
 0x30f   : > { %v1779_v14 = vmul.f32 1.442695, %v1748_v57  ;;  %v7891_v57 = vrot.slane %v6497_v42, %v2378_v43 }
 0x310   : > { %v7815_v35 = vpop.permute.xlu0 %1896 }
 0x311   : > { %6352 = vpow2.f32 %v1779_v14 }
 0x314   : > { %v7817_v24 = vpop.permute.xlu0 %1911 }
 0x318   : > { %v7819_v18 = vpop.permute.xlu0 %1921 }
 0x31c   : > { %v7821_v0 = vpop.permute.xlu0 %1931 }
 0x31e   : > { %v7823_v38 = vpop.eup %6352 }
 0x31f   : > { %1843 = vadd.xlane.f32.xlu1 %v7823_v38 }
 0x320   : > { %v7826_v13 = vpop.permute.xlu0 %1941 }
 0x324   : > { %v7828_v1 = vpop.permute.xlu0 %1951 }
 0x328   : > { %v7830_v2 = vpop.permute.xlu0 %1961 }
 0x32c   : > { %v7832_v7 = vpop.permute.xlu0 %1971 }
 0x330   : > { %1901 = vperm.xlu1 %6095, %v7754_v20   ;;  %v7835_v50 = vpop.permute.xlu0 %6102  ;;  %v9641_v20 = vld [vmem:[#allocation42_spill] sm:$0xff] }
 0x334   : > { %1906 = vperm.xlu1 %6095, %v7766_v52   ;;  %v7838_v23 = vpop.permute.xlu0 %6112  ;;  %v9642_v52 = vld [vmem:[#allocation41_spill] sm:$0xff] }
 0x338   : > { %1916 = vperm.xlu1 %6095, %v7779_v17   ;;  %v7841_v39 = vpop.permute.xlu0 %6122  ;;  %v6096_v17 = vpack.i.bf16 %v9642_v52, %v9641_v20 }
 0x33c   : > { %1926 = vperm.xlu1 %6095, %v7792_v22   ;;  %v6133_v46 = vpop.permute.xlu0 %6132  ;;  %v9643_v22 = vld [vmem:[#allocation38_spill] sm:$0xff] }
 0x33d   : > { %v6134_v16 = vunpack.i.l.bf16 %v6133_v46  ;;  %v6135_v11 = vunpack.i.h.bf16 %v6133_v46  ;;  %v6106_v60 = vpack.i.bf16 %v9644_v12, %v9643_v22 }
 0x33f   : > { %5789 = vmatprep.subr.mxu1 %v6135_v11 }
 0x340   : > { %1936 = vperm.xlu1 %6095, %v6345_v29   ;;  %5790 = vmatpush3.msra.mxu1 %v6135_v11  ;;  %v9645_v29 = vmov 2   ;;  %v2318_v53 = vpop.permute.xlu0 %2317 }
 0x341   : > { %5791 = vmatprep.subr.mxu1 %v6134_v16  ;;  %v2381_v46 = vadd.f32 %v7891_v57, %v2318_v53 }
 0x342   : > { %5792 = vmatpush3.msra.mxu1 %v6134_v16 }
 0x343   : > { %v2397_v11 = vmul.f32 0.2, %v2381_v46 }
 0x344   : > { %1946 = vperm.xlu1 %6095, %v6347_v59   ;;  %v6116_v59 = vpack.i.bf16 %v9647_v34, %v9646_v5  ;;  %v2330_v25 = vpop.permute.xlu0 %2329 }
 0x348   : > { %1956 = vperm.xlu1 %6095, %v6349_v49   ;;  %v7866_v49 = vld [vmem:[%s6758_s24 + $0x18] sm:$0xff]  ;;  %v2338_v14 = vpop.permute.xlu0 %2337 }
 0x34c   : > { %1966 = vperm.xlu1 %6095, %v6351_v31   ;;  %v7886_v31 = vld [vmem:[%s6758_s24 + $0x68] sm:$0xff]  ;;  %v2346_v16 = vpop.permute.xlu0 %2345 }
 0x34d   : > { %9653 = vst [vmem:[#allocation54_spill] sm:$0xff] %v7886_v31  ;;  %v2388_v43 = vadd.f32 %v7891_v57, %v2346_v16 }
 0x34f   : > { %v2404_v53 = vmul.f32 0.2, %v2388_v43 }
 0x350   : > { %6097 = vrot.lane.b32.xlu1 %v6096_v17, %s6631_s0  ;;  %v2384_v17 = vadd.f32 %v7891_v57, %v2330_v25  ;;  %v2354_v20 = vpop.permute.xlu0 %2353 }
 0x351   : > { %6136 = vset.pattern.permute.xlu1 %v9645_v29  ;;  %v2390_v25 = vadd.f32 %v7891_v57, %v2354_v20 }
 0x354   : > { %6107 = vrot.lane.b32.xlu1 %v6106_v60, %s6631_s0  ;;  %v2413_v60 = vmax.f32 %v2381_v46, %v2397_v11  ;;  %v2362_v42 = vpop.permute.xlu0 %2361  ;;  %v2420_v46 = vmax.f32 %v2388_v43, %v2404_v53  ;;  %v1796_v11 = vld [vmem:[#allocation3 + $0x78] sm:$0xff] }
 0x355   : > { %v2392_v16 = vadd.f32 %v7891_v57, %v2362_v42  ;;  %v9659_v42 = vld [vmem:[#allocation19_spill] sm:$0xff] }
 0x356   : > { %v7897_v22 = vadd.f32 %v2413_v60, %v9655_v36  ;;  %v7913_v20 = vadd.f32 %v2420_v46, %v9658_v54  ;;  %v9660_v46 = vld [vmem:[#allocation21_spill] sm:$0xff]  ;;  %v6125_v54 = vunpack.i.h.bf16 %v7841_v39 }
 0x358   : > { %6117 = vrot.lane.b32.xlu1 %v6116_v59, %s6631_s0  ;;  %v2400_v59 = vmul.f32 0.2, %v2384_v17 }
 0x35a   : > { %v2416_v52 = vmax.f32 %v2384_v17, %v2400_v59  ;;  %v9657_v17 = vld [vmem:[#allocation15_spill] sm:$0xff]  ;;  %v2370_v59 = vpop.permute.xlu0 %2369 }
 0x35b   : > { %v2394_v43 = vadd.f32 %v7891_v57, %v2370_v59 }
 0x35c   : > { %6127 = vrot.lane.b32.xlu1 %v6126_v26, %s6631_s0  ;;  %v2386_v26 = vadd.f32 %v7891_v57, %v2338_v14  ;;  %v7902_v19 = vadd.f32 %v2416_v52, %v9656_v28  ;;  %v2406_v14 = vmul.f32 0.2, %v2390_v25  ;;  %v2408_v52 = vmul.f32 0.2, %v2392_v16 }
 0x35d   : > { %v6124_v28 = vunpack.i.l.bf16 %v7841_v39  ;;  %v6115_v39 = vunpack.i.h.bf16 %v7838_v23 }
 0x35e   : > { %v2402_v55 = vmul.f32 0.2, %v2386_v26 }
 0x360   : > { %2313 = vperm.xlu1 %6136, %v7858_v44   ;;  %v2418_v12 = vmax.f32 %v2386_v26, %v2402_v55  ;;  %v1812_v55 = vmul.f32 %v7685_v47, %v1796_v11  ;;  %v2422_v26 = vmax.f32 %v2390_v25, %v2406_v14  ;;  %v2410_v47 = vmul.f32 0.2, %v2394_v43 }
 0x362   : > { %v7907_v60 = vadd.f32 %v2418_v12, %v9657_v17  ;;  %v2424_v12 = vmax.f32 %v2392_v16, %v2408_v52  ;;  %v7921_v25 = vadd.f32 %v2422_v26, %v9659_v42  ;;  %v2426_v14 = vmax.f32 %v2394_v43, %v2410_v47  ;;  %v9661_v16 = vld [vmem:[#allocation23_spill] sm:$0xff] }
 0x364   : > { %2321 = vperm.xlu1 %6136, %v7862_v30   ;;  %v7927_v59 = vadd.f32 %v2424_v12, %v9660_v46  ;;  %v7947_v12 = vld [vmem:[%s6758_s24 + $0x78] sm:$0xff] }
 0x365   : > { %9662 = vst [vmem:[#allocation49_spill] sm:$0xff] %v7947_v12 }
 0x368   : > { %2325 = vperm.xlu1 %6136, %v7866_v49  }
 0x36c   : > { %2333 = vperm.xlu1 %6136, %v7870_v45  }
 0x370   : > { %2341 = vperm.xlu1 %6136, %v7874_v15   ;;  %v9663_v15 = vld [vmem:[#allocation10_spill] sm:$0xff] }
 0x374   : > { %2349 = vperm.xlu1 %6136, %v7878_v6  }
 0x378   : > { %2357 = vperm.xlu1 %6136, %v7882_v51  }
 0x37c   : > { %2365 = vperm.xlu1 %6136, %v7886_v31  }
 0x3a0   : > { %2462 = vmax.xlane.f32.xlu1 %v7897_v22 }
 0x3a4   : > { %2468 = vmax.xlane.f32.xlu1 %v7902_v19 }
 0x3a8   : > { %v1844_v27 = vpop.xlane.xlu1 %1843  ;;  %2472 = vmax.xlane.f32.xlu1 %v7907_v60 }
 0x3a9   : > { %v1860_v53 = vadd.f32 %v1844_v27, %v1812_v55  ;;  %v7933_v55 = vadd.f32 %v2426_v14, %v9661_v16 }
 0x3ab   : > { %1877 = vst.msk [vmem:[#allocation3 + $0x78] sm:$0xff] %vm1861_vm3, %v1860_v53 }
 0x3ac   : > { %v7917_v5 = vpop.permute.xlu1 %1901  ;;  %2476 = vmax.xlane.f32.xlu1 %v7913_v20 }
 0x3b0   : > { %v7923_v11 = vpop.permute.xlu1 %1906  ;;  %2480 = vmax.xlane.f32.xlu1 %v7921_v25 }
 0x3b4   : > { %v7929_v27 = vpop.permute.xlu1 %1916  ;;  %2484 = vmax.xlane.f32.xlu1 %v7927_v59 }
 0x3b8   : > { %v7935_v52 = vpop.permute.xlu1 %1926  ;;  %2488 = vmax.xlane.f32.xlu1 %v7933_v55 }
 0x3bc   : > { %v7938_v26 = vpop.permute.xlu1 %1936 }
 0x3c0   : > { %v7940_v43 = vpop.permute.xlu1 %1946 }
 0x3c4   : > { %v7942_v53 = vpop.permute.xlu1 %1956 }
 0x3c8   : > { %v7944_v47 = vpop.permute.xlu1 %1966 }
 0x3c9   : > { %2373 = vperm.xlu1 %6136, %v7947_v12  }
 0x3cc   : > { %v7950_v34 = vpop.permute.xlu1 %6097 }
 0x3d0   : > { %v6108_v14 = vpop.permute.xlu1 %6107 }
 0x3d4   : > { %v6118_v10 = vpop.permute.xlu1 %6117 }
 0x3d5   : > { %v6120_v29 = vunpack.i.h.bf16 %v6118_v10 }
 0x3d8   : > { %v6128_v56 = vpop.permute.xlu1 %6127 }
 0x3d9   : > { %v6130_v16 = vunpack.i.h.bf16 %v6128_v56  ;;  %v6129_v46 = vunpack.i.l.bf16 %v6128_v56  ;;  %v6119_v56 = vunpack.i.l.bf16 %v6118_v10  ;;  %v9664_v10 = vld [vmem:[#allocation11_spill] sm:$0xff] }
 0x3db   : > { %5793 = vmatprep.subr.mxu1 %v6130_v16 }
 0x3dc   : > { %v2314_v42 = vpop.permute.xlu1 %2313  ;;  %5794 = vmatpush3.msra.mxu1 %v6130_v16 }
 0x3dd   : > { %v2380_v17 = vadd.f32 %v7891_v57, %v2314_v42  ;;  %5795 = vmatprep.subr.mxu1 %v6129_v46 }
 0x3de   : > { %5796 = vmatpush3.msra.mxu1 %v6129_v46 }
 0x3df   : > { %v2396_v36 = vmul.f32 0.2, %v2380_v17  ;;  %5797 = vmatprep.subr.mxu1 %v6125_v54 }
 0x3e0   : > { %v2322_v48 = vpop.permute.xlu1 %2321  ;;  %5798 = vmatpush3.msra.mxu1 %v6125_v54  ;;  %v6114_v54 = vunpack.i.l.bf16 %v7838_v23 }
 0x3e1   : > { %v2412_v12 = vmax.f32 %v2380_v17, %v2396_v36  ;;  %v2382_v31 = vadd.f32 %v7891_v57, %v2322_v48  ;;  %5799 = vmatprep.subr.mxu1 %v6124_v28  ;;  %v6110_v17 = vunpack.i.h.bf16 %v6108_v14 }
 0x3e2   : > { %5800 = vmatpush3.msra.mxu1 %v6124_v28 }
 0x3e3   : > { %v2398_v16 = vmul.f32 0.2, %v2382_v31  ;;  %5801 = vmatprep.subr.mxu1 %v6120_v29  ;;  %v7957_v51 = vadd.f32 %v2412_v12, %v9663_v15 }
 0x3e4   : > { %v2326_v42 = vpop.permute.xlu1 %2325  ;;  %5802 = vmatpush3.msra.mxu1 %v6120_v29 }
 0x3e5   : > { %v2414_v46 = vmax.f32 %v2382_v31, %v2398_v16  ;;  %v2383_v6 = vadd.f32 %v7891_v57, %v2326_v42  ;;  %2460 = vmax.xlane.f32.xlu0 %v7957_v51  ;;  %5803 = vmatprep.subr.mxu1 %v6119_v56  ;;  %v6109_v31 = vunpack.i.l.bf16 %v6108_v14  ;;  %v9666_v14 = vld [vmem:[#allocation16_spill] sm:$0xff] }
 0x3e6   : > { %5804 = vmatpush3.msra.mxu1 %v6119_v56  ;;  %v9665_v56 = vld [vmem:[#allocation14_spill] sm:$0xff] }
 0x3e7   : > { %v2399_v36 = vmul.f32 0.2, %v2383_v6  ;;  %5805 = vmatprep.subr.mxu1 %v6115_v39  ;;  %v7964_v28 = vadd.f32 %v2414_v46, %v9664_v10  ;;  %v6105_v46 = vunpack.i.h.bf16 %v7835_v50 }
 0x3e8   : > { %v2334_v48 = vpop.permute.xlu1 %2333  ;;  %5806 = vmatpush3.msra.mxu1 %v6115_v39 }
 0x3e9   : > { %v2415_v29 = vmax.f32 %v2383_v6, %v2399_v36  ;;  %v2385_v12 = vadd.f32 %v7891_v57, %v2334_v48  ;;  %2464 = vmax.xlane.f32.xlu0 %v7964_v28  ;;  %5807 = vmatprep.subr.mxu1 %v6114_v54  ;;  %v6104_v6 = vunpack.i.l.bf16 %v7835_v50  ;;  %v9667_v50 = vld [vmem:[#allocation18_spill] sm:$0xff] }
 0x3ea   : > { %5808 = vmatpush3.msra.mxu1 %v6114_v54 }
 0x3eb   : > { %v2401_v16 = vmul.f32 0.2, %v2385_v12  ;;  %5809 = vmatprep.subr.mxu1 %v6110_v17  ;;  %v7969_v23 = vadd.f32 %v2415_v29, %v9665_v56 }
 0x3ec   : > { %v2342_v42 = vpop.permute.xlu1 %2341  ;;  %5810 = vmatpush3.msra.mxu1 %v6110_v17  ;;  %v6100_v17 = vunpack.i.h.bf16 %v7950_v34 }
 0x3ed   : > { %v2417_v10 = vmax.f32 %v2385_v12, %v2401_v16  ;;  %v2387_v39 = vadd.f32 %v7891_v57, %v2342_v42  ;;  %2466 = vmax.xlane.f32.xlu0 %v7969_v23  ;;  %5811 = vmatprep.subr.mxu1 %v6109_v31 }
 0x3ee   : > { %5812 = vmatpush3.msra.mxu1 %v6109_v31  ;;  %v6099_v31 = vunpack.i.l.bf16 %v7950_v34 }
 0x3ef   : > { %v2403_v54 = vmul.f32 0.2, %v2387_v39  ;;  %5813 = vmatprep.subr.mxu1 %v6105_v46  ;;  %v7976_v36 = vadd.f32 %v2417_v10, %v9666_v14 }
 0x3f0   : > { %v2350_v48 = vpop.permute.xlu1 %2349  ;;  %5814 = vmatpush3.msra.mxu1 %v6105_v46 }
 0x3f1   : > { %v2419_v29 = vmax.f32 %v2387_v39, %v2403_v54  ;;  %v2389_v12 = vadd.f32 %v7891_v57, %v2350_v48  ;;  %2470 = vmax.xlane.f32.xlu0 %v7976_v36  ;;  %5815 = vmatprep.subr.mxu1 %v6104_v6 }
 0x3f2   : > { %5816 = vmatpush3.msra.mxu1 %v6104_v6  ;;  %v9668_v6 = vld [vmem:[#allocation20_spill] sm:$0xff] }
 0x3f3   : > { %v2405_v16 = vmul.f32 0.2, %v2389_v12  ;;  %5817 = vmatprep.subr.mxu1 %v6100_v17  ;;  %v7983_v42 = vadd.f32 %v2419_v29, %v9667_v50 }
 0x3f4   : > { %v2358_v10 = vpop.permute.xlu1 %2357  ;;  %5818 = vmatpush3.msra.mxu1 %v6100_v17 }
 0x3f5   : > { %v2421_v14 = vmax.f32 %v2389_v12, %v2405_v16  ;;  %v2391_v46 = vadd.f32 %v7891_v57, %v2358_v10  ;;  %2474 = vmax.xlane.f32.xlu0 %v7983_v42  ;;  %5819 = vmatprep.subr.mxu1 %v6099_v31  ;;  %v9669_v12 = vld [vmem:[#allocation22_spill] sm:$0xff] }
 0x3f6   : > { %5820 = vmatpush3.msra.mxu1 %v6099_v31 }
 0x3f7   : > { %v2407_v39 = vmul.f32 0.2, %v2391_v46  ;;  %5822 = vmatmul.mubr.f32.vlgmr.msra.gmra.mxu1 %v7585_v58  ;;  %v7989_v54 = vadd.f32 %v2421_v14, %v9668_v6  ;;  %v9670_v14 = vld [vmem:[#allocation24_spill] sm:$0xff] }
 0x3f8   : > { %v2366_v34 = vpop.permute.xlu1 %2365  ;;  %5824 = vmatprep.mubr.f32.mxu1 %v7592_v61 }
 0x3f9   : > { %v2423_v48 = vmax.f32 %v2391_v46, %v2407_v39  ;;  %v2393_v29 = vadd.f32 %v7891_v57, %v2366_v34  ;;  %2478 = vmax.xlane.f32.xlu0 %v7989_v54  ;;  %v8050_v46 = vld [vmem:[#allocation2 + $0x60] sm:$0xff] }
 0x3fa   : > { %9674 = vst [vmem:[#allocation56_spill] sm:$0xff] %v8050_v46 }
 0x3fb   : > { %v2409_v17 = vmul.f32 0.2, %v2393_v29  ;;  %5825 = vmatmul.mubr.f32.gmra.mxu1 %v7576_v62  ;;  %v7996_v16 = vadd.f32 %v2423_v48, %v9669_v12  ;;  %v8015_v62 = vld [vmem:[#allocation2 + $0x8] sm:$0xff]  ;;  %v8057_v48 = vld [vmem:[#allocation2 + $0x70] sm:$0xff] }
 0x3fc   : > { %5827 = vmatprep.mubr.f32.mxu1 %v7599_v21  ;;  %9676 = vst [vmem:[#allocation70_spill] sm:$0xff] %v8057_v48 }
 0x3fd   : > { %v2425_v58 = vmax.f32 %v2393_v29, %v2409_v17  ;;  %2482 = vmax.xlane.f32.xlu0 %v7996_v16 }
 0x3ff   : > { %5828 = vmatmul.mubr.f32.gmra.mxu1 %v7581_v9  ;;  %v8002_v61 = vadd.f32 %v2425_v58, %v9670_v14 }
 0x400   : > { %5830 = vmatprep.mubr.f32.mxu1 %v7606_v32  ;;  %v8029_v32 = vld [vmem:[#allocation2 + $0x30] sm:$0xff] }
 0x401   : > { %2486 = vmax.xlane.f32.xlu0 %v8002_v61 }
 0x403   : > { %5831 = vmatmul.mubr.f32.gmra.mxu1 %v7587_v8 }
 0x404   : > { %5833 = vmatprep.mubr.f32.mxu1 %v7612_v41 }
 0x407   : > { %5834 = vmatmul.mubr.f32.gmra.mxu1 %v7594_v63  ;;  %v8022_v63 = vld [vmem:[#allocation2 + $0x20] sm:$0xff] }
 0x408   : > { %5836 = vmatprep.mubr.f32.mxu1 %v7615_v33  ;;  %v8036_v33 = vld [vmem:[#allocation2 + $0x40] sm:$0xff] }
 0x409   : > { %9671 = vst [vmem:[#allocation59_spill] sm:$0xff] %v8036_v33 }
 0x40b   : > { %5837 = vmatmul.mubr.f32.gmra.mxu1 %v7601_v40 }
 0x40c   : > { %5839 = vmatprep.mubr.f32.mxu1 %v7618_v3 }
 0x40f   : > { %5840 = vmatmul.mubr.f32.gmra.mxu1 %v7608_v37 }
 0x410   : > { %5842 = vmatprep.mubr.f32.mxu1 %v7621_v4 }
 0x413   : > { %5843 = vmatmul.mubr.f32.gmra.mxu1 %v7823_v38  ;;  %v8043_v38 = vld [vmem:[#allocation2 + $0x50] sm:$0xff] }
 0x414   : > { %9672 = vst [vmem:[#allocation53_spill] sm:$0xff] %v8043_v38 }
 0x429   : > { %v2463_v9 = vpop.xlane.xlu1 %2462 }
 0x42a   : > { %v8018_v8 = vmax.f32 %v8015_v62, %v2463_v9 }
 0x42c   : > { %3184 = vst.msk [vmem:[#allocation2 + $0x8] sm:$0xff] %vm2764_vm5, %v8018_v8 }
 0x42d   : > { %v2469_v21 = vpop.xlane.xlu1 %2468 }
 0x42e   : > { %v8025_v40 = vmax.f32 %v8022_v63, %v2469_v21 }
 0x430   : > { %3187 = vst.msk [vmem:[#allocation2 + $0x20] sm:$0xff] %vm2764_vm5, %v8025_v40 }
 0x431   : > { %v2473_v37 = vpop.xlane.xlu1 %2472 }
 0x432   : > { %v8032_v41 = vmax.f32 %v8029_v32, %v2473_v37 }
 0x434   : > { %3189 = vst.msk [vmem:[#allocation2 + $0x30] sm:$0xff] %vm2764_vm5, %v8032_v41 }
 0x435   : > { %v2477_v3 = vpop.xlane.xlu1 %2476 }
 0x436   : > { %v8039_v4 = vmax.f32 %v8036_v33, %v2477_v3  ;;  %v9678_v3 = vld [vmem:[#allocation25_spill] sm:$0xff] }
 0x438   : > { %3191 = vst.msk [vmem:[#allocation2 + $0x40] sm:$0xff] %vm2764_vm5, %v8039_v4 }
 0x439   : > { %v2481_v31 = vpop.xlane.xlu1 %2480 }
 0x43a   : > { %v8046_v10 = vmax.f32 %v8043_v38, %v2481_v31 }
 0x43c   : > { %9673 = vst [vmem:[#allocation63_spill] sm:$0xff] %v8046_v10  ;;  %3193 = vst.msk [vmem:[#allocation2 + $0x50] sm:$0xff] %vm2764_vm5, %v8046_v10 }
 0x43d   : > { %v2485_v39 = vpop.xlane.xlu1 %2484 }
 0x43e   : > { %v8053_v34 = vmax.f32 %v8050_v46, %v2485_v39  ;;  %v8069_v39 = vld [vmem:[#allocation2] sm:$0xff] }
 0x440   : > { %9675 = vst [vmem:[#allocation61_spill] sm:$0xff] %v8053_v34  ;;  %3195 = vst.msk [vmem:[#allocation2 + $0x60] sm:$0xff] %vm2764_vm5, %v8053_v34 }
 0x441   : > { %v2489_v29 = vpop.xlane.xlu1 %2488 }
 0x442   : > { %v8060_v17 = vmax.f32 %v8057_v48, %v2489_v29  ;;  %v8076_v29 = vld [vmem:[#allocation2 + $0x10] sm:$0xff] }
 0x444   : > { %9677 = vst [vmem:[#allocation65_spill] sm:$0xff] %v8060_v17  ;;  %3197 = vst.msk [vmem:[#allocation2 + $0x70] sm:$0xff] %vm2764_vm5, %v8060_v17 }
 0x445   : > { %v2374_v58 = vpop.permute.xlu1 %2373 }
 0x446   : > { %v2395_v9 = vadd.f32 %v7891_v57, %v2374_v58  ;;  %v8083_v58 = vld [vmem:[#allocation2 + $0x18] sm:$0xff] }
 0x447   : > { %9679 = vst [vmem:[#allocation71_spill] sm:$0xff] %v8083_v58 }
 0x448   : > { %v2411_v21 = vmul.f32 0.2, %v2395_v9 }
 0x44a   : > { %v2427_v37 = vmax.f32 %v2395_v9, %v2411_v21 }
 0x44c   : > { %v8066_v31 = vadd.f32 %v2427_v37, %v9678_v3 }
 0x44e   : > { %2490 = vmax.xlane.f32.xlu0 %v8066_v31 }
 0x46e   : > { %v2461_v14 = vpop.xlane.xlu0 %2460 }
 0x46f   : > { %v8072_v12 = vmax.f32 %v8069_v39, %v2461_v14  ;;  %v8090_v14 = vld [vmem:[#allocation2 + $0x28] sm:$0xff] }
 0x470   : > { %9680 = vst [vmem:[#allocation44_spill] sm:$0xff] %v8090_v14 }
 0x471   : > { %3183 = vst.msk [vmem:[#allocation2] sm:$0xff] %vm2764_vm5, %v8072_v12 }
 0x472   : > { %v2465_v6 = vpop.xlane.xlu0 %2464 }
 0x473   : > { %v8079_v57 = vmax.f32 %v8076_v29, %v2465_v6  ;;  %v8097_v6 = vld [vmem:[#allocation2 + $0x38] sm:$0xff] }
 0x474   : > { %9681 = vst [vmem:[#allocation46_spill] sm:$0xff] %v8097_v6 }
 0x475   : > { %3185 = vst.msk [vmem:[#allocation2 + $0x10] sm:$0xff] %vm2764_vm5, %v8079_v57 }
 0x476   : > { %v2467_v9 = vpop.xlane.xlu0 %2466 }
 0x477   : > { %v8086_v21 = vmax.f32 %v8083_v58, %v2467_v9  ;;  %v8104_v9 = vld [vmem:[#allocation2 + $0x48] sm:$0xff] }
 0x478   : > { %9683 = vst [vmem:[#allocation48_spill] sm:$0xff] %v8104_v9 }
 0x479   : > { %3186 = vst.msk [vmem:[#allocation2 + $0x18] sm:$0xff] %vm2764_vm5, %v8086_v21 }
 0x47a   : > { %v2471_v37 = vpop.xlane.xlu0 %2470 }
 0x47b   : > { %v8093_v3 = vmax.f32 %v8090_v14, %v2471_v37  ;;  %v8111_v37 = vld [vmem:[#allocation2 + $0x58] sm:$0xff] }
 0x47c   : > { %9685 = vst [vmem:[#allocation52_spill] sm:$0xff] %v8111_v37 }
 0x47d   : > { %3188 = vst.msk [vmem:[#allocation2 + $0x28] sm:$0xff] %vm2764_vm5, %v8093_v3 }
 0x47e   : > { %v2475_v50 = vpop.xlane.xlu0 %2474 }
 0x47f   : > { %v8100_v15 = vmax.f32 %v8097_v6, %v2475_v50  ;;  %v8118_v50 = vld [vmem:[#allocation2 + $0x68] sm:$0xff] }
 0x480   : > { %9687 = vst [vmem:[#allocation57_spill] sm:$0xff] %v8118_v50 }
 0x481   : > { %9682 = vst [vmem:[#allocation47_spill] sm:$0xff] %v8100_v15  ;;  %3190 = vst.msk [vmem:[#allocation2 + $0x38] sm:$0xff] %vm2764_vm5, %v8100_v15 }
 0x482   : > { %v2479_v56 = vpop.xlane.xlu0 %2478 }
 0x483   : > { %v8107_v48 = vmax.f32 %v8104_v9, %v2479_v56 }
 0x485   : > { %9684 = vst [vmem:[#allocation50_spill] sm:$0xff] %v8107_v48  ;;  %3192 = vst.msk [vmem:[#allocation2 + $0x48] sm:$0xff] %vm2764_vm5, %v8107_v48 }
 0x486   : > { %v2483_v46 = vpop.xlane.xlu0 %2482 }
 0x487   : > { %v8114_v38 = vmax.f32 %v8111_v37, %v2483_v46 }
 0x489   : > { %9686 = vst [vmem:[#allocation55_spill] sm:$0xff] %v8114_v38  ;;  %3194 = vst.msk [vmem:[#allocation2 + $0x58] sm:$0xff] %vm2764_vm5, %v8114_v38 }
 0x48a   : > { %v2487_v6 = vpop.xlane.xlu0 %2486 }
 0x48b   : > { %v8121_v14 = vmax.f32 %v8118_v50, %v2487_v6 }
 0x48d   : > { %9688 = vst [vmem:[#allocation58_spill] sm:$0xff] %v8121_v14  ;;  %3196 = vst.msk [vmem:[#allocation2 + $0x68] sm:$0xff] %vm2764_vm5, %v8121_v14 }
 0x4b7   : > { %v5823_v56 = vpop.f32.mrf.mxu1 }
 0x4b8   : > { %2217 = vrot.lane.b32.xlu0 %v5823_v56, %s6633_s10 }
 0x4b9   : > { %v2120_v9 = vpop.f32.mrf.mxu1 }
 0x4ba   : > { %2215 = vrot.lane.b32.xlu1 %v2120_v9, %s6633_s10 }
 0x4bb   : > { %v5826_v46 = vpop.f32.mrf.mxu1 }
 0x4bc   : > { %2221 = vrot.lane.b32.xlu0 %v5826_v46, %s6633_s10 }
 0x4bd   : > { %v2130_v37 = vpop.f32.mrf.mxu1 }
 0x4be   : > { %2219 = vrot.lane.b32.xlu1 %v2130_v37, %s6633_s10 }
 0x4bf   : > { %v5829_v33 = vpop.f32.mrf.mxu1 }
 0x4c0   : > { %2225 = vrot.lane.b32.xlu0 %v5829_v33, %s6633_s10 }
 0x4c1   : > { %v2140_v6 = vpop.f32.mrf.mxu1 }
 0x4c2   : > { %2223 = vrot.lane.b32.xlu1 %v2140_v6, %s6633_s10 }
 0x4c3   : > { %v5832_v50 = vpop.f32.mrf.mxu1 }
 0x4c4   : > { %2229 = vrot.lane.b32.xlu0 %v5832_v50, %s6633_s10 }
 0x4c5   : > { %v2150_v58 = vpop.f32.mrf.mxu1 }
 0x4c6   : > { %2227 = vrot.lane.b32.xlu1 %v2150_v58, %s6633_s10 }
 0x4c7   : > { %v5835_v56 = vpop.f32.mrf.mxu1 }
 0x4c8   : > { %2233 = vrot.lane.b32.xlu0 %v5835_v56, %s6633_s10  ;;  %v8141_v56 = vld [vmem:[#allocation2 + $0x78] sm:$0xff] }
 0x4c9   : > { %v2160_v9 = vpop.f32.mrf.mxu1  ;;  %9689 = vst [vmem:[#allocation60_spill] sm:$0xff] %v8141_v56 }
 0x4ca   : > { %2231 = vrot.lane.b32.xlu1 %v2160_v9, %s6633_s10 }
 0x4cb   : > { %v5838_v46 = vpop.f32.mrf.mxu1 }
 0x4cc   : > { %2237 = vrot.lane.b32.xlu0 %v5838_v46, %s6633_s10 }
 0x4cd   : > { %v2170_v37 = vpop.f32.mrf.mxu1 }
 0x4ce   : > { %2235 = vrot.lane.b32.xlu1 %v2170_v37, %s6633_s10 }
 0x4cf   : > { %v5841_v33 = vpop.f32.mrf.mxu1 }
 0x4d0   : > { %2241 = vrot.lane.b32.xlu0 %v5841_v33, %s6633_s10  ;;  %v9488_v33 = vmov 3  }
 0x4d1   : > { %v2180_v6 = vpop.f32.mrf.mxu1 }
 0x4d2   : > { %2239 = vrot.lane.b32.xlu1 %v2180_v6, %s6633_s10  ;;  %v1879_v6 = vld [vmem:[#allocation4 + $0x8] sm:$0xff] }
 0x4d3   : > { %v5844_v50 = vpop.f32.mrf.mxu1 }
 0x4d4   : > { %2245 = vrot.lane.b32.xlu0 %v5844_v50, %s6633_s10  ;;  %v1975_v50 = vmul.f32 %v7917_v5, %v1879_v6  ;;  %v1883_v6 = vld [vmem:[#allocation4 + $0x28] sm:$0xff] }
 0x4d5   : > { %v2190_v58 = vpop.f32.mrf.mxu1 }
 0x4d6   : > { %2243 = vrot.lane.b32.xlu1 %v2190_v58, %s6633_s10  ;;  %v1878_v58 = vld [vmem:[#allocation4] sm:$0xff] }
 0x4d7   : > { %v2491_v9 = vpop.xlane.xlu0 %2490  ;;  %v1974_v37 = vmul.f32 %v7815_v35, %v1878_v58 }
 0x4d8   : > { %v8144_v46 = vmax.f32 %v8141_v56, %v2491_v9  ;;  %2563 = vperm.xlu0 %6137, %v8018_v8  }
 0x4da   : > { %9690 = vst [vmem:[#allocation62_spill] sm:$0xff] %v8144_v46  ;;  %3198 = vst.msk [vmem:[#allocation2 + $0x78] sm:$0xff] %vm2764_vm5, %v8144_v46  ;;  %2558 = vperm.xlu1 %6136, %v8072_v12  }
 0x4dc   : > { %2578 = vperm.xlu0 %6137, %v8025_v40  }
 0x4de   : > { %2568 = vperm.xlu1 %6136, %v8079_v57  }
 0x4e0   : > { %2588 = vperm.xlu0 %6137, %v8032_v41  }
 0x4e2   : > { %2573 = vperm.xlu1 %6136, %v8086_v21  }
 0x4e4   : > { %2598 = vperm.xlu0 %6137, %v8039_v4  }
 0x4e6   : > { %2583 = vperm.xlu1 %6136, %v8093_v3  }
 0x4e8   : > { %2608 = vperm.xlu0 %6137, %v8046_v10   ;;  %v1979_v10 = vmul.f32 %v7819_v18, %v1883_v6  ;;  %v1889_v6 = vld [vmem:[#allocation4 + $0x58] sm:$0xff] }
 0x4ea   : > { %2593 = vperm.xlu1 %6136, %v8100_v15  }
 0x4ec   : > { %2618 = vperm.xlu0 %6137, %v8053_v34  }
 0x4ee   : > { %2603 = vperm.xlu1 %6136, %v8107_v48   ;;  %v1880_v48 = vld [vmem:[#allocation4 + $0x10] sm:$0xff] }
 0x4f0   : > { %2628 = vperm.xlu0 %6137, %v8060_v17   ;;  %v1881_v17 = vld [vmem:[#allocation4 + $0x18] sm:$0xff] }
 0x4f2   : > { %2613 = vperm.xlu1 %6136, %v8114_v38  }
 0x4f4   : > { %6138 = vset.pattern.permute.xlu0 %v9488_v33 }
 0x4f6   : > { %2623 = vperm.xlu1 %6136, %v8121_v14   ;;  %v1977_v14 = vmul.f32 %v7817_v24, %v1881_v17  ;;  %v1885_v17 = vld [vmem:[#allocation4 + $0x38] sm:$0xff] }
 0x4fa   : > { %2633 = vperm.xlu1 %6136, %v8144_v46  }
 0x4fe   : > { %6139 = vset.pattern.permute.xlu1 %v9488_v33  ;;  %v1976_v33 = vmul.f32 %v7923_v11, %v1880_v48  ;;  %v1981_v11 = vmul.f32 %v7821_v0, %v1885_v17  ;;  %v1884_v48 = vld [vmem:[#allocation4 + $0x30] sm:$0xff]  ;;  %v1891_v17 = vld [vmem:[#allocation4 + $0x68] sm:$0xff] }
 0x4ff   : > { %v1980_v18 = vmul.f32 %v7935_v52, %v1884_v48  ;;  %v1985_v52 = vmul.f32 %v7828_v1, %v1889_v6 }
 0x52a   : > { %v2218_v9 = vpop.permute.xlu0 %2217 }
 0x52b   : > { %v2264_v56 = vadd.f32 %v2218_v9, %v1975_v50  ;;  %v1882_v50 = vld [vmem:[#allocation4 + $0x20] sm:$0xff] }
 0x52c   : > { %v2216_v38 = vpop.permute.xlu1 %2215  ;;  %v1978_v24 = vmul.f32 %v7929_v27, %v1882_v50 }
 0x52d   : > { %2281 = vst.msk [vmem:[#allocation4 + $0x8] sm:$0xff] %vm2279_vm6, %v2264_v56  ;;  %v2263_v46 = vadd.f32 %v2216_v38, %v1974_v37 }
 0x52e   : > { %v2222_v34 = vpop.permute.xlu0 %2221 }
 0x52f   : > { %2280 = vst.msk [vmem:[#allocation4] sm:$0xff] %vm2279_vm6, %v2263_v46  ;;  %v2266_v5 = vadd.f32 %v2222_v34, %v1977_v14  ;;  %v1887_v46 = vld [vmem:[#allocation4 + $0x48] sm:$0xff] }
 0x530   : > { %v2220_v15 = vpop.permute.xlu1 %2219  ;;  %v1983_v27 = vmul.f32 %v7826_v13, %v1887_v46 }
 0x531   : > { %2283 = vst.msk [vmem:[#allocation4 + $0x18] sm:$0xff] %vm2279_vm6, %v2266_v5  ;;  %v2265_v35 = vadd.f32 %v2220_v15, %v1976_v33  ;;  %v1886_v33 = vld [vmem:[#allocation4 + $0x40] sm:$0xff] }
 0x532   : > { %v2226_v58 = vpop.permute.xlu0 %2225  ;;  %v1982_v0 = vmul.f32 %v7938_v26, %v1886_v33  ;;  %v1987_v26 = vmul.f32 %v7830_v2, %v1891_v17 }
 0x533   : > { %2282 = vst.msk [vmem:[#allocation4 + $0x10] sm:$0xff] %vm2279_vm6, %v2265_v35  ;;  %v2268_v38 = vadd.f32 %v2226_v58, %v1979_v10  ;;  %v1888_v58 = vld [vmem:[#allocation4 + $0x50] sm:$0xff] }
 0x534   : > { %v2224_v56 = vpop.permute.xlu1 %2223  ;;  %v1984_v13 = vmul.f32 %v7940_v43, %v1888_v58 }
 0x535   : > { %2285 = vst.msk [vmem:[#allocation4 + $0x28] sm:$0xff] %vm2279_vm6, %v2268_v38  ;;  %v2267_v34 = vadd.f32 %v2224_v56, %v1978_v24 }
 0x536   : > { %v2230_v14 = vpop.permute.xlu0 %2229 }
 0x537   : > { %2284 = vst.msk [vmem:[#allocation4 + $0x20] sm:$0xff] %vm2279_vm6, %v2267_v34  ;;  %v2270_v15 = vadd.f32 %v2230_v14, %v1981_v11  ;;  %v1890_v34 = vld [vmem:[#allocation4 + $0x60] sm:$0xff] }
 0x538   : > { %v2228_v37 = vpop.permute.xlu1 %2227  ;;  %v1986_v1 = vmul.f32 %v7942_v53, %v1890_v34 }
 0x539   : > { %2287 = vst.msk [vmem:[#allocation4 + $0x38] sm:$0xff] %vm2279_vm6, %v2270_v15  ;;  %v2269_v10 = vadd.f32 %v2228_v37, %v1980_v18  ;;  %v1893_v18 = vld [vmem:[#allocation4 + $0x78] sm:$0xff]  ;;  %v1892_v37 = vld [vmem:[#allocation4 + $0x70] sm:$0xff] }
 0x53a   : > { %v2234_v9 = vpop.permute.xlu0 %2233  ;;  %v1989_v43 = vmul.f32 %v7832_v7, %v1893_v18  ;;  %v1988_v2 = vmul.f32 %v7944_v47, %v1892_v37 }
 0x53b   : > { %2286 = vst.msk [vmem:[#allocation4 + $0x30] sm:$0xff] %vm2279_vm6, %v2269_v10  ;;  %v2272_v5 = vadd.f32 %v2234_v9, %v1983_v27 }
 0x53c   : > { %v2232_v35 = vpop.permute.xlu1 %2231 }
 0x53d   : > { %2289 = vst.msk [vmem:[#allocation4 + $0x48] sm:$0xff] %vm2279_vm6, %v2272_v5  ;;  %v2271_v50 = vadd.f32 %v2232_v35, %v1982_v0 }
 0x53e   : > { %v2238_v24 = vpop.permute.xlu0 %2237 }
 0x53f   : > { %2288 = vst.msk [vmem:[#allocation4 + $0x40] sm:$0xff] %vm2279_vm6, %v2271_v50  ;;  %v2274_v38 = vadd.f32 %v2238_v24, %v1985_v52 }
 0x540   : > { %v2236_v56 = vpop.permute.xlu1 %2235 }
 0x541   : > { %2291 = vst.msk [vmem:[#allocation4 + $0x58] sm:$0xff] %vm2279_vm6, %v2274_v38  ;;  %v2273_v11 = vadd.f32 %v2236_v56, %v1984_v13 }
 0x542   : > { %v2242_v48 = vpop.permute.xlu0 %2241 }
 0x543   : > { %2290 = vst.msk [vmem:[#allocation4 + $0x50] sm:$0xff] %vm2279_vm6, %v2273_v11  ;;  %v2276_v14 = vadd.f32 %v2242_v48, %v1987_v26 }
 0x544   : > { %v2240_v15 = vpop.permute.xlu1 %2239 }
 0x545   : > { %2293 = vst.msk [vmem:[#allocation4 + $0x68] sm:$0xff] %vm2279_vm6, %v2276_v14  ;;  %v2275_v46 = vadd.f32 %v2240_v15, %v1986_v1 }
 0x546   : > { %v2246_v27 = vpop.permute.xlu0 %2245 }
 0x547   : > { %2292 = vst.msk [vmem:[#allocation4 + $0x60] sm:$0xff] %vm2279_vm6, %v2275_v46  ;;  %v2278_v10 = vadd.f32 %v2246_v27, %v1989_v43 }
 0x548   : > { %v2244_v33 = vpop.permute.xlu1 %2243 }
 0x549   : > { %2295 = vst.msk [vmem:[#allocation4 + $0x78] sm:$0xff] %vm2279_vm6, %v2278_v10  ;;  %v2277_v53 = vadd.f32 %v2244_v33, %v1988_v2 }
 0x54b   : > { %2294 = vst.msk [vmem:[#allocation4 + $0x70] sm:$0xff] %vm2279_vm6, %v2277_v53 }
 0x553   : > { %v2564_v9 = vpop.permute.xlu0 %2563 }
 0x554   : > { %v2637_v0 = vsub.f32 %v7897_v22, %v2564_v9 }
 0x555   : > { %v2559_v7 = vpop.permute.xlu1 %2558 }
 0x556   : > { %v2654_v5 = vmul.f32 1.442695, %v2637_v0  ;;  %v2636_v6 = vsub.f32 %v7957_v51, %v2559_v7 }
 0x557   : > { %v2579_v35 = vpop.permute.xlu0 %2578 }
 0x558   : > { %6354 = vpow2.f32 %v2654_v5  ;;  %v2652_v52 = vmul.f32 1.442695, %v2636_v6  ;;  %v2640_v47 = vsub.f32 %v7902_v19, %v2579_v35 }
 0x559   : > { %v2569_v50 = vpop.permute.xlu1 %2568 }
 0x55a   : > { %6356 = vpow2.f32 %v2652_v52  ;;  %v2660_v58 = vmul.f32 1.442695, %v2640_v47  ;;  %v2638_v24 = vsub.f32 %v7964_v28, %v2569_v50 }
 0x55b   : > { %v2589_v13 = vpop.permute.xlu0 %2588 }
 0x55c   : > { %6358 = vpow2.f32 %v2660_v58  ;;  %v2656_v38 = vmul.f32 1.442695, %v2638_v24  ;;  %v2642_v17 = vsub.f32 %v7907_v60, %v2589_v13 }
 0x55d   : > { %v2574_v22 = vpop.permute.xlu1 %2573 }
 0x55e   : > { %6360 = vpow2.f32 %v2656_v38  ;;  %v2664_v56 = vmul.f32 1.442695, %v2642_v17  ;;  %v2639_v51 = vsub.f32 %v7969_v23, %v2574_v22 }
 0x55f   : > { %v2599_v26 = vpop.permute.xlu0 %2598 }
 0x560   : > { %6362 = vpow2.f32 %v2664_v56  ;;  %v2658_v11 = vmul.f32 1.442695, %v2639_v51  ;;  %v2644_v19 = vsub.f32 %v7913_v20, %v2599_v26  ;;  %v6499_v26 = vld [vmem:[%s6758_s24 + $0x8] sm:$0xff] }
 0x561   : > { %v2584_v34 = vpop.permute.xlu1 %2583 }
 0x562   : > { %6364 = vpow2.f32 %v2658_v11  ;;  %v2668_v48 = vmul.f32 1.442695, %v2644_v19  ;;  %v2641_v28 = vsub.f32 %v7976_v36, %v2584_v34  ;;  %v6500_v11 = vld [vmem:[%s6758_s24 + $0x20] sm:$0xff]  ;;  %v9691_v19 = vld [vmem:[#allocation51_spill] sm:$0xff] }
 0x563   : > { %v2609_v1 = vpop.permute.xlu0 %2608  ;;  %v6501_v34 = vld [vmem:[%s6758_s24 + $0x30] sm:$0xff] }
 0x564   : > { %6366 = vpow2.f32 %v2668_v48  ;;  %v2662_v14 = vmul.f32 1.442695, %v2641_v28  ;;  %v2646_v60 = vsub.f32 %v7921_v25, %v2609_v1  ;;  %v9692_v48 = vld [vmem:[#allocation45_spill] sm:$0xff]  ;;  %v9693_v28 = vld [vmem:[#allocation43_spill] sm:$0xff]  ;;  %v9694_v1 = vld [vmem:[#allocation54_spill] sm:$0xff] }
 0x565   : > { %v8209_v18 = vpop.eup %6354  ;;  %v2594_v15 = vpop.permute.xlu1 %2593 }
 0x566   : > { %6368 = vpow2.f32 %v2662_v14  ;;  %v2672_v23 = vmul.f32 1.442695, %v2646_v60  ;;  %v2643_v43 = vsub.f32 %v7983_v42, %v2594_v15  ;;  %2718 = vadd.xlane.f32.xlu1 %v8209_v18  ;;  %v6503_v14 = vld [vmem:[%s6758_s24 + $0x50] sm:$0xff]  ;;  %v6504_v60 = vld [vmem:[%s6758_s24 + $0x60] sm:$0xff]  ;;  %v2509_v15 = vsub.f32 %v8015_v62, %v8018_v8 }
 0x567   : > { %v6357_v20 = vpop.eup %6356  ;;  %v2619_v46 = vpop.permute.xlu0 %2618  ;;  %v9697_v62 = vld [vmem:[#allocation71_spill] sm:$0xff] }
 0x568   : > { %6370 = vpow2.f32 %v2672_v23  ;;  %v2666_v37 = vmul.f32 1.442695, %v2643_v43  ;;  %v2648_v36 = vsub.f32 %v7927_v59, %v2619_v46  ;;  %2716 = vadd.xlane.f32.xlu0 %v6357_v20  ;;  %5877 = vmatprep.mubr.f32.mxu0 %v6357_v20  ;;  %v2508_v23 = vsub.f32 %v8069_v39, %v8072_v12  ;;  %v9698_v39 = vld [vmem:[#allocation59_spill] sm:$0xff] }
 0x569   : > { %v8214_v27 = vpop.eup %6358  ;;  %v2604_v25 = vpop.permute.xlu1 %2603  ;;  %v2526_v43 = vmul.f32 1.442695, %v2509_v15  ;;  %v2512_v20 = vsub.f32 %v8022_v63, %v8025_v40  ;;  %v2511_v8 = vsub.f32 %v9697_v62, %v8086_v21  ;;  %v9699_v40 = vld [vmem:[#allocation44_spill] sm:$0xff] }
 0x56a   : > { %6372 = vpow2.f32 %v2666_v37  ;;  %v2676_v2 = vmul.f32 1.442695, %v2648_v36  ;;  %v2645_v10 = vsub.f32 %v7989_v54, %v2604_v25  ;;  %2724 = vadd.xlane.f32.xlu1 %v8214_v27  ;;  %v2524_v46 = vmul.f32 1.442695, %v2508_v23  ;;  %v9711_v15 = vld [vmem:[#allocation52_spill] sm:$0xff] }
 0x56b   : > { %v8218_v42 = vpop.eup %6360  ;;  %v2629_v33 = vpop.permute.xlu0 %2628  ;;  %v2510_v37 = vsub.f32 %v8076_v29, %v8079_v57  ;;  %v2532_v36 = vmul.f32 1.442695, %v2512_v20  ;;  %v2514_v25 = vsub.f32 %v8029_v32, %v8032_v41  ;;  %v2530_v63 = vmul.f32 1.442695, %v2511_v8 }
 0x56c   : > { %6374 = vpow2.f32 %v2676_v2  ;;  %v2670_v53 = vmul.f32 1.442695, %v2645_v10  ;;  %v2650_v9 = vsub.f32 %v7933_v55, %v2629_v33  ;;  %2720 = vadd.xlane.f32.xlu0 %v8218_v42  ;;  %v2516_v10 = vsub.f32 %v9698_v39, %v8039_v4  ;;  %v9700_v33 = vld [vmem:[#allocation63_spill] sm:$0xff] }
 0x56d   : > { %v8222_v59 = vpop.eup %6362  ;;  %v2614_v0 = vpop.permute.xlu1 %2613  ;;  %v2528_v2 = vmul.f32 1.442695, %v2510_v37  ;;  %v2536_v12 = vmul.f32 1.442695, %v2514_v25  ;;  %v2513_v29 = vsub.f32 %v9699_v40, %v8093_v3 }
 0x56e   : > { %6376 = vpow2.f32 %v2670_v53  ;;  %v2680_v7 = vmul.f32 1.442695, %v2650_v9  ;;  %v2647_v5 = vsub.f32 %v7996_v16, %v2614_v0  ;;  %2728 = vadd.xlane.f32.xlu1 %v8222_v59  ;;  %v2540_v57 = vmul.f32 1.442695, %v2516_v10  ;;  %v9701_v53 = vld [vmem:[#allocation53_spill] sm:$0xff]  ;;  %v9702_v9 = vld [vmem:[#allocation47_spill] sm:$0xff] }
 0x56f   : > { %v8226_v54 = vpop.eup %6364  ;;  %v2518_v32 = vsub.f32 %v9701_v53, %v9700_v33  ;;  %v2534_v41 = vmul.f32 1.442695, %v2513_v29  ;;  %v9703_v0 = vld [vmem:[#allocation46_spill] sm:$0xff]  ;;  %v2690_v53 = vld [vmem:[#allocation3 + $0x30] sm:$0xff] }
 0x570   : > { %6378 = vpow2.f32 %v2680_v7  ;;  %v2674_v6 = vmul.f32 1.442695, %v2647_v5  ;;  %2722 = vadd.xlane.f32.xlu0 %v8226_v54  ;;  %v2515_v21 = vsub.f32 %v9703_v0, %v9702_v9  ;;  %v9704_v5 = vld [vmem:[#allocation61_spill] sm:$0xff]  ;;  %v9712_v10 = vld [vmem:[#allocation58_spill] sm:$0xff] }
 0x571   : > { %v8229_v35 = vpop.eup %6366  ;;  %v2624_v55 = vpop.permute.xlu1 %2623  ;;  %v2544_v7 = vmul.f32 1.442695, %v2518_v32 }
 0x572   : > { %6380 = vpow2.f32 %v2674_v6  ;;  %v2649_v52 = vsub.f32 %v8002_v61, %v2624_v55  ;;  %2732 = vadd.xlane.f32.xlu1 %v8229_v35  ;;  %v9705_v6 = vld [vmem:[#allocation56_spill] sm:$0xff]  ;;  %v2538_v3 = vmul.f32 1.442695, %v2515_v21 }
 0x573   : > { %v8233_v47 = vpop.eup %6368  ;;  %v2520_v4 = vsub.f32 %v9705_v6, %v9704_v5  ;;  %v2687_v21 = vld [vmem:[#allocation3 + $0x18] sm:$0xff] }
 0x574   : > { %v2678_v50 = vmul.f32 1.442695, %v2649_v52  ;;  %2726 = vadd.xlane.f32.xlu0 %v8233_v47 }
 0x575   : > { %v8236_v16 = vpop.eup %6370  ;;  %v2634_v58 = vpop.permute.xlu1 %2633 }
 0x576   : > { %6382 = vpow2.f32 %v2678_v50  ;;  %v2651_v24 = vsub.f32 %v8066_v31, %v2634_v58  ;;  %2736 = vadd.xlane.f32.xlu1 %v8236_v16  ;;  %v9706_v50 = vld [vmem:[#allocation50_spill] sm:$0xff]  ;;  %v9707_v58 = vld [vmem:[#allocation48_spill] sm:$0xff] }
 0x577   : > { %v8240_v13 = vpop.eup %6372 }
 0x578   : > { %v2682_v38 = vmul.f32 1.442695, %v2651_v24  ;;  %2730 = vadd.xlane.f32.xlu0 %v8240_v13  ;;  %v2517_v24 = vsub.f32 %v9707_v58, %v9706_v50  ;;  %v2692_v50 = vld [vmem:[#allocation3 + $0x40] sm:$0xff] }
 0x579   : > { %v8243_v61 = vpop.eup %6374 }
 0x57a   : > { %6384 = vpow2.f32 %v2682_v38  ;;  %2740 = vadd.xlane.f32.xlu1 %v8243_v61  ;;  %v2685_v38 = vld [vmem:[#allocation3 + $0x8] sm:$0xff] }
 0x57b   : > { %v8246_v17 = vpop.eup %6376  ;;  %6386 = vpow2.f32 %v2526_v43 }
 0x57c   : > { %2734 = vadd.xlane.f32.xlu0 %v8246_v17  ;;  %6388 = vpow2.f32 %v2524_v46  ;;  %v2688_v46 = vld [vmem:[#allocation3 + $0x20] sm:$0xff] }
 0x57d   : > { %v8249_v22 = vpop.eup %6378  ;;  %6390 = vpow2.f32 %v2532_v36 }
 0x57e   : > { %2744 = vadd.xlane.f32.xlu1 %v8249_v22  ;;  %6392 = vpow2.f32 %v2528_v2  ;;  %v2686_v2 = vld [vmem:[#allocation3 + $0x10] sm:$0xff] }
 0x57f   : > { %v8252_v31 = vpop.eup %6380  ;;  %6394 = vpow2.f32 %v2536_v12 }
 0x580   : > { %2738 = vadd.xlane.f32.xlu0 %v8252_v31  ;;  %6396 = vpow2.f32 %v2530_v63  ;;  %v9713_v63 = vld [vmem:[#allocation57_spill] sm:$0xff] }
 0x581   : > { %6398 = vpow2.f32 %v2540_v57  ;;  %v2521_v40 = vsub.f32 %v9713_v63, %v9712_v10 }
 0x582   : > { %6400 = vpow2.f32 %v2534_v41 }
 0x583   : > { %v8255_v56 = vpop.eup %6382  ;;  %6402 = vpow2.f32 %v2544_v7  ;;  %v2550_v7 = vmul.f32 1.442695, %v2521_v40 }
 0x584   : > { %2742 = vadd.xlane.f32.xlu0 %v8255_v56  ;;  %6404 = vpow2.f32 %v2538_v3 }
 0x587   : > { %v8258_v51 = vpop.eup %6384 }
 0x588   : > { %2746 = vadd.xlane.f32.xlu0 %v8258_v51  ;;  %v8300_v55 = vpop.eup %6386 }
 0x589   : > { %v8302_v52 = vpop.eup %6388 }
 0x58f   : > { %3204 = vperm.xlu1 %6139, %v6499_v26   ;;  %v2548_v26 = vmul.f32 1.442695, %v2520_v4 }
 0x591   : > { %6406 = vpow2.f32 %v2548_v26 }
 0x593   : > { %3208 = vperm.xlu1 %6139, %v7862_v30   ;;  %v6502_v30 = vld [vmem:[%s6758_s24 + $0x40] sm:$0xff] }
 0x597   : > { %3212 = vperm.xlu1 %6139, %v7866_v49   ;;  %v9695_v49 = vld [vmem:[#allocation49_spill] sm:$0xff] }
 0x59b   : > { %3216 = vperm.xlu1 %6139, %v6500_v11   ;;  %v9708_v11 = vld [vmem:[#allocation65_spill] sm:$0xff] }
 0x59e   : > { %3200 = vperm.xlu0 %6138, %v7858_v44   ;;  %v6505_v44 = vld [vmem:[%s6758_s24 + $0x70] sm:$0xff] }
 0x59f   : > { %3220 = vperm.xlu1 %6139, %v7870_v45   ;;  %v9696_v45 = vmov 2  }
 0x5a2   : > { %3236 = vperm.xlu0 %6138, %v9691_v19   ;;  %v9709_v19 = vld [vmem:[#allocation70_spill] sm:$0xff] }
 0x5a3   : > { %3224 = vperm.xlu1 %6139, %v6501_v34   ;;  %v2522_v34 = vsub.f32 %v9709_v19, %v9708_v11  ;;  %v2689_v11 = vld [vmem:[#allocation3 + $0x28] sm:$0xff]  ;;  %v9714_v19 = vld [vmem:[#allocation60_spill] sm:$0xff] }
 0x5a5   : > { %v2552_v37 = vmul.f32 1.442695, %v2522_v34  ;;  %v9715_v34 = vld [vmem:[#allocation62_spill] sm:$0xff] }
 0x5a6   : > { %3244 = vperm.xlu0 %6138, %v9692_v48   ;;  %v2701_v48 = vmul.f32 %v8300_v55, %v2685_v38 }
 0x5a7   : > { %3228 = vperm.xlu1 %6139, %v9693_v28   ;;  %v2684_v28 = vld [vmem:[#allocation3] sm:$0xff] }
 0x5aa   : > { %3252 = vperm.xlu0 %6138, %v9694_v1   ;;  %v8309_v1 = vpop.eup %6390 }
 0x5ab   : > { %3232 = vperm.xlu1 %6139, %v6502_v30   ;;  %v2704_v25 = vmul.f32 %v8309_v1, %v2688_v46 }
 0x5ae   : > { %3260 = vperm.xlu0 %6138, %v9695_v49   ;;  %v2700_v49 = vmul.f32 %v8302_v52, %v2684_v28 }
 0x5af   : > { %3240 = vperm.xlu1 %6139, %v6503_v14   ;;  %v8312_v14 = vpop.eup %6392 }
 0x5b0   : > { %v8318_v62 = vpop.eup %6394  ;;  %v2702_v12 = vmul.f32 %v8312_v14, %v2686_v2 }
 0x5b1   : > { %v8324_v57 = vpop.eup %6396  ;;  %v2706_v41 = vmul.f32 %v8318_v62, %v2690_v53 }
 0x5b2   : > { %v8328_v9 = vpop.eup %6398  ;;  %v2703_v6 = vmul.f32 %v8324_v57, %v2687_v21 }
 0x5b3   : > { %3248 = vperm.xlu1 %6139, %v6504_v60   ;;  %v2542_v60 = vmul.f32 1.442695, %v2517_v24  ;;  %v8332_v4 = vpop.eup %6400  ;;  %v2708_v24 = vmul.f32 %v8328_v9, %v2692_v50  ;;  %v2695_v50 = vld [vmem:[#allocation3 + $0x58] sm:$0xff] }
 0x5b4   : > { %v8336_v38 = vpop.eup %6402 }
 0x5b5   : > { %6408 = vpow2.f32 %v2542_v60  ;;  %v8343_v60 = vpop.eup %6404 }
 0x5b6   : > { %6410 = vpow2.f32 %v2552_v37  ;;  %v2691_v37 = vld [vmem:[#allocation3 + $0x38] sm:$0xff] }
 0x5b7   : > { %3256 = vperm.xlu1 %6139, %v6505_v44   ;;  %v9710_v44 = vld [vmem:[#allocation55_spill] sm:$0xff] }
 0x5b8   : > { %v2519_v23 = vsub.f32 %v9711_v15, %v9710_v44  ;;  %v2694_v15 = vld [vmem:[#allocation3 + $0x50] sm:$0xff] }
 0x5ba   : > { %v2546_v39 = vmul.f32 1.442695, %v2519_v23 }
 0x5bb   : > { %6140 = vset.pattern.permute.xlu1 %v9696_v45 }
 0x5bc   : > { %6412 = vpow2.f32 %v2546_v39 }
 0x5bd   : > { %6414 = vpow2.f32 %v2550_v7  ;;  %v2698_v7 = vld [vmem:[#allocation3 + $0x70] sm:$0xff] }
 0x5ef   : > { %v2719_v30 = vpop.xlane.xlu1 %2718 }
 0x5f0   : > { %v2749_v43 = vadd.f32 %v2719_v30, %v2701_v48  ;;  %v9716_v48 = vsub.f32 %v9714_v19, %v9715_v34 }
 0x5f1   : > { %v2717_v20 = vpop.xlane.xlu0 %2716 }
 0x5f2   : > { %2766 = vst.msk [vmem:[#allocation3 + $0x8] sm:$0xff] %vm2764_vm5, %v2749_v43  ;;  %v2748_v36 = vadd.f32 %v2717_v20, %v2700_v49  ;;  %v2554_v28 = vmul.f32 1.442695, %v9716_v48  ;;  %v2705_v49 = vmul.f32 %v8332_v4, %v2689_v11  ;;  %v2710_v43 = vmul.f32 %v8336_v38, %v2694_v15  ;;  %v8347_v20 = vpop.eup %6406 }
 0x5f3   : > { %v2725_v8 = vpop.xlane.xlu1 %2724  ;;  %v8351_v2 = vpop.eup %6408 }
 0x5f4   : > { %2765 = vst.msk [vmem:[#allocation3] sm:$0xff] %vm2764_vm5, %v2748_v36  ;;  %v2752_v29 = vadd.f32 %v2725_v8, %v2704_v25  ;;  %6416 = vpow2.f32 %v2554_v28  ;;  %v2707_v25 = vmul.f32 %v8343_v60, %v2691_v37  ;;  %v8355_v63 = vpop.eup %6410 }
 0x5f5   : > { %v2721_v33 = vpop.xlane.xlu0 %2720 }
 0x5f6   : > { %2769 = vst.msk [vmem:[#allocation3 + $0x20] sm:$0xff] %vm2764_vm5, %v2752_v29  ;;  %v2750_v32 = vadd.f32 %v2721_v33, %v2702_v12  ;;  %v2696_v12 = vld [vmem:[#allocation3 + $0x60] sm:$0xff]  ;;  %v2693_v29 = vld [vmem:[#allocation3 + $0x48] sm:$0xff] }
 0x5f7   : > { %v2729_v0 = vpop.xlane.xlu1 %2728  ;;  %v2712_v10 = vmul.f32 %v8347_v20, %v2696_v12  ;;  %v2709_v53 = vmul.f32 %v8351_v2, %v2693_v29 }
 0x5f8   : > { %2767 = vst.msk [vmem:[#allocation3 + $0x10] sm:$0xff] %vm2764_vm5, %v2750_v32  ;;  %v2754_v5 = vadd.f32 %v2729_v0, %v2706_v41  ;;  %v9717_v32 = vld [vmem:[#allocation9_spill] sm:$0xff]  ;;  %v8360_v0 = vpop.eup %6412 }
 0x5f9   : > { %v2723_v3 = vpop.xlane.xlu0 %2722  ;;  %v3265_v41 = vsub.s32 3, %v9717_v32  ;;  %v8369_v19 = vpop.eup %6414 }
 0x5fa   : > { %2771 = vst.msk [vmem:[#allocation3 + $0x30] sm:$0xff] %vm2764_vm5, %v2754_v5  ;;  %v2751_v58 = vadd.f32 %v2723_v3, %v2703_v6  ;;  %v2714_v6 = vmul.f32 %v8355_v63, %v2698_v7 }
 0x5fb   : > { %v2733_v26 = vpop.xlane.xlu1 %2732 }
 0x5fc   : > { %2768 = vst.msk [vmem:[#allocation3 + $0x18] sm:$0xff] %vm2764_vm5, %v2751_v58  ;;  %v2756_v30 = vadd.f32 %v2733_v26, %v2708_v24  ;;  %v2711_v24 = vmul.f32 %v8360_v0, %v2695_v50  ;;  %v6506_v26 = vld [vmem:[%s6763_s3] sm:$0xf]  ;;  %s6635_s3 = smov 112  }
 0x5fd   : > { %v2727_v44 = vpop.xlane.xlu0 %2726  ;;  %v8367_v11 = vrot.slane %v6506_v26, %v3265_v41 }
 0x5fe   : > { %2773 = vst.msk [vmem:[#allocation3 + $0x40] sm:$0xff] %vm2764_vm5, %v2756_v30  ;;  %v2753_v23 = vadd.f32 %v2727_v44, %v2705_v49  ;;  %v2697_v30 = vld [vmem:[#allocation3 + $0x68] sm:$0xff] }
 0x5ff   : > { %v2737_v46 = vpop.xlane.xlu1 %2736  ;;  %v2713_v44 = vmul.f32 %v8369_v19, %v2697_v30 }
 0x600   : > { %2770 = vst.msk [vmem:[#allocation3 + $0x28] sm:$0xff] %vm2764_vm5, %v2753_v23  ;;  %v2758_v36 = vadd.f32 %v2737_v46, %v2710_v43 }
 0x601   : > { %v2731_v8 = vpop.xlane.xlu0 %2730  ;;  %v8375_v15 = vpop.eup %6416 }
 0x602   : > { %2775 = vst.msk [vmem:[#allocation3 + $0x50] sm:$0xff] %vm2764_vm5, %v2758_v36  ;;  %v2755_v39 = vadd.f32 %v2731_v8, %v2707_v25  ;;  %v2699_v36 = vld [vmem:[#allocation3 + $0x78] sm:$0xff] }
 0x603   : > { %v2741_v40 = vpop.xlane.xlu1 %2740  ;;  %v2715_v8 = vmul.f32 %v8375_v15, %v2699_v36 }
 0x604   : > { %2772 = vst.msk [vmem:[#allocation3 + $0x38] sm:$0xff] %vm2764_vm5, %v2755_v39  ;;  %v2760_v33 = vadd.f32 %v2741_v40, %v2712_v10  ;;  %v9718_v10 = vld [vmem:[#allocation12_spill] sm:$0xff] }
 0x605   : > { %v2735_v21 = vpop.xlane.xlu0 %2734 }
 0x606   : > { %2777 = vst.msk [vmem:[#allocation3 + $0x60] sm:$0xff] %vm2764_vm5, %v2760_v33  ;;  %v2757_v5 = vadd.f32 %v2735_v21, %v2709_v53 }
 0x607   : > { %v2745_v3 = vpop.xlane.xlu1 %2744 }
 0x608   : > { %2774 = vst.msk [vmem:[#allocation3 + $0x48] sm:$0xff] %vm2764_vm5, %v2757_v5  ;;  %v2762_v58 = vadd.f32 %v2745_v3, %v2714_v6  ;;  %v9719_v6 = vld [vmem:[#allocation14_spill] sm:$0xff] }
 0x609   : > { %v2739_v34 = vpop.xlane.xlu0 %2738 }
 0x60a   : > { %2779 = vst.msk [vmem:[#allocation3 + $0x70] sm:$0xff] %vm2764_vm5, %v2762_v58  ;;  %v2759_v48 = vadd.f32 %v2739_v34, %v2711_v24 }
 0x60b   : > { %v3205_v28 = vpop.permute.xlu1 %3204 }
 0x60c   : > { %2776 = vst.msk [vmem:[#allocation3 + $0x58] sm:$0xff] %vm2764_vm5, %v2759_v48  ;;  %v3268_v49 = vadd.f32 %v8367_v11, %v3205_v28 }
 0x60d   : > { %v2743_v23 = vpop.xlane.xlu0 %2742 }
 0x60e   : > { %v3284_v43 = vmul.f32 0.2, %v3268_v49  ;;  %v2761_v46 = vadd.f32 %v2743_v23, %v2713_v44 }
 0x60f   : > { %v3209_v37 = vpop.permute.xlu1 %3208 }
 0x610   : > { %v3300_v25 = vmax.f32 %v3268_v49, %v3284_v43  ;;  %2778 = vst.msk [vmem:[#allocation3 + $0x68] sm:$0xff] %vm2764_vm5, %v2761_v46  ;;  %v3269_v32 = vadd.f32 %v8367_v11, %v3209_v37  ;;  %v9720_v37 = vld [vmem:[#allocation10_spill] sm:$0xff] }
 0x611   : > { %v2747_v12 = vpop.xlane.xlu0 %2746 }
 0x612   : > { %v2763_v39 = vadd.f32 %v2747_v12, %v2715_v8  ;;  %v8380_v40 = vadd.f32 %v3300_v25, %v9718_v10  ;;  %v3285_v50 = vmul.f32 0.2, %v3269_v32  ;;  %v9721_v12 = vld [vmem:[#allocation16_spill] sm:$0xff] }
 0x613   : > { %v3213_v29 = vpop.permute.xlu1 %3212 }
 0x614   : > { %2780 = vst.msk [vmem:[#allocation3 + $0x78] sm:$0xff] %vm2764_vm5, %v2763_v39  ;;  %v3270_v33 = vadd.f32 %v8367_v11, %v3213_v29  ;;  %3349 = vmax.xlane.f32.xlu0 %v8380_v40  ;;  %v3301_v49 = vmax.f32 %v3269_v32, %v3285_v50  ;;  %v9722_v32 = vld [vmem:[#allocation11_spill] sm:$0xff] }
 0x616   : > { %v3286_v53 = vmul.f32 0.2, %v3270_v33 }
 0x617   : > { %v3217_v41 = vpop.permute.xlu1 %3216 }
 0x618   : > { %v3302_v21 = vmax.f32 %v3270_v33, %v3286_v53  ;;  %v3271_v24 = vadd.f32 %v8367_v11, %v3217_v41  ;;  %v8405_v41 = vadd.f32 %v3301_v49, %v9722_v32 }
 0x619   : > { %v3201_v7 = vpop.permute.xlu0 %3200 }
 0x61a   : > { %v3267_v5 = vadd.f32 %v8367_v11, %v3201_v7  ;;  %v8388_v3 = vadd.f32 %v3302_v21, %v9719_v6  ;;  %v3287_v23 = vmul.f32 0.2, %v3271_v24 }
 0x61b   : > { %v3221_v58 = vpop.permute.xlu1 %3220 }
 0x61c   : > { %v3283_v26 = vmul.f32 0.2, %v3267_v5  ;;  %v3272_v34 = vadd.f32 %v8367_v11, %v3221_v58  ;;  %3353 = vmax.xlane.f32.xlu0 %v8388_v3  ;;  %v3303_v29 = vmax.f32 %v3271_v24, %v3287_v23  ;;  %v9724_v23 = vld [vmem:[#allocation18_spill] sm:$0xff] }
 0x61d   : > { %v3237_v48 = vpop.permute.xlu0 %3236 }
 0x61e   : > { %v3299_v28 = vmax.f32 %v3267_v5, %v3283_v26  ;;  %v3288_v30 = vmul.f32 0.2, %v3272_v34  ;;  %v3276_v25 = vadd.f32 %v8367_v11, %v3237_v48 }
 0x61f   : > { %v3225_v44 = vpop.permute.xlu1 %3224 }
 0x620   : > { %v3304_v43 = vmax.f32 %v3272_v34, %v3288_v30  ;;  %v3273_v46 = vadd.f32 %v8367_v11, %v3225_v44  ;;  %v8395_v36 = vadd.f32 %v3299_v28, %v9720_v37  ;;  %v3292_v21 = vmul.f32 0.2, %v3276_v25  ;;  %v9723_v34 = vld [vmem:[#allocation13_spill] sm:$0xff] }
 0x621   : > { %v3245_v8 = vpop.permute.xlu0 %3244  ;;  %v8411_v48 = vadd.f32 %v3303_v29, %v9723_v34 }
 0x622   : > { %3347 = vmax.xlane.f32.xlu1 %v8395_v36  ;;  %v8400_v39 = vadd.f32 %v3304_v43, %v9721_v12  ;;  %v3289_v33 = vmul.f32 0.2, %v3273_v46  ;;  %v3278_v5 = vadd.f32 %v8367_v11, %v3245_v8  ;;  %v3308_v28 = vmax.f32 %v3276_v25, %v3292_v21  ;;  %v9726_v25 = vld [vmem:[#allocation20_spill] sm:$0xff] }
 0x623   : > { %v3229_v10 = vpop.permute.xlu1 %3228 }
 0x624   : > { %v3274_v53 = vadd.f32 %v8367_v11, %v3229_v10  ;;  %3357 = vmax.xlane.f32.xlu0 %v8400_v39  ;;  %v3305_v58 = vmax.f32 %v3273_v46, %v3289_v33  ;;  %v3294_v30 = vmul.f32 0.2, %v3278_v5  ;;  %v9725_v10 = vld [vmem:[#allocation15_spill] sm:$0xff]  ;;  %v8424_v33 = vadd.f32 %v3308_v28, %v9726_v25 }
 0x625   : > { %v3253_v7 = vpop.permute.xlu0 %3252 }
 0x626   : > { %v3290_v6 = vmul.f32 0.2, %v3274_v53  ;;  %3351 = vmax.xlane.f32.xlu1 %v8405_v41  ;;  %v3280_v49 = vadd.f32 %v8367_v11, %v3253_v7  ;;  %v8421_v29 = vadd.f32 %v3305_v58, %v9725_v10 }
 0x627   : > { %v3233_v50 = vpop.permute.xlu1 %3232 }
 0x628   : > { %v3306_v26 = vmax.f32 %v3274_v53, %v3290_v6  ;;  %v3275_v24 = vadd.f32 %v8367_v11, %v3233_v50  ;;  %v3310_v53 = vmax.f32 %v3278_v5, %v3294_v30  ;;  %v3296_v32 = vmul.f32 0.2, %v3280_v49  ;;  %v9728_v5 = vld [vmem:[#allocation22_spill] sm:$0xff] }
 0x629   : > { %v3261_v37 = vpop.permute.xlu0 %3260 }
 0x62a   : > { %v3291_v44 = vmul.f32 0.2, %v3275_v24  ;;  %3355 = vmax.xlane.f32.xlu1 %v8411_v48  ;;  %v8416_v43 = vadd.f32 %v3306_v26, %v9724_v23  ;;  %v3282_v21 = vadd.f32 %v8367_v11, %v3261_v37  ;;  %v3312_v58 = vmax.f32 %v3280_v49, %v3296_v32  ;;  %v9730_v49 = vld [vmem:[#allocation24_spill] sm:$0xff] }
 0x62b   : > { %v3241_v8 = vpop.permute.xlu1 %3240  ;;  %v8435_v30 = vadd.f32 %v3310_v53, %v9728_v5  ;;  %v9731_v53 = vld [vmem:[#allocation21_spill] sm:$0xff]  ;;  %v9737_v5 = vld [vmem:[#allocation34_spill] sm:$0xff] }
 0x62c   : > { %v3307_v12 = vmax.f32 %v3275_v24, %v3291_v44  ;;  %v3277_v46 = vadd.f32 %v8367_v11, %v3241_v8  ;;  %3361 = vmax.xlane.f32.xlu0 %v8416_v43  ;;  %v9727_v24 = vld [vmem:[#allocation17_spill] sm:$0xff]  ;;  %v3298_v44 = vmul.f32 0.2, %v3282_v21  ;;  %v8444_v32 = vadd.f32 %v3312_v58, %v9730_v49  ;;  %v9735_v58 = vld [vmem:[#allocation28_spill] sm:$0xff] }
 0x62e   : > { %v3293_v7 = vmul.f32 0.2, %v3277_v46  ;;  %3359 = vmax.xlane.f32.xlu1 %v8421_v29  ;;  %v8431_v34 = vadd.f32 %v3307_v12, %v9727_v24  ;;  %v3314_v25 = vmax.f32 %v3282_v21, %v3298_v44  ;;  %v9733_v21 = vld [vmem:[#allocation23_spill] sm:$0xff] }
 0x62f   : > { %v3249_v6 = vpop.permute.xlu1 %3248  ;;  %v9734_v24 = vld [vmem:[#allocation27_spill] sm:$0xff] }
 0x630   : > { %v3309_v50 = vmax.f32 %v3277_v46, %v3293_v7  ;;  %v3279_v26 = vadd.f32 %v8367_v11, %v3249_v6  ;;  %3365 = vmax.xlane.f32.xlu0 %v8424_v33  ;;  %v9729_v46 = vld [vmem:[#allocation19_spill] sm:$0xff]  ;;  %v6141_v44 = vpack.i.bf16 %v9735_v58, %v9734_v24  ;;  %v9746_v58 = vmov 3  }
 0x632   : > { %v3295_v28 = vmul.f32 0.2, %v3279_v26  ;;  %3363 = vmax.xlane.f32.xlu1 %v8431_v34  ;;  %v8440_v10 = vadd.f32 %v3309_v50, %v9729_v46 }
 0x633   : > { %v3257_v23 = vpop.permute.xlu1 %3256 }
 0x634   : > { %v3311_v37 = vmax.f32 %v3279_v26, %v3295_v28  ;;  %v3281_v8 = vadd.f32 %v8367_v11, %v3257_v23  ;;  %3369 = vmax.xlane.f32.xlu0 %v8435_v30  ;;  %v9732_v11 = vld [vmem:[#allocation25_spill] sm:$0xff] }
 0x635   : > { %v8452_v26 = vadd.f32 %v3314_v25, %v9732_v11  ;;  %v9736_v28 = vld [vmem:[#allocation33_spill] sm:$0xff]  ;;  %v9744_v11 = vld [vmem:[#allocation31_spill] sm:$0xff] }
 0x636   : > { %v3297_v12 = vmul.f32 0.2, %v3281_v8  ;;  %3367 = vmax.xlane.f32.xlu1 %v8440_v10  ;;  %v8448_v6 = vadd.f32 %v3311_v37, %v9731_v53  ;;  %v6156_v23 = vpack.i.bf16 %v9737_v5, %v9736_v28  ;;  %v9738_v37 = vld [vmem:[#allocation35_spill] sm:$0xff]  ;;  %v9740_v25 = vld [vmem:[#allocation29_spill] sm:$0xff]  ;;  %v9743_v53 = vld [vmem:[#allocation38_spill] sm:$0xff] }
 0x637   : > { %v9749_v5 = vld [vmem:[#allocation41_spill] sm:$0xff] }
 0x638   : > { %v3313_v7 = vmax.f32 %v3281_v8, %v3297_v12  ;;  %3373 = vmax.xlane.f32.xlu0 %v8444_v32  ;;  %v9739_v8 = vld [vmem:[#allocation36_spill] sm:$0xff]  ;;  %v9741_v12 = vld [vmem:[#allocation30_spill] sm:$0xff] }
 0x639   : > { %v6166_v46 = vpack.i.bf16 %v9739_v8, %v9738_v37  ;;  %v6146_v49 = vpack.i.bf16 %v9741_v12, %v9740_v25  ;;  %v9750_v37 = vld [vmem:[#allocation42_spill] sm:$0xff] }
 0x63a   : > { %3371 = vmax.xlane.f32.xlu1 %v8448_v6  ;;  %v8456_v50 = vadd.f32 %v3313_v7, %v9733_v21  ;;  %v9742_v7 = vld [vmem:[#allocation37_spill] sm:$0xff]  ;;  %v9745_v21 = vld [vmem:[#allocation32_spill] sm:$0xff]  ;;  %v8489_v8 = vpack.i.bf16 %v9750_v37, %v9749_v5  ;;  %v8493_v25 = vld [vmem:[#allocation2 + $0x8] sm:$0xff] }
 0x63b   : > { %v6151_v24 = vpack.i.bf16 %v9745_v21, %v9744_v11  ;;  %9751 = vst [vmem:[#allocation64_spill] sm:$0xff] %v8493_v25  ;;  %v8511_v11 = vld [vmem:[#allocation2] sm:$0xff] }
 0x63c   : > { %3377 = vmax.xlane.f32.xlu0 %v8452_v26 }
 0x63e   : > { %3375 = vmax.xlane.f32.xlu1 %v8456_v50 }
 0x64f   : > { %2799 = vperm.xlu1 %6140, %v8302_v52   ;;  %v8472_v52 = vpack.i.bf16 %v9743_v53, %v9742_v7 }
 0x652   : > { %6142 = vrot.lane.b32.xlu0 %v6141_v44, %s6635_s3 }
 0x653   : > { %2804 = vperm.xlu1 %6140, %v8300_v55   ;;  %v9747_v55 = vld [vmem:[#allocation39_spill] sm:$0xff] }
 0x656   : > { %6157 = vrot.lane.b32.xlu0 %v6156_v23, %s6635_s3 }
 0x657   : > { %2814 = vperm.xlu1 %6140, %v8324_v57   ;;  %v9748_v57 = vld [vmem:[#allocation40_spill] sm:$0xff] }
 0x658   : > { %v8481_v28 = vpack.i.bf16 %v9748_v57, %v9747_v55  ;;  %v8516_v55 = vld [vmem:[#allocation2 + $0x28] sm:$0xff] }
 0x659   : > { %9755 = vst [vmem:[#allocation69_spill] sm:$0xff] %v8516_v55 }
 0x65a   : > { %6167 = vrot.lane.b32.xlu0 %v6166_v46, %s6635_s3 }
 0x65b   : > { %6147 = vrot.lane.b32.xlu1 %v6146_v49, %s6635_s3 }
 0x65c   : > { %6181 = vset.pattern.permute.xlu1 %v9746_v58 }
 0x65e   : > { %6177 = vrot.lane.b32.xlu0 %v8472_v52, %s6635_s3 }
 0x65f   : > { %6152 = vrot.lane.b32.xlu1 %v6151_v24, %s6635_s3 }
 0x662   : > { %6183 = vrot.lane.b32.xlu0 %v6151_v24, %s6636_s12 }
 0x663   : > { %6162 = vrot.lane.b32.xlu1 %v6141_v44, %s6636_s12 }
 0x666   : > { %6188 = vrot.lane.b32.xlu0 %v8481_v28, %s6635_s3 }
 0x667   : > { %6172 = vrot.lane.b32.xlu1 %v6146_v49, %s6636_s12 }
 0x66a   : > { %6193 = vrot.lane.b32.xlu0 %v6156_v23, %s6636_s12  ;;  %v8502_v23 = vld [vmem:[#allocation2 + $0x18] sm:$0xff] }
 0x66b   : > { %9753 = vst [vmem:[#allocation67_spill] sm:$0xff] %v8502_v23 }
 0x66e   : > { %6198 = vrot.lane.b32.xlu0 %v8489_v8, %s6635_s3 }
 0x672   : > { %6203 = vrot.lane.b32.xlu0 %v6166_v46, %s6636_s12 }
 0x69d   : > { %v3350_v12 = vpop.xlane.xlu0 %3349 }
 0x69e   : > { %v8496_v44 = vmax.f32 %v8493_v25, %v3350_v12  ;;  %v8526_v12 = vld [vmem:[#allocation2 + $0x10] sm:$0xff] }
 0x69f   : > { %9757 = vst [vmem:[#allocation51_spill] sm:$0xff] %v8526_v12 }
 0x6a0   : > { %9752 = vst [vmem:[#allocation66_spill] sm:$0xff] %v8496_v44  ;;  %4071 = vst.msk [vmem:[#allocation2 + $0x8] sm:$0xff] %vm3651_vm7, %v8496_v44 }
 0x6a5   : > { %v3354_v7 = vpop.xlane.xlu0 %3353 }
 0x6a6   : > { %v8505_v53 = vmax.f32 %v8502_v23, %v3354_v7 }
 0x6a8   : > { %9754 = vst [vmem:[#allocation68_spill] sm:$0xff] %v8505_v53  ;;  %4073 = vst.msk [vmem:[#allocation2 + $0x18] sm:$0xff] %vm3651_vm7, %v8505_v53 }
 0x6ab   : > { %v3348_v21 = vpop.xlane.xlu1 %3347 }
 0x6ac   : > { %v8514_v24 = vmax.f32 %v8511_v11, %v3348_v21  ;;  %v8545_v21 = vld [vmem:[#allocation2 + $0x38] sm:$0xff] }
 0x6ad   : > { %v3358_v57 = vpop.xlane.xlu0 %3357  ;;  %9761 = vst [vmem:[#allocation49_spill] sm:$0xff] %v8545_v21 }
 0x6ae   : > { %4070 = vst.msk [vmem:[#allocation2] sm:$0xff] %vm3651_vm7, %v8514_v24  ;;  %v8523_v37 = vmax.f32 %v8516_v55, %v3358_v57  ;;  %3445 = vperm.xlu1 %6181, %v8514_v24   ;;  %v8540_v57 = vld [vmem:[#allocation2 + $0x20] sm:$0xff] }
 0x6af   : > { %v3352_v7 = vpop.xlane.xlu1 %3351  ;;  %9759 = vst [vmem:[#allocation43_spill] sm:$0xff] %v8540_v57 }
 0x6b0   : > { %9756 = vst [vmem:[#allocation26_spill] sm:$0xff] %v8523_v37  ;;  %4075 = vst.msk [vmem:[#allocation2 + $0x28] sm:$0xff] %vm3651_vm7, %v8523_v37  ;;  %v8533_v46 = vmax.f32 %v8526_v12, %v3352_v7  ;;  %v8555_v12 = vld [vmem:[#allocation2 + $0x30] sm:$0xff]  ;;  %v8564_v7 = vld [vmem:[#allocation2 + $0x48] sm:$0xff] }
 0x6b1   : > { %9763 = vst [vmem:[#allocation59_spill] sm:$0xff] %v8555_v12  ;;  %9765 = vst [vmem:[#allocation63_spill] sm:$0xff] %v8564_v7 }
 0x6b2   : > { %9758 = vst [vmem:[#allocation45_spill] sm:$0xff] %v8533_v46  ;;  %4072 = vst.msk [vmem:[#allocation2 + $0x10] sm:$0xff] %vm3651_vm7, %v8533_v46  ;;  %3450 = vperm.xlu1 %6181, %v8496_v44  }
 0x6b3   : > { %v3356_v5 = vpop.xlane.xlu1 %3355 }
 0x6b4   : > { %v8543_v23 = vmax.f32 %v8540_v57, %v3356_v5  ;;  %v8575_v5 = vld [vmem:[#allocation2 + $0x40] sm:$0xff] }
 0x6b5   : > { %v3362_v55 = vpop.xlane.xlu0 %3361  ;;  %9767 = vst [vmem:[#allocation47_spill] sm:$0xff] %v8575_v5 }
 0x6b6   : > { %9760 = vst [vmem:[#allocation54_spill] sm:$0xff] %v8543_v23  ;;  %4074 = vst.msk [vmem:[#allocation2 + $0x20] sm:$0xff] %vm3651_vm7, %v8543_v23  ;;  %v8552_v49 = vmax.f32 %v8545_v21, %v3362_v55  ;;  %3455 = vperm.xlu1 %6181, %v8533_v46   ;;  %v8595_v21 = vld [vmem:[#allocation2 + $0x50] sm:$0xff] }
 0x6b7   : > { %v3360_v44 = vpop.xlane.xlu1 %3359  ;;  %9771 = vst [vmem:[#allocation50_spill] sm:$0xff] %v8595_v21 }
 0x6b8   : > { %9762 = vst [vmem:[#allocation71_spill] sm:$0xff] %v8552_v49  ;;  %4077 = vst.msk [vmem:[#allocation2 + $0x38] sm:$0xff] %vm3651_vm7, %v8552_v49  ;;  %v8562_v25 = vmax.f32 %v8555_v12, %v3360_v44  ;;  %v8584_v12 = vld [vmem:[#allocation2 + $0x58] sm:$0xff] }
 0x6b9   : > { %v3366_v57 = vpop.xlane.xlu0 %3365  ;;  %9769 = vst [vmem:[#allocation61_spill] sm:$0xff] %v8584_v12 }
 0x6ba   : > { %9764 = vst [vmem:[#allocation44_spill] sm:$0xff] %v8562_v25  ;;  %4076 = vst.msk [vmem:[#allocation2 + $0x30] sm:$0xff] %vm3651_vm7, %v8562_v25  ;;  %v8571_v46 = vmax.f32 %v8564_v7, %v3366_v57  ;;  %3460 = vperm.xlu1 %6181, %v8505_v53   ;;  %3475 = vperm.xlu0 %6138, %v8562_v25   ;;  %v8615_v7 = vld [vmem:[#allocation2 + $0x60] sm:$0xff] }
 0x6bb   : > { %v3364_v44 = vpop.xlane.xlu1 %3363  ;;  %9774 = vst [vmem:[#allocation70_spill] sm:$0xff] %v8615_v7 }
 0x6bc   : > { %9766 = vst [vmem:[#allocation53_spill] sm:$0xff] %v8571_v46  ;;  %4079 = vst.msk [vmem:[#allocation2 + $0x48] sm:$0xff] %vm3651_vm7, %v8571_v46  ;;  %v8582_v55 = vmax.f32 %v8575_v5, %v3364_v44  ;;  %v8604_v5 = vld [vmem:[#allocation2 + $0x68] sm:$0xff] }
 0x6bd   : > { %v3370_v57 = vpop.xlane.xlu0 %3369  ;;  %9772 = vst [vmem:[#allocation48_spill] sm:$0xff] %v8604_v5 }
 0x6be   : > { %9768 = vst [vmem:[#allocation46_spill] sm:$0xff] %v8582_v55  ;;  %4078 = vst.msk [vmem:[#allocation2 + $0x40] sm:$0xff] %vm3651_vm7, %v8582_v55  ;;  %v8591_v25 = vmax.f32 %v8584_v12, %v3370_v57  ;;  %3465 = vperm.xlu1 %6181, %v8543_v23   ;;  %3485 = vperm.xlu0 %6138, %v8582_v55  }
 0x6bf   : > { %v3368_v44 = vpop.xlane.xlu1 %3367 }
 0x6c0   : > { %9770 = vst [vmem:[#allocation56_spill] sm:$0xff] %v8591_v25  ;;  %4081 = vst.msk [vmem:[#allocation2 + $0x58] sm:$0xff] %vm3651_vm7, %v8591_v25  ;;  %v8602_v53 = vmax.f32 %v8595_v21, %v3368_v44  ;;  %v8624_v21 = vld [vmem:[#allocation2 + $0x78] sm:$0xff] }
 0x6c1   : > { %v3374_v57 = vpop.xlane.xlu0 %3373  ;;  %9775 = vst [vmem:[#allocation55_spill] sm:$0xff] %v8624_v21 }
 0x6c2   : > { %4080 = vst.msk [vmem:[#allocation2 + $0x50] sm:$0xff] %vm3651_vm7, %v8602_v53  ;;  %v8611_v55 = vmax.f32 %v8604_v5, %v3374_v57  ;;  %3470 = vperm.xlu1 %6181, %v8523_v37   ;;  %3490 = vperm.xlu0 %6138, %v8571_v46  }
 0x6c3   : > { %v3372_v44 = vpop.xlane.xlu1 %3371 }
 0x6c4   : > { %9773 = vst [vmem:[#allocation65_spill] sm:$0xff] %v8611_v55  ;;  %4083 = vst.msk [vmem:[#allocation2 + $0x68] sm:$0xff] %vm3651_vm7, %v8611_v55  ;;  %v8622_v23 = vmax.f32 %v8615_v7, %v3372_v44  ;;  %v8637_v44 = vld [vmem:[#allocation2 + $0x70] sm:$0xff] }
 0x6c5   : > { %v3378_v57 = vpop.xlane.xlu0 %3377 }
 0x6c6   : > { %4082 = vst.msk [vmem:[#allocation2 + $0x60] sm:$0xff] %vm3651_vm7, %v8622_v23  ;;  %v8631_v46 = vmax.f32 %v8624_v21, %v3378_v57  ;;  %6208 = vrot.lane.b32.xlu1 %v8472_v52, %s6636_s12  ;;  %6218 = vrot.lane.b32.xlu0 %v8489_v8, %s6636_s12 }
 0x6c7   : > { %v3376_v12 = vpop.xlane.xlu1 %3375 }
 0x6c8   : > { %4085 = vst.msk [vmem:[#allocation2 + $0x78] sm:$0xff] %vm3651_vm7, %v8631_v46  ;;  %v8644_v37 = vmax.f32 %v8637_v44, %v3376_v12 }
 0x6c9   : > { %v6143_v57 = vpop.permute.xlu0 %6142 }
 0x6ca   : > { %4084 = vst.msk [vmem:[#allocation2 + $0x70] sm:$0xff] %vm3651_vm7, %v8644_v37  ;;  %3480 = vperm.xlu1 %6181, %v8552_v49   ;;  %3505 = vperm.xlu0 %6138, %v8622_v23   ;;  %v6144_v8 = vunpack.i.l.bf16 %v6143_v57  ;;  %v6145_v5 = vunpack.i.h.bf16 %v6143_v57 }
 0x6cb   : > { %v8652_v52 = vpop.permute.xlu1 %2799 }
 0x6cc   : > { %9776 = vst [vmem:[#allocation52_spill] sm:$0xff] %v8652_v52  ;;  %5845 = vmatprep.subr.mxu0 %v6144_v8 }
 0x6cd   : > { %v6158_v21 = vpop.permute.xlu0 %6157  ;;  %5846 = vmatpush3.msra.mxu0 %v6144_v8 }
 0x6ce   : > { %6213 = vrot.lane.b32.xlu1 %v8481_v28, %s6636_s12  ;;  %3515 = vperm.xlu0 %6138, %v8644_v37  }
 0x6cf   : > { %v8657_v12 = vpop.permute.xlu1 %2804  ;;  %5847 = vmatprep.subr.mxu0 %v6145_v5 }
 0x6d0   : > { %9777 = vst [vmem:[#allocation58_spill] sm:$0xff] %v8657_v12  ;;  %5848 = vmatpush3.msra.mxu0 %v6145_v5 }
 0x6d1   : > { %v6168_v7 = vpop.permute.xlu0 %6167 }
 0x6d2   : > { %3495 = vperm.xlu1 %6181, %v8602_v53   ;;  %6222 = vset.pattern.permute.xlu0 %v9696_v45 }
 0x6d3   : > { %2809 = vperm.xlu0 %6222, %v8312_v14   ;;  %v8662_v57 = vpop.permute.xlu1 %2814 }
 0x6d4   : > { %9778 = vst [vmem:[#allocation57_spill] sm:$0xff] %v8662_v57 }
 0x6d5   : > { %v8665_v49 = vpop.permute.xlu0 %6177 }
 0x6d6   : > { %3500 = vperm.xlu1 %6181, %v8591_v25  }
 0x6d7   : > { %2819 = vperm.xlu0 %6222, %v8309_v1   ;;  %v6148_v28 = vpop.permute.xlu1 %6147 }
 0x6d8   : > { %v6149_v52 = vunpack.i.l.bf16 %v6148_v28  ;;  %v6150_v8 = vunpack.i.h.bf16 %v6148_v28  ;;  %v6159_v28 = vunpack.i.l.bf16 %v6158_v21 }
 0x6d9   : > { %v6184_v14 = vpop.permute.xlu0 %6183 }
 0x6da   : > { %3510 = vperm.xlu1 %6181, %v8611_v55   ;;  %5849 = vmatprep.subr.mxu0 %v6149_v52 }
 0x6db   : > { %2834 = vperm.xlu0 %6222, %v8343_v60   ;;  %v6153_v5 = vpop.permute.xlu1 %6152  ;;  %5850 = vmatpush3.msra.mxu0 %v6149_v52  ;;  %v6160_v52 = vunpack.i.h.bf16 %v6158_v21 }
 0x6dc   : > { %v6154_v12 = vunpack.i.l.bf16 %v6153_v5  ;;  %5851 = vmatprep.subr.mxu0 %v6150_v8  ;;  %v6155_v57 = vunpack.i.h.bf16 %v6153_v5 }
 0x6dd   : > { %5852 = vmatpush3.msra.mxu0 %v6150_v8  ;;  %v6189_v60 = vpop.permute.xlu0 %6188 }
 0x6de   : > { %3520 = vperm.xlu1 %6181, %v8631_v46   ;;  %5853 = vmatprep.subr.mxu0 %v6154_v12 }
 0x6df   : > { %2844 = vperm.xlu0 %6222, %v8351_v2   ;;  %v6163_v1 = vpop.permute.xlu1 %6162  ;;  %5854 = vmatpush3.msra.mxu0 %v6154_v12  ;;  %v6169_v2 = vunpack.i.l.bf16 %v6168_v7 }
 0x6e0   : > { %v6164_v25 = vunpack.i.l.bf16 %v6163_v1  ;;  %5855 = vmatprep.subr.mxu0 %v6155_v57  ;;  %v6165_v55 = vunpack.i.h.bf16 %v6163_v1 }
 0x6e1   : > { %5856 = vmatpush3.msra.mxu0 %v6155_v57  ;;  %v6194_v21 = vpop.permute.xlu0 %6193  ;;  %v6191_v57 = vunpack.i.h.bf16 %v6189_v60 }
 0x6e2   : > { %6223 = vset.pattern.permute.xlu1 %v9696_v45  ;;  %5857 = vmatprep.subr.mxu0 %v6159_v28  ;;  %v6170_v45 = vunpack.i.h.bf16 %v6168_v7  ;;  %v6186_v7 = vunpack.i.h.bf16 %v6184_v14  ;;  %v6196_v1 = vunpack.i.h.bf16 %v6194_v21 }
 0x6e3   : > { %5901 = vmatprep.subr.mxu1 %v6164_v25  ;;  %2824 = vperm.xlu1 %6223, %v8332_v4   ;;  %v6173_v8 = vpop.permute.xlu1 %6172  ;;  %v6179_v4 = vunpack.i.l.bf16 %v8665_v49 }
 0x6e4   : > { %2854 = vperm.xlu0 %6222, %v8360_v0   ;;  %v6174_v5 = vunpack.i.l.bf16 %v6173_v8  ;;  %5858 = vmatpush3.msra.mxu0 %v6159_v28  ;;  %v6175_v12 = vunpack.i.h.bf16 %v6173_v8  ;;  %v6185_v0 = vunpack.i.l.bf16 %v6184_v14 }
 0x6e5   : > { %5902 = vmatpush3.msra.mxu1 %v6164_v25  ;;  %5859 = vmatprep.subr.mxu0 %v6160_v52  ;;  %v6180_v25 = vunpack.i.h.bf16 %v8665_v49 }
 0x6e6   : > { %5903 = vmatprep.subr.mxu1 %v6165_v55  ;;  %5860 = vmatpush3.msra.mxu0 %v6160_v52 }
 0x6e7   : > { %5904 = vmatpush3.msra.mxu1 %v6165_v55  ;;  %5861 = vmatprep.subr.mxu0 %v6169_v2  ;;  %v6190_v55 = vunpack.i.l.bf16 %v6189_v60 }
 0x6e8   : > { %5905 = vmatprep.subr.mxu1 %v6174_v5  ;;  %2829 = vperm.xlu1 %6223, %v8318_v62   ;;  %v6195_v62 = vunpack.i.l.bf16 %v6194_v21 }
 0x6e9   : > { %2864 = vperm.xlu0 %6222, %v8369_v19   ;;  %5862 = vmatpush3.msra.mxu0 %v6169_v2  ;;  %v6199_v19 = vpop.permute.xlu0 %6198 }
 0x6ea   : > { %5906 = vmatpush3.msra.mxu1 %v6174_v5  ;;  %5863 = vmatprep.subr.mxu0 %v6170_v45  ;;  %v6200_v49 = vunpack.i.l.bf16 %v6199_v19  ;;  %v6201_v28 = vunpack.i.h.bf16 %v6199_v19 }
 0x6eb   : > { %5907 = vmatprep.subr.mxu1 %v6175_v12  ;;  %5864 = vmatpush3.msra.mxu0 %v6170_v45 }
 0x6ec   : > { %5908 = vmatpush3.msra.mxu1 %v6175_v12  ;;  %5865 = vmatprep.subr.mxu0 %v6179_v4 }
 0x6ed   : > { %5909 = vmatprep.subr.mxu1 %v6185_v0  ;;  %2839 = vperm.xlu1 %6223, %v8328_v9   ;;  %v6204_v9 = vpop.permute.xlu0 %6203 }
 0x6ee   : > { %2874 = vperm.xlu0 %6222, %v8375_v15   ;;  %5866 = vmatpush3.msra.mxu0 %v6179_v4  ;;  %v6205_v14 = vunpack.i.l.bf16 %v6204_v9  ;;  %v6206_v15 = vunpack.i.h.bf16 %v6204_v9 }
 0x6ef   : > { %5910 = vmatpush3.msra.mxu1 %v6185_v0  ;;  %5867 = vmatprep.subr.mxu0 %v6180_v25 }
 0x6f0   : > { %5911 = vmatprep.subr.mxu1 %v6186_v7  ;;  %5868 = vmatpush3.msra.mxu0 %v6180_v25 }
 0x6f1   : > { %5912 = vmatpush3.msra.mxu1 %v6186_v7  ;;  %5869 = vmatprep.subr.mxu0 %v6190_v55 }
 0x6f2   : > { %5913 = vmatprep.subr.mxu1 %v6195_v62  ;;  %2849 = vperm.xlu1 %6223, %v8336_v38  }
 0x6f3   : > { %5870 = vmatpush3.msra.mxu0 %v6190_v55  ;;  %5914 = vmatpush3.msra.mxu1 %v6195_v62 }
 0x6f4   : > { %5871 = vmatprep.subr.mxu0 %v6191_v57  ;;  %5915 = vmatprep.subr.mxu1 %v6196_v1 }
 0x6f5   : > { %5872 = vmatpush3.msra.mxu0 %v6191_v57  ;;  %5916 = vmatpush3.msra.mxu1 %v6196_v1 }
 0x6f6   : > { %5873 = vmatprep.subr.mxu0 %v6200_v49  ;;  %2859 = vperm.xlu1 %6223, %v8347_v20  }
 0x6f7   : > { %5874 = vmatpush3.msra.mxu0 %v6200_v49  ;;  %5917 = vmatprep.subr.mxu1 %v6205_v14 }
 0x6f8   : > { %5875 = vmatprep.subr.mxu0 %v6201_v28  ;;  %5918 = vmatpush3.msra.mxu1 %v6205_v14 }
 0x6f9   : > { %5876 = vmatpush3.msra.mxu0 %v6201_v28  ;;  %5919 = vmatprep.subr.mxu1 %v6206_v15 }
 0x6fa   : > { %5878 = vmatmul.mubr.f32.vlgmr.msra.gmra.mxu0 %v8209_v18  ;;  %2869 = vperm.xlu1 %6223, %v8355_v63  }
 0x6fb   : > { %5880 = vmatprep.mubr.f32.mxu0 %v8218_v42  ;;  %5920 = vmatpush3.msra.mxu1 %v6206_v15 }
 0x6fc   : > { %6224 = vset.pattern.permute.xlu0 %v9746_v58 }
 0x6fe   : > { %5881 = vmatmul.mubr.f32.gmra.mxu0 %v8226_v54  ;;  %6225 = vset.pattern.permute.xlu1 %v9746_v58 }
 0x6ff   : > { %5883 = vmatprep.mubr.f32.mxu0 %v8214_v27 }
 0x702   : > { %5884 = vmatmul.mubr.f32.gmra.mxu0 %v8233_v47 }
 0x703   : > { %5886 = vmatprep.mubr.f32.mxu0 %v8222_v59 }
 0x706   : > { %5887 = vmatmul.mubr.f32.gmra.mxu0 %v8240_v13 }
 0x707   : > { %5889 = vmatprep.mubr.f32.mxu0 %v8229_v35 }
 0x70a   : > { %5890 = vmatmul.mubr.f32.gmra.mxu0 %v8246_v17 }
 0x70b   : > { %5892 = vmatprep.mubr.f32.mxu0 %v8236_v16 }
 0x70e   : > { %5893 = vmatmul.mubr.f32.gmra.mxu0 %v8252_v31 }
 0x70f   : > { %5895 = vmatprep.mubr.f32.mxu0 %v8243_v61 }
 0x712   : > { %5896 = vmatmul.mubr.f32.gmra.mxu0 %v8255_v56 }
 0x713   : > { %5898 = vmatprep.mubr.f32.mxu0 %v8249_v22 }
 0x716   : > { %5899 = vmatmul.mubr.f32.gmra.mxu0 %v8258_v51 }
 0x729   : > { %v3446_v18 = vpop.permute.xlu1 %3445 }
 0x72a   : > { %v3523_v27 = vsub.f32 %v8395_v36, %v3446_v18 }
 0x72c   : > { %v3539_v42 = vmul.f32 1.442695, %v3523_v27 }
 0x72d   : > { %v3451_v59 = vpop.permute.xlu1 %3450 }
 0x72e   : > { %6418 = vpow2.f32 %v3539_v42  ;;  %v3524_v22 = vsub.f32 %v8380_v40, %v3451_v59 }
 0x730   : > { %v3541_v38 = vmul.f32 1.442695, %v3524_v22 }
 0x731   : > { %v3456_v54 = vpop.permute.xlu1 %3455 }
 0x732   : > { %v3525_v31 = vsub.f32 %v8405_v41, %v3456_v54  ;;  %6420 = vpow2.f32 %v3541_v38 }
 0x734   : > { %v3543_v63 = vmul.f32 1.442695, %v3525_v31 }
 0x735   : > { %v3461_v35 = vpop.permute.xlu1 %3460  ;;  %v3476_v47 = vpop.permute.xlu0 %3475 }
 0x736   : > { %v3526_v56 = vsub.f32 %v8388_v3, %v3461_v35  ;;  %6422 = vpow2.f32 %v3543_v63  ;;  %v3529_v40 = vsub.f32 %v8421_v29, %v3476_v47 }
 0x738   : > { %v3545_v52 = vmul.f32 1.442695, %v3526_v56  ;;  %v3551_v4 = vmul.f32 1.442695, %v3529_v40 }
 0x739   : > { %v3466_v16 = vpop.permute.xlu1 %3465  ;;  %v3486_v17 = vpop.permute.xlu0 %3485 }
 0x73a   : > { %v3527_v36 = vsub.f32 %v8411_v48, %v3466_v16  ;;  %6424 = vpow2.f32 %v3545_v52  ;;  %v3531_v0 = vsub.f32 %v8431_v34, %v3486_v17 }
 0x73b   : > { %v8702_v13 = vpop.eup %6418 }
 0x73c   : > { %5933 = vmatprep.mubr.f32.mxu1 %v8702_v13  ;;  %v3547_v41 = vmul.f32 1.442695, %v3527_v36  ;;  %v3555_v55 = vmul.f32 1.442695, %v3531_v0 }
 0x73d   : > { %v3471_v61 = vpop.permute.xlu1 %3470  ;;  %v3491_v20 = vpop.permute.xlu0 %3490 }
 0x73e   : > { %v3528_v5 = vsub.f32 %v8400_v39, %v3471_v61  ;;  %6426 = vpow2.f32 %v3547_v41  ;;  %v3532_v29 = vsub.f32 %v8424_v33, %v3491_v20 }
 0x73f   : > { %v8716_v49 = vpop.eup %6420 }
 0x740   : > { %v3549_v12 = vmul.f32 1.442695, %v3528_v5  ;;  %v3557_v34 = vmul.f32 1.442695, %v3532_v29 }
 0x741   : > { %v6209_v51 = vpop.permute.xlu1 %6208  ;;  %v6219_v3 = vpop.permute.xlu0 %6218 }
 0x742   : > { %v6211_v58 = vunpack.i.h.bf16 %v6209_v51  ;;  %v6210_v60 = vunpack.i.l.bf16 %v6209_v51  ;;  %v6220_v39 = vunpack.i.l.bf16 %v6219_v3  ;;  %6428 = vpow2.f32 %v3549_v12 }
 0x743   : > { %v6221_v7 = vunpack.i.h.bf16 %v6219_v3  ;;  %6430 = vpow2.f32 %v3551_v4  ;;  %v8719_v14 = vpop.eup %6422 }
 0x744   : > { %5921 = vmatprep.subr.mxu1 %v6210_v60 }
 0x745   : > { %v3481_v8 = vpop.permute.xlu1 %3480  ;;  %5922 = vmatpush3.msra.mxu1 %v6210_v60  ;;  %v3506_v62 = vpop.permute.xlu0 %3505 }
 0x746   : > { %5923 = vmatprep.subr.mxu1 %v6211_v58  ;;  %v3530_v48 = vsub.f32 %v8416_v43, %v3481_v8  ;;  %v3535_v33 = vsub.f32 %v8448_v6, %v3506_v62 }
 0x747   : > { %5924 = vmatpush3.msra.mxu1 %v6211_v58  ;;  %v8723_v28 = vpop.eup %6424 }
 0x748   : > { %v3553_v19 = vmul.f32 1.442695, %v3530_v48  ;;  %v3563_v27 = vmul.f32 1.442695, %v3535_v33  ;;  %v9784_v33 = vld [vmem:[#allocation46_spill] sm:$0xff] }
 0x749   : > { %v6214_v2 = vpop.permute.xlu1 %6213  ;;  %v3516_v15 = vpop.permute.xlu0 %3515 }
 0x74a   : > { %v6216_v45 = vunpack.i.h.bf16 %v6214_v2  ;;  %v6215_v21 = vunpack.i.l.bf16 %v6214_v2  ;;  %6432 = vpow2.f32 %v3553_v19  ;;  %v3537_v42 = vsub.f32 %v8456_v50, %v3516_v15 }
 0x74b   : > { %6434 = vpow2.f32 %v3555_v55  ;;  %v8727_v6 = vpop.eup %6426  ;;  %v9780_v55 = vld [vmem:[#allocation64_spill] sm:$0xff] }
 0x74c   : > { %5925 = vmatprep.subr.mxu1 %v6215_v21  ;;  %6436 = vpow2.f32 %v3557_v34  ;;  %v3567_v16 = vmul.f32 1.442695, %v3537_v42 }
 0x74d   : > { %v3496_v25 = vpop.permute.xlu1 %3495  ;;  %5926 = vmatpush3.msra.mxu1 %v6215_v21 }
 0x74e   : > { %5927 = vmatprep.subr.mxu1 %v6216_v45  ;;  %v3533_v43 = vsub.f32 %v8440_v10, %v3496_v25  ;;  %v8756_v0 = vpop.permute.xlu0 %2809 }
 0x74f   : > { %5928 = vmatpush3.msra.mxu1 %v6216_v45  ;;  %v8732_v47 = vpop.eup %6428 }
 0x750   : > { %5929 = vmatprep.subr.mxu1 %v6220_v39  ;;  %v3559_v9 = vmul.f32 1.442695, %v3533_v43  ;;  %v9781_v43 = vld [vmem:[#allocation66_spill] sm:$0xff] }
 0x751   : > { %v3501_v57 = vpop.permute.xlu1 %3500  ;;  %5930 = vmatpush3.msra.mxu1 %v6220_v39 }
 0x752   : > { %v3534_v1 = vsub.f32 %v8435_v30, %v3501_v57  ;;  %5931 = vmatprep.subr.mxu1 %v6221_v7  ;;  %6438 = vpow2.f32 %v3559_v9  ;;  %v8759_v39 = vpop.permute.xlu0 %2819  ;;  %v9782_v57 = vsub.f32 %v9780_v55, %v9781_v43  ;;  %v9807_v55 = vld [vmem:[#allocation52_spill] sm:$0xff] }
 0x753   : > { %5932 = vmatpush3.msra.mxu1 %v6221_v7  ;;  %v9779_v7 = vsub.f32 %v8511_v11, %v8514_v24  ;;  %v9787_v11 = vld [vmem:[#allocation45_spill] sm:$0xff] }
 0x754   : > { %5934 = vmatmul.mubr.f32.vlgmr.msra.gmra.mxu1 %v8716_v49  ;;  %v3561_v30 = vmul.f32 1.442695, %v3534_v1  ;;  %v3413_v34 = vmul.f32 1.442695, %v9782_v57 }
 0x755   : > { %v3511_v10 = vpop.permute.xlu1 %3510  ;;  %5936 = vmatprep.mubr.f32.mxu1 %v8719_v14  ;;  %v3411_v62 = vmul.f32 1.442695, %v9779_v7  ;;  %v2781_v7 = vld [vmem:[#allocation4] sm:$0xff] }
 0x756   : > { %v3536_v18 = vsub.f32 %v8444_v32, %v3511_v10  ;;  %6440 = vpow2.f32 %v3561_v30  ;;  %v6431_v32 = vpop.eup %6430  ;;  %v8763_v29 = vpop.permute.xlu0 %2834  ;;  %v9786_v10 = vld [vmem:[#allocation51_spill] sm:$0xff]  ;;  %v2877_v43 = vmul.f32 %v9807_v55, %v2781_v7 }
 0x757   : > { %6442 = vpow2.f32 %v3563_v27  ;;  %v6433_v17 = vpop.eup %6432  ;;  %v9788_v24 = vsub.f32 %v9786_v10, %v9787_v11  ;;  %v9809_v10 = vld [vmem:[#allocation71_spill] sm:$0xff] }
 0x758   : > { %5937 = vmatmul.mubr.f32.gmra.mxu1 %v8723_v28  ;;  %v3565_v54 = vmul.f32 1.442695, %v3536_v18  ;;  %v6435_v61 = vpop.eup %6434  ;;  %v9789_v18 = vld [vmem:[#allocation50_spill] sm:$0xff] }
 0x759   : > { %v3521_v59 = vpop.permute.xlu1 %3520  ;;  %5939 = vmatprep.mubr.f32.mxu1 %v8727_v6  ;;  %v6437_v22 = vpop.eup %6436  ;;  %v9790_v27 = vsub.f32 %v9789_v18, %v8602_v53  ;;  %v9796_v53 = vld [vmem:[#allocation43_spill] sm:$0xff] }
 0x75a   : > { %v3538_v35 = vsub.f32 %v8452_v26, %v3521_v59  ;;  %6444 = vpow2.f32 %v3565_v54  ;;  %v8770_v19 = vpop.permute.xlu0 %2844  ;;  %v9791_v54 = vld [vmem:[#allocation67_spill] sm:$0xff] }
 0x75b   : > { %6446 = vpow2.f32 %v3567_v16  ;;  %v3431_v42 = vmul.f32 1.442695, %v9790_v27 }
 0x75c   : > { %5940 = vmatmul.mubr.f32.gmra.mxu1 %v8732_v47  ;;  %v3569_v50 = vmul.f32 1.442695, %v3538_v35  ;;  %v9792_v35 = vld [vmem:[#allocation68_spill] sm:$0xff] }
 0x75d   : > { %5942 = vmatprep.mubr.f32.mxu1 %v6431_v32 }
 0x75e   : > { %6448 = vpow2.f32 %v3569_v50  ;;  %v8761_v25 = vpop.permute.xlu1 %2824 }
 0x75f   : > { %v6439_v31 = vpop.eup %6438  ;;  %6450 = vpow2.f32 %v3411_v62  ;;  %v8785_v30 = vpop.permute.xlu0 %2854 }
 0x760   : > { %5943 = vmatmul.mubr.f32.gmra.mxu1 %v6433_v17  ;;  %6452 = vpow2.f32 %v3413_v34 }
 0x761   : > { %5945 = vmatprep.mubr.f32.mxu1 %v6435_v61 }
 0x763   : > { %v6441_v26 = vpop.eup %6440 }
 0x764   : > { %5946 = vmatmul.mubr.f32.gmra.mxu1 %v6437_v22  ;;  %v6443_v56 = vpop.eup %6442 }
 0x765   : > { %5948 = vmatprep.mubr.f32.mxu1 %v6439_v31 }
 0x767   : > { %v6445_v51 = vpop.eup %6444 }
 0x768   : > { %5949 = vmatmul.mubr.f32.gmra.mxu1 %v6441_v26  ;;  %v6447_v38 = vpop.eup %6446 }
 0x769   : > { %5951 = vmatprep.mubr.f32.mxu1 %v6443_v56 }
 0x76b   : > { %v6449_v20 = vpop.eup %6448 }
 0x76c   : > { %5952 = vmatmul.mubr.f32.gmra.mxu1 %v6445_v51 }
 0x76d   : > { %5954 = vmatprep.mubr.f32.mxu1 %v6447_v38 }
 0x770   : > { %5955 = vmatmul.mubr.f32.gmra.mxu1 %v6449_v20 }
 0x7ba   : > { %v5879_v63 = vpop.f32.mrf.mxu0 }
 0x7bb   : > { %3104 = vrot.lane.b32.xlu0 %v5879_v63, %s6637_s16  ;;  %v8812_v63 = vpop.eup %6450 }
 0x7bc   : > { %v3007_v36 = vpop.f32.mrf.mxu0 }
 0x7bd   : > { %3102 = vrot.lane.b32.xlu1 %v3007_v36, %s6637_s16  ;;  %v9800_v36 = vld [vmem:[#allocation69_spill] sm:$0xff] }
 0x7be   : > { %v5882_v58 = vpop.f32.mrf.mxu0 }
 0x7bf   : > { %3108 = vrot.lane.b32.xlu0 %v5882_v58, %s6637_s16  ;;  %v9801_v58 = vld [vmem:[#allocation26_spill] sm:$0xff] }
 0x7c0   : > { %v3017_v60 = vpop.f32.mrf.mxu0 }
 0x7c1   : > { %3106 = vrot.lane.b32.xlu1 %v3017_v60, %s6637_s16  ;;  %v9802_v60 = vsub.f32 %v9800_v36, %v9801_v58  ;;  %v2785_v58 = vld [vmem:[#allocation4 + $0x20] sm:$0xff] }
 0x7c2   : > { %v5885_v52 = vpop.f32.mrf.mxu0 }
 0x7c3   : > { %3112 = vrot.lane.b32.xlu0 %v5885_v52, %s6637_s16  ;;  %v3421_v52 = vmul.f32 1.442695, %v9802_v60 }
 0x7c4   : > { %v3027_v8 = vpop.f32.mrf.mxu0 }
 0x7c5   : > { %3110 = vrot.lane.b32.xlu1 %v3027_v8, %s6637_s16  ;;  %v8820_v8 = vpop.eup %6452 }
 0x7c6   : > { %v5888_v5 = vpop.f32.mrf.mxu0 }
 0x7c7   : > { %3116 = vrot.lane.b32.xlu0 %v5888_v5, %s6637_s16 }
 0x7c8   : > { %v3037_v40 = vpop.f32.mrf.mxu0 }
 0x7c9   : > { %3114 = vrot.lane.b32.xlu1 %v3037_v40, %s6637_s16 }
 0x7ca   : > { %v5891_v41 = vpop.f32.mrf.mxu0 }
 0x7cb   : > { %3120 = vrot.lane.b32.xlu0 %v5891_v41, %s6637_s16 }
 0x7cc   : > { %v3047_v3 = vpop.f32.mrf.mxu0 }
 0x7cd   : > { %3118 = vrot.lane.b32.xlu1 %v3047_v3, %s6637_s16  ;;  %v9803_v3 = vld [vmem:[#allocation59_spill] sm:$0xff] }
 0x7ce   : > { %v5894_v2 = vpop.f32.mrf.mxu0 }
 0x7cf   : > { %3124 = vrot.lane.b32.xlu0 %v5894_v2, %s6637_s16  ;;  %v9804_v2 = vld [vmem:[#allocation44_spill] sm:$0xff] }
 0x7d0   : > { %v3057_v12 = vpop.f32.mrf.mxu0 }
 0x7d1   : > { %3122 = vrot.lane.b32.xlu1 %v3057_v12, %s6637_s16  ;;  %v9805_v12 = vsub.f32 %v9803_v3, %v9804_v2  ;;  %v2788_v2 = vld [vmem:[#allocation4 + $0x38] sm:$0xff] }
 0x7d2   : > { %v5897_v48 = vpop.f32.mrf.mxu0 }
 0x7d3   : > { %3128 = vrot.lane.b32.xlu0 %v5897_v48, %s6637_s16  ;;  %v3423_v48 = vmul.f32 1.442695, %v9805_v12 }
 0x7d4   : > { %v3067_v45 = vpop.f32.mrf.mxu0 }
 0x7d5   : > { %3126 = vrot.lane.b32.xlu1 %v3067_v45, %s6637_s16  ;;  %v9806_v45 = vld [vmem:[#allocation58_spill] sm:$0xff] }
 0x7d6   : > { %v5900_v21 = vpop.f32.mrf.mxu0 }
 0x7d7   : > { %3132 = vrot.lane.b32.xlu0 %v5900_v21, %s6637_s16 }
 0x7d8   : > { %v3077_v4 = vpop.f32.mrf.mxu0 }
 0x7d9   : > { %3130 = vrot.lane.b32.xlu1 %v3077_v4, %s6637_s16 }
 0x7f6   : > { %3605 = vadd.xlane.f32.xlu0 %v8716_v49  ;;  %v9783_v49 = vld [vmem:[#allocation47_spill] sm:$0xff] }
 0x7f7   : > { %v9785_v9 = vsub.f32 %v9783_v49, %v9784_v33  ;;  %v2784_v49 = vld [vmem:[#allocation4 + $0x18] sm:$0xff] }
 0x7fa   : > { %3607 = vadd.xlane.f32.xlu0 %v8719_v14  ;;  %v3427_v14 = vmul.f32 1.442695, %v9785_v9 }
 0x7fc   : > { %6454 = vpow2.f32 %v3427_v14  ;;  %v9808_v14 = vld [vmem:[#allocation49_spill] sm:$0xff] }
 0x7fd   : > { %3603 = vadd.xlane.f32.xlu1 %v8702_v13  ;;  %v8765_v13 = vpop.permute.xlu1 %2829  ;;  %v9810_v11 = vsub.f32 %v9808_v14, %v9809_v10  ;;  %v2790_v14 = vld [vmem:[#allocation4 + $0x48] sm:$0xff] }
 0x7fe   : > { %3611 = vadd.xlane.f32.xlu0 %v8727_v6 }
 0x801   : > { %3609 = vadd.xlane.f32.xlu1 %v8723_v28  ;;  %v8775_v1 = vpop.permute.xlu1 %2839  ;;  %v3415_v28 = vmul.f32 1.442695, %v9788_v24  ;;  %v3425_v24 = vmul.f32 1.442695, %v9810_v11  ;;  %v9818_v11 = vld [vmem:[#allocation48_spill] sm:$0xff] }
 0x802   : > { %3615 = vadd.xlane.f32.xlu0 %v6431_v32  ;;  %v9794_v32 = vld [vmem:[#allocation70_spill] sm:$0xff] }
 0x803   : > { %6456 = vpow2.f32 %v3415_v28  ;;  %v9795_v50 = vsub.f32 %v9794_v32, %v8622_v23  ;;  %v9811_v28 = vld [vmem:[#allocation57_spill] sm:$0xff] }
 0x804   : > { %6458 = vpow2.f32 %v3431_v42  ;;  %v2880_v18 = vmul.f32 %v9811_v28, %v2784_v49 }
 0x805   : > { %3613 = vadd.xlane.f32.xlu1 %v8732_v47  ;;  %v8790_v6 = vpop.permute.xlu1 %2849  ;;  %v9793_v47 = vsub.f32 %v9791_v54, %v9792_v35  ;;  %v2783_v54 = vld [vmem:[#allocation4 + $0x10] sm:$0xff] }
 0x806   : > { %3619 = vadd.xlane.f32.xlu0 %v6435_v61  ;;  %v8800_v61 = vpop.permute.xlu0 %2864 }
 0x807   : > { %v3417_v16 = vmul.f32 1.442695, %v9793_v47  ;;  %v2879_v47 = vmul.f32 %v8756_v0, %v2783_v54 }
 0x809   : > { %3617 = vadd.xlane.f32.xlu1 %v6433_v17  ;;  %v3435_v17 = vmul.f32 1.442695, %v9795_v50  ;;  %6460 = vpow2.f32 %v3417_v16  ;;  %v2786_v50 = vld [vmem:[#allocation4 + $0x28] sm:$0xff] }
 0x80a   : > { %3623 = vadd.xlane.f32.xlu0 %v6439_v31  ;;  %v9797_v31 = vld [vmem:[#allocation54_spill] sm:$0xff]  ;;  %v8822_v5 = vpop.permute.xlu0 %2874 }
 0x80b   : > { %6462 = vpow2.f32 %v3435_v17 }
 0x80d   : > { %3621 = vadd.xlane.f32.xlu1 %v6437_v22 }
 0x80e   : > { %3627 = vadd.xlane.f32.xlu0 %v6443_v56 }
 0x811   : > { %3625 = vadd.xlane.f32.xlu1 %v6441_v26  ;;  %v9798_v26 = vsub.f32 %v9796_v53, %v9797_v31  ;;  %v9812_v31 = vld [vmem:[#allocation63_spill] sm:$0xff] }
 0x812   : > { %3631 = vadd.xlane.f32.xlu0 %v6447_v38  ;;  %v9799_v38 = vsub.f32 %v8637_v44, %v8644_v37  ;;  %v8825_v37 = vpop.eup %6454  ;;  %v2782_v44 = vld [vmem:[#allocation4 + $0x8] sm:$0xff] }
 0x813   : > { %v3419_v56 = vmul.f32 1.442695, %v9798_v26  ;;  %v2878_v21 = vmul.f32 %v9806_v45, %v2782_v44  ;;  %v8836_v4 = vpop.eup %6456  ;;  %v9813_v26 = vld [vmem:[#allocation53_spill] sm:$0xff]  ;;  %v9816_v45 = vld [vmem:[#allocation56_spill] sm:$0xff] }
 0x814   : > { %v8780_v15 = vpop.f32.mrf.mxu1  ;;  %v8840_v34 = vpop.eup %6458 }
 0x815   : > { %3629 = vadd.xlane.f32.xlu1 %v6445_v51  ;;  %v8807_v51 = vpop.permute.xlu1 %2859  ;;  %6464 = vpow2.f32 %v3419_v56  ;;  %v9814_v56 = vsub.f32 %v9812_v31, %v9813_v26  ;;  %v9821_v26 = vld [vmem:[#allocation55_spill] sm:$0xff] }
 0x816   : > { %v8792_v59 = vpop.f32.mrf.mxu1  ;;  %v8850_v42 = vpop.eup %6460 }
 0x818   : > { %v8802_v22 = vpop.f32.mrf.mxu1  ;;  %v8855_v32 = vpop.eup %6462 }
 0x819   : > { %3633 = vadd.xlane.f32.xlu1 %v6449_v20  ;;  %v3439_v20 = vmul.f32 1.442695, %v9799_v38  ;;  %v8827_v40 = vpop.permute.xlu1 %2869  ;;  %v3429_v38 = vmul.f32 1.442695, %v9814_v56  ;;  %v9822_v56 = vsub.f32 %v9821_v26, %v8631_v46  ;;  %v2794_v46 = vld [vmem:[#allocation4 + $0x68] sm:$0xff]  ;;  %v3574_v26 = vld [vmem:[#allocation3 + $0x18] sm:$0xff] }
 0x81a   : > { %v8814_v23 = vpop.f32.mrf.mxu1 }
 0x81b   : > { %6466 = vpow2.f32 %v3439_v20  ;;  %v2882_v20 = vmul.f32 %v8761_v25, %v2786_v50 }
 0x81c   : > { %v8829_v41 = vpop.f32.mrf.mxu1  ;;  %6468 = vpow2.f32 %v3421_v52  ;;  %v2881_v52 = vmul.f32 %v8759_v39, %v2785_v58 }
 0x81d   : > { %6470 = vpow2.f32 %v3423_v48  ;;  %v9815_v48 = vld [vmem:[#allocation61_spill] sm:$0xff] }
 0x81e   : > { %v8842_v33 = vpop.f32.mrf.mxu1  ;;  %6472 = vpow2.f32 %v3425_v24  ;;  %v9819_v24 = vld [vmem:[#allocation65_spill] sm:$0xff] }
 0x81f   : > { %6474 = vpow2.f32 %v3429_v38  ;;  %v9820_v28 = vsub.f32 %v9818_v11, %v9819_v24  ;;  %v3441_v38 = vmul.f32 1.442695, %v9822_v56  ;;  %v3590_v56 = vmul.f32 %v8850_v42, %v3574_v26 }
 0x820   : > { %v8857_v17 = vpop.f32.mrf.mxu1 }
 0x822   : > { %v8865_v36 = vpop.eup %6464  ;;  %v8872_v25 = vpop.f32.mrf.mxu1 }
 0x824   : > { %v8885_v10 = vpop.f32.mrf.mxu1 }
 0x828   : > { %3686 = vperm.xlu0 %6224, %v8812_v63   ;;  %v8870_v3 = vpop.eup %6466 }
 0x829   : > { %v8880_v55 = vpop.eup %6468 }
 0x82a   : > { %3691 = vperm.xlu1 %6225, %v8820_v8  }
 0x82c   : > { %3726 = vperm.xlu0 %6224, %v8825_v37  }
 0x82d   : > { %v3105_v62 = vpop.permute.xlu0 %3104 }
 0x82e   : > { %v3151_v57 = vadd.f32 %v3105_v62, %v2878_v21  ;;  %3696 = vperm.xlu1 %6225, %v8836_v4   ;;  %v9817_v21 = vsub.f32 %v9815_v48, %v9816_v45  ;;  %v2884_v62 = vmul.f32 %v8763_v29, %v2788_v2  ;;  %v2890_v2 = vmul.f32 %v8800_v61, %v2794_v46 }
 0x82f   : > { %v3103_v9 = vpop.permute.xlu1 %3102 }
 0x830   : > { %3168 = vst.msk [vmem:[#allocation4 + $0x8] sm:$0xff] %vm3166_vm8, %v3151_v57  ;;  %v3150_v27 = vadd.f32 %v3103_v9, %v2877_v43  ;;  %3736 = vperm.xlu0 %6224, %v8840_v34   ;;  %v3433_v7 = vmul.f32 1.442695, %v9817_v21  ;;  %v2787_v43 = vld [vmem:[#allocation4 + $0x30] sm:$0xff] }
 0x831   : > { %v3109_v35 = vpop.permute.xlu0 %3108  ;;  %v2883_v49 = vmul.f32 %v8765_v13, %v2787_v43  ;;  %v8894_v13 = vpop.eup %6470 }
 0x832   : > { %3167 = vst.msk [vmem:[#allocation4] sm:$0xff] %vm3166_vm8, %v3150_v27  ;;  %v3153_v16 = vadd.f32 %v3109_v35, %v2880_v18  ;;  %3701 = vperm.xlu1 %6225, %v8850_v42   ;;  %6476 = vpow2.f32 %v3433_v7  ;;  %v3437_v18 = vmul.f32 1.442695, %v9820_v28  ;;  %v2886_v27 = vmul.f32 %v8770_v19, %v2790_v14  ;;  %v2789_v35 = vld [vmem:[#allocation4 + $0x40] sm:$0xff]  ;;  %v3934_v19 = vpop.f32.mrf.mxu1  ;;  %v2796_v7 = vld [vmem:[#allocation4 + $0x78] sm:$0xff] }
 0x833   : > { %v3107_v53 = vpop.permute.xlu1 %3106 }
 0x834   : > { %3170 = vst.msk [vmem:[#allocation4 + $0x18] sm:$0xff] %vm3166_vm8, %v3153_v16  ;;  %v3152_v0 = vadd.f32 %v3107_v53, %v2879_v47  ;;  %3746 = vperm.xlu0 %6224, %v8855_v32   ;;  %v2885_v16 = vmul.f32 %v8775_v1, %v2789_v35  ;;  %v2792_v53 = vld [vmem:[#allocation4 + $0x58] sm:$0xff]  ;;  %6478 = vpow2.f32 %v3437_v18  ;;  %v8906_v1 = vpop.eup %6472 }
 0x835   : > { %v3113_v60 = vpop.permute.xlu0 %3112  ;;  %6480 = vpow2.f32 %v3441_v38 }
 0x836   : > { %3169 = vst.msk [vmem:[#allocation4 + $0x10] sm:$0xff] %vm3166_vm8, %v3152_v0  ;;  %v3155_v44 = vadd.f32 %v3113_v60, %v2882_v20  ;;  %3706 = vperm.xlu1 %6225, %v8865_v36   ;;  %v2791_v0 = vld [vmem:[#allocation4 + $0x50] sm:$0xff] }
 0x837   : > { %v3111_v12 = vpop.permute.xlu1 %3110  ;;  %v2887_v60 = vmul.f32 %v8790_v6, %v2791_v0  ;;  %v2793_v6 = vld [vmem:[#allocation4 + $0x60] sm:$0xff] }
 0x838   : > { %3172 = vst.msk [vmem:[#allocation4 + $0x28] sm:$0xff] %vm3166_vm8, %v3155_v44  ;;  %v3154_v39 = vadd.f32 %v3111_v12, %v2881_v52  ;;  %3756 = vperm.xlu0 %6224, %v8870_v3   ;;  %v5950_v44 = vpop.f32.mrf.mxu1  ;;  %v8915_v12 = vpop.eup %6474  ;;  %v2889_v45 = vmul.f32 %v8807_v51, %v2793_v6 }
 0x839   : > { %v3117_v57 = vpop.permute.xlu0 %3116 }
 0x83a   : > { %3171 = vst.msk [vmem:[#allocation4 + $0x20] sm:$0xff] %vm3166_vm8, %v3154_v39  ;;  %v3157_v9 = vadd.f32 %v3117_v57, %v2884_v62  ;;  %3711 = vperm.xlu1 %6225, %v8880_v55   ;;  %v3944_v62 = vpop.f32.mrf.mxu1  ;;  %v2892_v39 = vmul.f32 %v8822_v5, %v2796_v7  ;;  %v2795_v57 = vld [vmem:[#allocation4 + $0x70] sm:$0xff]  ;;  %v3580_v7 = vld [vmem:[#allocation3 + $0x48] sm:$0xff] }
 0x83b   : > { %v3115_v29 = vpop.permute.xlu1 %3114 }
 0x83c   : > { %3174 = vst.msk [vmem:[#allocation4 + $0x38] sm:$0xff] %vm3166_vm8, %v3157_v9  ;;  %v3156_v54 = vadd.f32 %v3115_v29, %v2883_v49  ;;  %3989 = vrot.lane.b32.xlu0 %v8792_v59, %s6638_s17  ;;  %v2888_v59 = vmul.f32 %v8785_v30, %v2792_v53  ;;  %v2891_v49 = vmul.f32 %v8827_v40, %v2795_v57  ;;  %v5953_v14 = vpop.f32.mrf.mxu1 }
 0x83d   : > { %v3121_v47 = vpop.permute.xlu0 %3120 }
 0x83e   : > { %3173 = vst.msk [vmem:[#allocation4 + $0x30] sm:$0xff] %vm3166_vm8, %v3156_v54  ;;  %v3159_v50 = vadd.f32 %v3121_v47, %v2886_v27  ;;  %3716 = vperm.xlu1 %6225, %v8894_v13   ;;  %v3573_v54 = vld [vmem:[#allocation3 + $0x10] sm:$0xff]  ;;  %v3571_v47 = vld [vmem:[#allocation3] sm:$0xff] }
 0x83f   : > { %v3119_v31 = vpop.permute.xlu1 %3118 }
 0x840   : > { %3176 = vst.msk [vmem:[#allocation4 + $0x48] sm:$0xff] %vm3166_vm8, %v3159_v50  ;;  %v3158_v20 = vadd.f32 %v3119_v31, %v2885_v16  ;;  %3993 = vrot.lane.b32.xlu0 %v8814_v23, %s6638_s17  ;;  %v3575_v16 = vld [vmem:[#allocation3 + $0x20] sm:$0xff] }
 0x841   : > { %v3125_v58 = vpop.permute.xlu0 %3124  ;;  %v3591_v53 = vmul.f32 %v8865_v36, %v3575_v16  ;;  %v3668_v16 = vld [vmem:[#allocation4] sm:$0xff] }
 0x842   : > { %3175 = vst.msk [vmem:[#allocation4 + $0x40] sm:$0xff] %vm3166_vm8, %v3158_v20  ;;  %v3161_v52 = vadd.f32 %v3125_v58, %v2888_v59  ;;  %3721 = vperm.xlu1 %6225, %v8906_v1   ;;  %v3576_v58 = vld [vmem:[#allocation3 + $0x28] sm:$0xff] }
 0x843   : > { %v3123_v30 = vpop.permute.xlu1 %3122  ;;  %v3592_v36 = vmul.f32 %v8880_v55, %v3576_v58 }
 0x844   : > { %3178 = vst.msk [vmem:[#allocation4 + $0x58] sm:$0xff] %vm3166_vm8, %v3161_v52  ;;  %v3160_v23 = vadd.f32 %v3123_v30, %v2887_v60  ;;  %3997 = vrot.lane.b32.xlu0 %v8842_v33, %s6638_s17  ;;  %v8924_v33 = vpop.eup %6476  ;;  %v3579_v60 = vld [vmem:[#allocation3 + $0x40] sm:$0xff] }
 0x845   : > { %v3129_v48 = vpop.permute.xlu0 %3128  ;;  %v8931_v11 = vpop.eup %6478  ;;  %v3595_v42 = vmul.f32 %v8825_v37, %v3579_v60  ;;  %v3596_v37 = vmul.f32 %v8915_v12, %v3580_v7  ;;  %v3674_v58 = vld [vmem:[#allocation4 + $0x30] sm:$0xff] }
 0x846   : > { %3177 = vst.msk [vmem:[#allocation4 + $0x50] sm:$0xff] %vm3166_vm8, %v3160_v23  ;;  %v3163_v21 = vadd.f32 %v3129_v48, %v2890_v2  ;;  %3731 = vperm.xlu1 %6225, %v8915_v12   ;;  %v8936_v40 = vpop.eup %6480  ;;  %v3578_v2 = vld [vmem:[#allocation3 + $0x38] sm:$0xff]  ;;  %v3581_v23 = vld [vmem:[#allocation3 + $0x50] sm:$0xff] }
 0x847   : > { %v3127_v61 = vpop.permute.xlu1 %3126  ;;  %v3597_v55 = vmul.f32 %v8840_v34, %v3581_v23 }
 0x848   : > { %3180 = vst.msk [vmem:[#allocation4 + $0x68] sm:$0xff] %vm3166_vm8, %v3163_v21  ;;  %v3162_v43 = vadd.f32 %v3127_v61, %v2889_v45  ;;  %4001 = vrot.lane.b32.xlu0 %v8872_v25, %s6638_s17  ;;  %v3954_v25 = vpop.f32.mrf.mxu1 }
 0x849   : > { %v3133_v51 = vpop.permute.xlu0 %3132 }
 0x84a   : > { %3179 = vst.msk [vmem:[#allocation4 + $0x60] sm:$0xff] %vm3166_vm8, %v3162_v43  ;;  %v3165_v9 = vadd.f32 %v3133_v51, %v2892_v39  ;;  %3741 = vperm.xlu1 %6225, %v8924_v33   ;;  %v5956_v24 = vpop.f32.mrf.mxu1  ;;  %v3582_v51 = vld [vmem:[#allocation3 + $0x58] sm:$0xff] }
 0x84b   : > { %v3131_v29 = vpop.permute.xlu1 %3130  ;;  %v3598_v34 = vmul.f32 %v8924_v33, %v3582_v51 }
 0x84c   : > { %3182 = vst.msk [vmem:[#allocation4 + $0x78] sm:$0xff] %vm3166_vm8, %v3165_v9  ;;  %v3164_v5 = vadd.f32 %v3131_v29, %v2891_v49  ;;  %4005 = vrot.lane.b32.xlu0 %v3934_v19, %s6638_s17  ;;  %v3964_v28 = vpop.f32.mrf.mxu1  ;;  %v3585_v49 = vld [vmem:[#allocation3 + $0x70] sm:$0xff] }
 0x84d   : > { %v3601_v12 = vmul.f32 %v8870_v3, %v3585_v49  ;;  %v3678_v23 = vld [vmem:[#allocation4 + $0x50] sm:$0xff] }
 0x84e   : > { %3181 = vst.msk [vmem:[#allocation4 + $0x70] sm:$0xff] %vm3166_vm8, %v3164_v5  ;;  %3751 = vperm.xlu1 %6225, %v8931_v11  }
 0x850   : > { %4009 = vrot.lane.b32.xlu0 %v3944_v62, %s6638_s17  ;;  %v3583_v62 = vld [vmem:[#allocation3 + $0x60] sm:$0xff] }
 0x852   : > { %3761 = vperm.xlu1 %6225, %v8936_v40  }
 0x854   : > { %4013 = vrot.lane.b32.xlu0 %v3954_v25, %s6638_s17  ;;  %v3584_v25 = vld [vmem:[#allocation3 + $0x68] sm:$0xff] }
 0x856   : > { %3991 = vrot.lane.b32.xlu1 %v8780_v15, %s6638_s17  ;;  %v3572_v15 = vld [vmem:[#allocation3 + $0x8] sm:$0xff] }
 0x857   : > { %v3588_v18 = vmul.f32 %v8820_v8, %v3572_v15  ;;  %v3586_v15 = vld [vmem:[#allocation3 + $0x78] sm:$0xff] }
 0x858   : > { %4017 = vrot.lane.b32.xlu0 %v3964_v28, %s6638_s17  ;;  %v3602_v33 = vmul.f32 %v8936_v40, %v3586_v15  ;;  %v3670_v40 = vld [vmem:[#allocation4 + $0x10] sm:$0xff]  ;;  %v3675_v15 = vld [vmem:[#allocation4 + $0x38] sm:$0xff] }
 0x85a   : > { %3995 = vrot.lane.b32.xlu1 %v8802_v22, %s6638_s17 }
 0x85e   : > { %3999 = vrot.lane.b32.xlu1 %v8829_v41, %s6638_s17  ;;  %v3589_v41 = vmul.f32 %v8836_v4, %v3573_v54  ;;  %v3577_v4 = vld [vmem:[#allocation3 + $0x30] sm:$0xff] }
 0x862   : > { %4003 = vrot.lane.b32.xlu1 %v8857_v17, %s6638_s17 }
 0x866   : > { %4007 = vrot.lane.b32.xlu1 %v8885_v10, %s6638_s17  ;;  %v3587_v10 = vmul.f32 %v8812_v63, %v3571_v47  ;;  %v3593_v63 = vmul.f32 %v8894_v13, %v3577_v4  ;;  %v3594_v13 = vmul.f32 %v8906_v1, %v3578_v2  ;;  %v3599_v1 = vmul.f32 %v8855_v32, %v3583_v62 }
 0x867   : > { %v3600_v32 = vmul.f32 %v8931_v11, %v3584_v25  ;;  %v3673_v25 = vld [vmem:[#allocation4 + $0x28] sm:$0xff] }
 0x86a   : > { %4011 = vrot.lane.b32.xlu1 %v5950_v44, %s6638_s17 }
 0x86e   : > { %4015 = vrot.lane.b32.xlu1 %v5953_v14, %s6638_s17 }
 0x872   : > { %4019 = vrot.lane.b32.xlu1 %v5956_v24, %s6638_s17 }
 0x87f   : > { %v3606_v27 = vpop.xlane.xlu0 %3605 }
 0x880   : > { %v3636_v22 = vadd.f32 %v3606_v27, %v3588_v18 }
 0x882   : > { %3653 = vst.msk [vmem:[#allocation3 + $0x8] sm:$0xff] %vm3651_vm7, %v3636_v22 }
 0x883   : > { %v3608_v17 = vpop.xlane.xlu0 %3607 }
 0x884   : > { %v3637_v35 = vadd.f32 %v3608_v17, %v3589_v41 }
 0x886   : > { %3654 = vst.msk [vmem:[#allocation3 + $0x10] sm:$0xff] %vm3651_vm7, %v3637_v35  ;;  %v3604_v50 = vpop.xlane.xlu1 %3603 }
 0x887   : > { %v3635_v19 = vadd.f32 %v3604_v50, %v3587_v10  ;;  %v3612_v8 = vpop.xlane.xlu0 %3611 }
 0x888   : > { %v3639_v31 = vadd.f32 %v3612_v8, %v3591_v53 }
 0x889   : > { %3652 = vst.msk [vmem:[#allocation3] sm:$0xff] %vm3651_vm7, %v3635_v19 }
 0x88a   : > { %3656 = vst.msk [vmem:[#allocation3 + $0x20] sm:$0xff] %vm3651_vm7, %v3639_v31  ;;  %v3610_v38 = vpop.xlane.xlu1 %3609 }
 0x88b   : > { %v3638_v59 = vadd.f32 %v3610_v38, %v3590_v56  ;;  %v3616_v20 = vpop.xlane.xlu0 %3615  ;;  %v3672_v38 = vld [vmem:[#allocation4 + $0x20] sm:$0xff] }
 0x88c   : > { %v3641_v0 = vadd.f32 %v3616_v20, %v3593_v63 }
 0x88d   : > { %3655 = vst.msk [vmem:[#allocation3 + $0x18] sm:$0xff] %vm3651_vm7, %v3638_v59 }
 0x88e   : > { %3658 = vst.msk [vmem:[#allocation3 + $0x30] sm:$0xff] %vm3651_vm7, %v3641_v0  ;;  %v3614_v52 = vpop.xlane.xlu1 %3613 }
 0x88f   : > { %v3640_v46 = vadd.f32 %v3614_v52, %v3592_v36  ;;  %v3620_v44 = vpop.xlane.xlu0 %3619 }
 0x890   : > { %v3643_v30 = vadd.f32 %v3620_v44, %v3595_v42 }
 0x891   : > { %3657 = vst.msk [vmem:[#allocation3 + $0x28] sm:$0xff] %vm3651_vm7, %v3640_v46  ;;  %v3676_v46 = vld [vmem:[#allocation4 + $0x40] sm:$0xff] }
 0x892   : > { %3660 = vst.msk [vmem:[#allocation3 + $0x40] sm:$0xff] %vm3651_vm7, %v3643_v30  ;;  %v3618_v6 = vpop.xlane.xlu1 %3617 }
 0x893   : > { %v3642_v48 = vadd.f32 %v3618_v6, %v3594_v13  ;;  %v3624_v45 = vpop.xlane.xlu0 %3623 }
 0x894   : > { %v3645_v21 = vadd.f32 %v3624_v45, %v3597_v55 }
 0x895   : > { %3659 = vst.msk [vmem:[#allocation3 + $0x38] sm:$0xff] %vm3651_vm7, %v3642_v48 }
 0x896   : > { %3662 = vst.msk [vmem:[#allocation3 + $0x50] sm:$0xff] %vm3651_vm7, %v3645_v21  ;;  %v3622_v61 = vpop.xlane.xlu1 %3621  ;;  %v3680_v21 = vld [vmem:[#allocation4 + $0x60] sm:$0xff] }
 0x897   : > { %v3644_v39 = vadd.f32 %v3622_v61, %v3596_v37  ;;  %v3628_v43 = vpop.xlane.xlu0 %3627  ;;  %v3669_v61 = vld [vmem:[#allocation4 + $0x8] sm:$0xff] }
 0x898   : > { %v3647_v57 = vadd.f32 %v3628_v43, %v3599_v1  ;;  %v3682_v43 = vld [vmem:[#allocation4 + $0x70] sm:$0xff] }
 0x899   : > { %3661 = vst.msk [vmem:[#allocation3 + $0x48] sm:$0xff] %vm3651_vm7, %v3644_v39 }
 0x89a   : > { %3664 = vst.msk [vmem:[#allocation3 + $0x60] sm:$0xff] %vm3651_vm7, %v3647_v57  ;;  %v3626_v9 = vpop.xlane.xlu1 %3625 }
 0x89b   : > { %v3646_v14 = vadd.f32 %v3626_v9, %v3598_v34  ;;  %v3632_v29 = vpop.xlane.xlu0 %3631  ;;  %v3671_v9 = vld [vmem:[#allocation4 + $0x18] sm:$0xff] }
 0x89c   : > { %v3649_v5 = vadd.f32 %v3632_v29, %v3601_v12 }
 0x89d   : > { %3663 = vst.msk [vmem:[#allocation3 + $0x58] sm:$0xff] %vm3651_vm7, %v3646_v14 }
 0x89e   : > { %3666 = vst.msk [vmem:[#allocation3 + $0x70] sm:$0xff] %vm3651_vm7, %v3649_v5  ;;  %v3630_v24 = vpop.xlane.xlu1 %3629 }
 0x89f   : > { %v3648_v28 = vadd.f32 %v3630_v24, %v3600_v32 }
 0x8a1   : > { %3665 = vst.msk [vmem:[#allocation3 + $0x68] sm:$0xff] %vm3651_vm7, %v3648_v28 }
 0x8a2   : > { %v3634_v18 = vpop.xlane.xlu1 %3633 }
 0x8a3   : > { %v3650_v27 = vadd.f32 %v3634_v18, %v3602_v33  ;;  %v3687_v3 = vpop.permute.xlu0 %3686 }
 0x8a4   : > { %v3764_v50 = vmul.f32 %v3687_v3, %v3668_v16  ;;  %v3677_v3 = vld [vmem:[#allocation4 + $0x48] sm:$0xff] }
 0x8a5   : > { %3667 = vst.msk [vmem:[#allocation3 + $0x78] sm:$0xff] %vm3651_vm7, %v3650_v27 }
 0x8a6   : > { %v3692_v22 = vpop.permute.xlu1 %3691 }
 0x8a7   : > { %v3727_v54 = vpop.permute.xlu0 %3726  ;;  %v3765_v39 = vmul.f32 %v3692_v22, %v3669_v61 }
 0x8a8   : > { %v3772_v44 = vmul.f32 %v3727_v54, %v3676_v46 }
 0x8aa   : > { %v3697_v41 = vpop.permute.xlu1 %3696 }
 0x8ab   : > { %v3737_v17 = vpop.permute.xlu0 %3736  ;;  %v3766_v31 = vmul.f32 %v3697_v41, %v3670_v40 }
 0x8ac   : > { %v3774_v6 = vmul.f32 %v3737_v17, %v3678_v23  ;;  %v3679_v17 = vld [vmem:[#allocation4 + $0x58] sm:$0xff] }
 0x8ae   : > { %v3702_v35 = vpop.permute.xlu1 %3701 }
 0x8af   : > { %v3747_v11 = vpop.permute.xlu0 %3746  ;;  %v3767_v14 = vmul.f32 %v3702_v35, %v3671_v9 }
 0x8b0   : > { %v3776_v7 = vmul.f32 %v3747_v11, %v3680_v21 }
 0x8b2   : > { %v3707_v47 = vpop.permute.xlu1 %3706 }
 0x8b3   : > { %v3757_v10 = vpop.permute.xlu0 %3756  ;;  %v3768_v63 = vmul.f32 %v3707_v47, %v3672_v38 }
 0x8b4   : > { %v3778_v57 = vmul.f32 %v3757_v10, %v3682_v43  ;;  %v3681_v10 = vld [vmem:[#allocation4 + $0x68] sm:$0xff] }
 0x8b6   : > { %v3712_v53 = vpop.permute.xlu1 %3711 }
 0x8b7   : > { %v3990_v19 = vpop.permute.xlu0 %3989  ;;  %v3769_v32 = vmul.f32 %v3712_v53, %v3673_v25 }
 0x8b8   : > { %v4037_v8 = vadd.f32 %v3990_v19, %v3764_v50  ;;  %v3683_v19 = vld [vmem:[#allocation4 + $0x78] sm:$0xff] }
 0x8ba   : > { %4054 = vst.msk [vmem:[#allocation4] sm:$0xff] %vm4053_vm9, %v4037_v8  ;;  %v3717_v26 = vpop.permute.xlu1 %3716 }
 0x8bb   : > { %v3994_v56 = vpop.permute.xlu0 %3993  ;;  %v3770_v36 = vmul.f32 %v3717_v26, %v3674_v58 }
 0x8bc   : > { %v4039_v4 = vadd.f32 %v3994_v56, %v3766_v31 }
 0x8be   : > { %4056 = vst.msk [vmem:[#allocation4 + $0x10] sm:$0xff] %vm4053_vm9, %v4039_v4  ;;  %v3722_v59 = vpop.permute.xlu1 %3721 }
 0x8bf   : > { %v3998_v20 = vpop.permute.xlu0 %3997  ;;  %v3771_v33 = vmul.f32 %v3722_v59, %v3675_v15 }
 0x8c0   : > { %v4041_v0 = vadd.f32 %v3998_v20, %v3768_v63 }
 0x8c2   : > { %4058 = vst.msk [vmem:[#allocation4 + $0x20] sm:$0xff] %vm4053_vm9, %v4041_v0  ;;  %v3732_v60 = vpop.permute.xlu1 %3731 }
 0x8c3   : > { %v4002_v52 = vpop.permute.xlu0 %4001  ;;  %v3773_v22 = vmul.f32 %v3732_v60, %v3677_v3 }
 0x8c4   : > { %v4043_v42 = vadd.f32 %v4002_v52, %v3770_v36 }
 0x8c6   : > { %4060 = vst.msk [vmem:[#allocation4 + $0x30] sm:$0xff] %vm4053_vm9, %v4043_v42  ;;  %v3742_v30 = vpop.permute.xlu1 %3741 }
 0x8c7   : > { %v4006_v2 = vpop.permute.xlu0 %4005  ;;  %v3775_v35 = vmul.f32 %v3742_v30, %v3679_v17 }
 0x8c8   : > { %v4045_v13 = vadd.f32 %v4006_v2, %v3772_v44 }
 0x8ca   : > { %4062 = vst.msk [vmem:[#allocation4 + $0x40] sm:$0xff] %vm4053_vm9, %v4045_v13  ;;  %v3752_v55 = vpop.permute.xlu1 %3751 }
 0x8cb   : > { %v4010_v48 = vpop.permute.xlu0 %4009  ;;  %v3777_v16 = vmul.f32 %v3752_v55, %v3681_v10 }
 0x8cc   : > { %v4047_v45 = vadd.f32 %v4010_v48, %v3774_v6 }
 0x8ce   : > { %4064 = vst.msk [vmem:[#allocation4 + $0x50] sm:$0xff] %vm4053_vm9, %v4047_v45  ;;  %v3762_v37 = vpop.permute.xlu1 %3761 }
 0x8cf   : > { %v4014_v62 = vpop.permute.xlu0 %4013  ;;  %v3779_v8 = vmul.f32 %v3762_v37, %v3683_v19 }
 0x8d0   : > { %v4049_v1 = vadd.f32 %v4014_v62, %v3776_v7 }
 0x8d2   : > { %4066 = vst.msk [vmem:[#allocation4 + $0x60] sm:$0xff] %vm4053_vm9, %v4049_v1  ;;  %v3992_v51 = vpop.permute.xlu1 %3991 }
 0x8d3   : > { %v4038_v34 = vadd.f32 %v3992_v51, %v3765_v39  ;;  %v4018_v49 = vpop.permute.xlu0 %4017 }
 0x8d4   : > { %v4051_v12 = vadd.f32 %v4018_v49, %v3778_v57 }
 0x8d5   : > { %4055 = vst.msk [vmem:[#allocation4 + $0x8] sm:$0xff] %vm4053_vm9, %v4038_v34 }
 0x8d6   : > { %4068 = vst.msk [vmem:[#allocation4 + $0x70] sm:$0xff] %vm4053_vm9, %v4051_v12  ;;  %v3996_v29 = vpop.permute.xlu1 %3995 }
 0x8d7   : > { %v4040_v5 = vadd.f32 %v3996_v29, %v3767_v14 }
 0x8d9   : > { %4057 = vst.msk [vmem:[#allocation4 + $0x18] sm:$0xff] %vm4053_vm9, %v4040_v5 }
 0x8da   : > { %v4000_v24 = vpop.permute.xlu1 %3999 }
 0x8db   : > { %v4042_v28 = vadd.f32 %v4000_v24, %v3769_v32 }
 0x8dd   : > { %4059 = vst.msk [vmem:[#allocation4 + $0x28] sm:$0xff] %vm4053_vm9, %v4042_v28 }
 0x8de   : > { %v4004_v18 = vpop.permute.xlu1 %4003 }
 0x8df   : > { %v4044_v27 = vadd.f32 %v4004_v18, %v3771_v33 }
 0x8e1   : > { %4061 = vst.msk [vmem:[#allocation4 + $0x38] sm:$0xff] %vm4053_vm9, %v4044_v27 }
 0x8e2   : > { %v4008_v54 = vpop.permute.xlu1 %4007 }
 0x8e3   : > { %v4046_v41 = vadd.f32 %v4008_v54, %v3773_v22 }
 0x8e5   : > { %4063 = vst.msk [vmem:[#allocation4 + $0x48] sm:$0xff] %vm4053_vm9, %v4046_v41 }
 0x8e6   : > { %v4012_v11 = vpop.permute.xlu1 %4011 }
 0x8e7   : > { %v4048_v47 = vadd.f32 %v4012_v11, %v3775_v35 }
 0x8e9   : > { %4065 = vst.msk [vmem:[#allocation4 + $0x58] sm:$0xff] %vm4053_vm9, %v4048_v47 }
 0x8ea   : > { %v4016_v50 = vpop.permute.xlu1 %4015 }
 0x8eb   : > { %v4050_v53 = vadd.f32 %v4016_v50, %v3777_v16 }
 0x8ed   : > { %4067 = vst.msk [vmem:[#allocation4 + $0x68] sm:$0xff] %vm4053_vm9, %v4050_v53  ;;  %4089 = sbr.rel (%p5459_p0) target bundleno = 3018 (0xbca), region = 94 }
 0x8ee   : > { %v4020_v40 = vpop.permute.xlu1 %4019 }
 0x8ef   : > { %v4052_v31 = vadd.f32 %v4020_v40, %v3779_v8 }
 0x8f1   : > { %4069 = vst.msk [vmem:[#allocation4 + $0x78] sm:$0xff] %vm4053_vm9, %v4052_v31 }
 0x8f2   : > { %v4108_v26 = vld [vmem:[#allocation3 + $0x10] sm:$0xff]  ;;  %v4106_v56 = vld [vmem:[#allocation3] sm:$0xff]  ;;  %v4109_v4 = vld [vmem:[#allocation3 + $0x18] sm:$0xff]  ;;  %v6639_v38 = vmov 0   ;;  %v6640_v13 = vmov 1   ;;  %v6641_v57 = vmov 2  }
 0x8f3   : > { %6508 = vset.pattern.permute.xlu1 %v6639_v38  ;;  %6507 = vset.pattern.permute.xlu0 %v6639_v38  ;;  %6539 = vrcp.f32 %v4108_v26  ;;  %v4107_v63 = vld [vmem:[#allocation3 + $0x8] sm:$0xff]  ;;  %v4110_v20 = vld [vmem:[#allocation3 + $0x20] sm:$0xff]  ;;  %v4113_v0 = vld [vmem:[#allocation3 + $0x38] sm:$0xff]  ;;  %v6642_v49 = vmov 3   ;;  %vm4789_vm10 = vcmask 261120   ;;  %vm5047_vm11 = vcmask 125952  }
 0x8f4   : > { %6541 = vrcp.f32 %v4106_v56  ;;  %v4111_v59 = vld [vmem:[#allocation3 + $0x28] sm:$0xff]  ;;  %v4114_v58 = vld [vmem:[#allocation3 + $0x40] sm:$0xff]  ;;  %v4112_v60 = vld [vmem:[#allocation3 + $0x30] sm:$0xff]  ;;  %vm5066_vm12 = vcmask 130048   ;;  %vm5260_vm13 = vcmask 15360  }
 0x8f5   : > { %6543 = vrcp.f32 %v4109_v4  ;;  %v4115_v23 = vld [vmem:[#allocation3 + $0x48] sm:$0xff]  ;;  %v4276_v48 = vld [vmem:[#allocation3 + $0x50] sm:$0xff]  ;;  %v4278_v45 = vld [vmem:[#allocation3 + $0x60] sm:$0xff] }
 0x8f6   : > { %6545 = vrcp.f32 %v4107_v63  ;;  %v4280_v21 = vld [vmem:[#allocation3 + $0x70] sm:$0xff]  ;;  %v4117_v7 = vld [vmem:[#allocation3 + $0x58] sm:$0xff]  ;;  %v4119_v43 = vld [vmem:[#allocation3 + $0x68] sm:$0xff] }
 0x8f7   : > { %6547 = vrcp.f32 %v4111_v59  ;;  %v4121_v34 = vld [vmem:[#allocation3 + $0x78] sm:$0xff]  ;;  %v4787_v14 = vld [vmem:[%s9359_s5 + $0x10] sm:$0xff]  ;;  %v4786_v29 = vld [vmem:[%s9359_s5 + $0x8] sm:$0xff] }
 0x8f8   : > { %6549 = vrcp.f32 %v4110_v20  ;;  %v4788_v12 = vld [vmem:[%s9359_s5 + $0x18] sm:$0xff]  ;;  %v4785_v5 = vld [vmem:[%s9359_s5] sm:$0xff]  ;;  %v4092_v25 = vld [vmem:[#allocation4 + $0x10] sm:$0xff] }
 0x8f9   : > { %6551 = vrcp.f32 %v4113_v0  ;;  %5957 = vmatprep.subr.mxu0 %v4788_v12  ;;  %v4090_v32 = vld [vmem:[#allocation4] sm:$0xff]  ;;  %v4093_v18 = vld [vmem:[#allocation4 + $0x18] sm:$0xff]  ;;  %v4091_v27 = vld [vmem:[#allocation4 + $0x8] sm:$0xff] }
 0x8fa   : > { %6553 = vrcp.f32 %v4114_v58  ;;  %5958 = vmatpush3.msra.mxu0 %v4788_v12  ;;  %v4095_v17 = vld [vmem:[#allocation4 + $0x28] sm:$0xff]  ;;  %v4094_v35 = vld [vmem:[#allocation4 + $0x20] sm:$0xff]  ;;  %v4097_v50 = vld [vmem:[#allocation4 + $0x38] sm:$0xff] }
 0x8fb   : > { %6555 = vrcp.f32 %v4112_v60  ;;  %5959 = vmatprep.subr.mxu0 %v4787_v14  ;;  %v4098_v31 = vld [vmem:[#allocation4 + $0x40] sm:$0xff]  ;;  %v4096_v56 = vld [vmem:[#allocation4 + $0x30] sm:$0xff] }
 0x8fc   : > { %6557 = vrcp.f32 %v4115_v23  ;;  %5960 = vmatpush3.msra.mxu0 %v4787_v14 }
 0x8fd   : > { %6559 = vrcp.f32 %v4276_v48  ;;  %5961 = vmatprep.subr.mxu0 %v4786_v29 }
 0x8fe   : > { %6561 = vrcp.f32 %v4278_v45  ;;  %5962 = vmatpush3.msra.mxu0 %v4786_v29  ;;  %v4099_v45 = vld [vmem:[#allocation4 + $0x48] sm:$0xff]  ;;  %v4100_v29 = vld [vmem:[#allocation4 + $0x50] sm:$0xff] }
 0x8ff   : > { %6563 = vrcp.f32 %v4280_v21  ;;  %5963 = vmatprep.subr.mxu0 %v4785_v5 }
 0x900   : > { %v9005_v36 = vpop.eup %6539  ;;  %6565 = vrcp.f32 %v4117_v7  ;;  %5964 = vmatpush3.msra.mxu0 %v4785_v5 }
 0x901   : > { %v9007_v52 = vpop.eup %6541  ;;  %4150 = vperm.xlu1 %6508, %v9005_v36   ;;  %6567 = vrcp.f32 %v4119_v43 }
 0x902   : > { %v9010_v42 = vpop.eup %6543  ;;  %4140 = vperm.xlu0 %6507, %v9007_v52   ;;  %6569 = vrcp.f32 %v4121_v34 }
 0x903   : > { %v9013_v46 = vpop.eup %6545 }
 0x904   : > { %v9016_v44 = vpop.eup %6547 }
 0x905   : > { %4155 = vperm.xlu1 %6508, %v9010_v42   ;;  %v9019_v30 = vpop.eup %6549 }
 0x906   : > { %4145 = vperm.xlu0 %6507, %v9013_v46   ;;  %v9023_v2 = vpop.eup %6551 }
 0x907   : > { %v9028_v6 = vpop.eup %6553 }
 0x908   : > { %v9030_v55 = vpop.eup %6555 }
 0x909   : > { %4165 = vperm.xlu1 %6508, %v9016_v44   ;;  %v9041_v37 = vpop.eup %6557 }
 0x90a   : > { %4160 = vperm.xlu0 %6507, %v9019_v30   ;;  %v9047_v62 = vpop.eup %6559 }
 0x90b   : > { %v6562_v61 = vpop.eup %6561 }
 0x90c   : > { %v9053_v1 = vpop.eup %6563 }
 0x90d   : > { %6509 = vset.pattern.permute.xlu1 %v6640_v13  ;;  %v9056_v39 = vpop.eup %6565 }
 0x90e   : > { %4175 = vperm.xlu0 %6507, %v9023_v2   ;;  %4305 = vperm.xlu1 %6509, %v9013_v46   ;;  %v9069_v51 = vpop.eup %6567 }
 0x90f   : > { %v9083_v9 = vpop.eup %6569 }
 0x912   : > { %4180 = vperm.xlu0 %6507, %v9028_v6   ;;  %6510 = vset.pattern.permute.xlu1 %v6639_v38 }
 0x913   : > { %4170 = vperm.xlu1 %6510, %v9030_v55  }
 0x916   : > { %6512 = vset.pattern.permute.xlu0 %v6640_v13 }
 0x917   : > { %4300 = vperm.xlu0 %6512, %v9007_v52   ;;  %6511 = vset.pattern.permute.xlu1 %v6640_v13 }
 0x918   : > { %4310 = vperm.xlu1 %6511, %v9005_v36  }
 0x91b   : > { %4320 = vperm.xlu0 %6512, %v9019_v30  }
 0x91c   : > { %4315 = vperm.xlu1 %6511, %v9010_v42  }
 0x91f   : > { %4330 = vperm.xlu0 %6512, %v9030_v55  }
 0x920   : > { %6513 = vset.pattern.permute.xlu1 %v6639_v38 }
 0x921   : > { %4185 = vperm.xlu1 %6513, %v9041_v37  }
 0x923   : > { %4340 = vperm.xlu0 %6512, %v9028_v6  }
 0x925   : > { %6514 = vset.pattern.permute.xlu1 %v6640_v13 }
 0x926   : > { %4325 = vperm.xlu1 %6514, %v9016_v44  }
 0x927   : > { %4350 = vperm.xlu0 %6512, %v9047_v62  }
 0x92a   : > { %6515 = vset.pattern.permute.xlu1 %v6639_v38 }
 0x92b   : > { %4360 = vperm.xlu0 %6512, %v6562_v61   ;;  %4190 = vperm.xlu1 %6515, %v9047_v62  }
 0x92f   : > { %4370 = vperm.xlu0 %6512, %v9053_v1   ;;  %4195 = vperm.xlu1 %6515, %v9056_v39  }
 0x933   : > { %6529 = vset.pattern.permute.xlu0 %v6641_v57  ;;  %6516 = vset.pattern.permute.xlu1 %v6641_v57 }
 0x934   : > { %4460 = vperm.xlu0 %6529, %v9007_v52   ;;  %4465 = vperm.xlu1 %6516, %v9013_v46  }
 0x938   : > { %4470 = vperm.xlu0 %6529, %v9005_v36   ;;  %6517 = vset.pattern.permute.xlu1 %v6640_v13 }
 0x939   : > { %4335 = vperm.xlu1 %6517, %v9023_v2  }
 0x93c   : > { %4480 = vperm.xlu0 %6529, %v9019_v30  }
 0x93d   : > { %6518 = vset.pattern.permute.xlu1 %v6639_v38 }
 0x93e   : > { %4200 = vperm.xlu1 %6518, %v6562_v61  }
 0x940   : > { %4520 = vperm.xlu0 %6529, %v6562_v61  }
 0x942   : > { %4205 = vperm.xlu1 %6518, %v9069_v51  }
 0x944   : > { %6534 = vset.pattern.permute.xlu0 %v6642_v49 }
 0x945   : > { %4625 = vperm.xlu0 %6534, %v9013_v46  }
 0x946   : > { %6519 = vset.pattern.permute.xlu1 %v6641_v57 }
 0x947   : > { %4475 = vperm.xlu1 %6519, %v9010_v42  }
 0x949   : > { %4635 = vperm.xlu0 %6534, %v9010_v42  }
 0x94b   : > { %6520 = vset.pattern.permute.xlu1 %v6640_v13 }
 0x94c   : > { %4345 = vperm.xlu1 %6520, %v9041_v37  }
 0x94d   : > { %4645 = vperm.xlu0 %6534, %v9016_v44  }
 0x950   : > { %6521 = vset.pattern.permute.xlu1 %v6639_v38 }
 0x951   : > { %4650 = vperm.xlu0 %6534, %v9030_v55   ;;  %4210 = vperm.xlu1 %6521, %v9053_v1  }
 0x955   : > { %4665 = vperm.xlu0 %6534, %v9041_v37   ;;  %4215 = vperm.xlu1 %6521, %v9083_v9  }
 0x959   : > { %4670 = vperm.xlu0 %6534, %v9047_v62   ;;  %6522 = vset.pattern.permute.xlu1 %v6641_v57 }
 0x95a   : > { %4485 = vperm.xlu1 %6522, %v9016_v44  }
 0x95d   : > { %4680 = vperm.xlu0 %6534, %v6562_v61  }
 0x95e   : > { %6523 = vset.pattern.permute.xlu1 %v6642_v49 }
 0x95f   : > { %4620 = vperm.xlu1 %6523, %v9007_v52  }
 0x961   : > { %4690 = vperm.xlu0 %6534, %v9053_v1  }
 0x963   : > { %6524 = vset.pattern.permute.xlu1 %v6640_v13 }
 0x964   : > { %4355 = vperm.xlu1 %6524, %v9056_v39  }
 0x968   : > { %6525 = vset.pattern.permute.xlu1 %v6641_v57 }
 0x969   : > { %4490 = vperm.xlu1 %6525, %v9030_v55  }
 0x96d   : > { %4495 = vperm.xlu1 %6525, %v9023_v2  }
 0x971   : > { %6526 = vset.pattern.permute.xlu1 %v6642_v49 }
 0x972   : > { %4630 = vperm.xlu1 %6526, %v9005_v36  }
 0x976   : > { %6527 = vset.pattern.permute.xlu1 %v6640_v13 }
 0x977   : > { %4365 = vperm.xlu1 %6527, %v9069_v51  }
 0x97b   : > { %6528 = vset.pattern.permute.xlu1 %v6641_v57 }
 0x97c   : > { %4500 = vperm.xlu1 %6528, %v9028_v6   ;;  %v4151_v24 = vpop.permute.xlu1 %4150 }
 0x97d   : > { %v4220_v28 = vmul.f32 %v4151_v24, %v4092_v25  ;;  %v4141_v15 = vpop.permute.xlu0 %4140  ;;  %v4101_v24 = vld [vmem:[#allocation4 + $0x58] sm:$0xff] }
 0x97e   : > { %v4218_v33 = vmul.f32 %v4141_v15, %v4090_v32 }
 0x97f   : > { %4236 = vst.msk [vmem:[#allocation4 + $0x10] sm:$0xff] %vm1376_vm4, %v4220_v28 }
 0x980   : > { %4234 = vst.msk [vmem:[#allocation4] sm:$0xff] %vm1376_vm4, %v4218_v33  ;;  %4505 = vperm.xlu1 %6528, %v9041_v37   ;;  %v4156_v3 = vpop.permute.xlu1 %4155 }
 0x981   : > { %v4221_v22 = vmul.f32 %v4156_v3, %v4093_v18  ;;  %v4146_v54 = vpop.permute.xlu0 %4145 }
 0x982   : > { %v4219_v41 = vmul.f32 %v4146_v54, %v4091_v27 }
 0x983   : > { %4237 = vst.msk [vmem:[#allocation4 + $0x18] sm:$0xff] %vm1376_vm4, %v4221_v22 }
 0x984   : > { %4235 = vst.msk [vmem:[#allocation4 + $0x8] sm:$0xff] %vm1376_vm4, %v4219_v41  ;;  %6530 = vset.pattern.permute.xlu1 %v6642_v49  ;;  %v4166_v11 = vpop.permute.xlu1 %4165 }
 0x985   : > { %v4223_v47 = vmul.f32 %v4166_v11, %v4095_v17  ;;  %4640 = vperm.xlu1 %6530, %v9019_v30   ;;  %v4161_v10 = vpop.permute.xlu0 %4160 }
 0x986   : > { %v4222_v16 = vmul.f32 %v4161_v10, %v4094_v35  ;;  %v4252_v60 = vld [vmem:[#allocation4 + $0x10] sm:$0xff] }
 0x987   : > { %4239 = vst.msk [vmem:[#allocation4 + $0x28] sm:$0xff] %vm1376_vm4, %v4223_v47  ;;  %v4250_v20 = vld [vmem:[#allocation4] sm:$0xff] }
 0x988   : > { %4238 = vst.msk [vmem:[#allocation4 + $0x20] sm:$0xff] %vm1376_vm4, %v4222_v16  ;;  %v4102_v16 = vld [vmem:[#allocation4 + $0x60] sm:$0xff] }
 0x989   : > { %6531 = vset.pattern.permute.xlu1 %v6640_v13  ;;  %v4306_v53 = vpop.permute.xlu1 %4305  ;;  %v4176_v19 = vpop.permute.xlu0 %4175 }
 0x98a   : > { %v4225_v8 = vmul.f32 %v4176_v19, %v4097_v50  ;;  %4375 = vperm.xlu1 %6531, %v9083_v9   ;;  %v4253_v13 = vld [vmem:[#allocation4 + $0x18] sm:$0xff] }
 0x98b   : > { %v4251_v40 = vld [vmem:[#allocation4 + $0x8] sm:$0xff] }
 0x98c   : > { %v4379_v26 = vmul.f32 %v4306_v53, %v4251_v40  ;;  %4241 = vst.msk [vmem:[#allocation4 + $0x38] sm:$0xff] %vm1376_vm4, %v4225_v8  ;;  %v4103_v40 = vld [vmem:[#allocation4 + $0x68] sm:$0xff] }
 0x98d   : > { %v4181_v4 = vpop.permute.xlu0 %4180 }
 0x98e   : > { %4395 = vst.msk [vmem:[#allocation4 + $0x8] sm:$0xff] %vm2279_vm6, %v4379_v26  ;;  %v4226_v38 = vmul.f32 %v4181_v4, %v4098_v31  ;;  %6532 = vset.pattern.permute.xlu1 %v6641_v57  ;;  %v4171_v63 = vpop.permute.xlu1 %4170  ;;  %v4255_v34 = vld [vmem:[#allocation4 + $0x28] sm:$0xff] }
 0x98f   : > { %v4224_v59 = vmul.f32 %v4171_v63, %v4096_v56  ;;  %4510 = vperm.xlu1 %6532, %v9047_v62   ;;  %v4254_v42 = vld [vmem:[#allocation4 + $0x20] sm:$0xff] }
 0x990   : > { %4242 = vst.msk [vmem:[#allocation4 + $0x40] sm:$0xff] %vm1376_vm4, %v4226_v38 }
 0x991   : > { %4240 = vst.msk [vmem:[#allocation4 + $0x30] sm:$0xff] %vm1376_vm4, %v4224_v59 }
 0x992   : > { %v4301_v0 = vpop.permute.xlu0 %4300 }
 0x993   : > { %v4378_v58 = vmul.f32 %v4301_v0, %v4250_v20  ;;  %4515 = vperm.xlu1 %6532, %v9056_v39   ;;  %v4311_v36 = vpop.permute.xlu1 %4310  ;;  %v4257_v41 = vld [vmem:[#allocation4 + $0x38] sm:$0xff] }
 0x994   : > { %v4380_v52 = vmul.f32 %v4311_v36, %v4252_v60 }
 0x995   : > { %4394 = vst.msk [vmem:[#allocation4] sm:$0xff] %vm2279_vm6, %v4378_v58  ;;  %v4411_v27 = vld [vmem:[#allocation4 + $0x8] sm:$0xff] }
 0x996   : > { %4396 = vst.msk [vmem:[#allocation4 + $0x10] sm:$0xff] %vm2279_vm6, %v4380_v52  ;;  %v4321_v46 = vpop.permute.xlu0 %4320 }
 0x997   : > { %v4382_v44 = vmul.f32 %v4321_v46, %v4254_v42  ;;  %6533 = vset.pattern.permute.xlu1 %v6642_v49  ;;  %v4316_v30 = vpop.permute.xlu1 %4315  ;;  %v4258_v37 = vld [vmem:[#allocation4 + $0x40] sm:$0xff]  ;;  %v4104_v42 = vld [vmem:[#allocation4 + $0x70] sm:$0xff] }
 0x998   : > { %v4381_v23 = vmul.f32 %v4316_v30, %v4253_v13  ;;  %4655 = vperm.xlu1 %6533, %v9023_v2   ;;  %v4256_v55 = vld [vmem:[#allocation4 + $0x30] sm:$0xff] }
 0x999   : > { %4398 = vst.msk [vmem:[#allocation4 + $0x20] sm:$0xff] %vm2279_vm6, %v4382_v44 }
 0x99a   : > { %4397 = vst.msk [vmem:[#allocation4 + $0x18] sm:$0xff] %vm2279_vm6, %v4381_v23  ;;  %v4331_v48 = vpop.permute.xlu0 %4330 }
 0x99b   : > { %v4384_v21 = vmul.f32 %v4331_v48, %v4256_v55 }
 0x99c   : > { %6535 = vset.pattern.permute.xlu1 %v6641_v57  ;;  %v4186_v7 = vpop.permute.xlu1 %4185 }
 0x99d   : > { %4400 = vst.msk [vmem:[#allocation4 + $0x30] sm:$0xff] %vm2279_vm6, %v4384_v21  ;;  %v4227_v62 = vmul.f32 %v4186_v7, %v4099_v45  ;;  %4525 = vperm.xlu1 %6535, %v9069_v51   ;;  %v4412_v35 = vld [vmem:[#allocation4 + $0x10] sm:$0xff]  ;;  %v4105_v45 = vld [vmem:[#allocation4 + $0x78] sm:$0xff] }
 0x99e   : > { %v4341_v61 = vpop.permute.xlu0 %4340 }
 0x99f   : > { %4243 = vst.msk [vmem:[#allocation4 + $0x48] sm:$0xff] %vm1376_vm4, %v4227_v62  ;;  %v4386_v2 = vmul.f32 %v4341_v61, %v4258_v37 }
 0x9a0   : > { %v4414_v10 = vld [vmem:[#allocation4 + $0x20] sm:$0xff] }
 0x9a1   : > { %4402 = vst.msk [vmem:[#allocation4 + $0x40] sm:$0xff] %vm2279_vm6, %v4386_v2  ;;  %6536 = vset.pattern.permute.xlu1 %v6642_v49  ;;  %v4326_v43 = vpop.permute.xlu1 %4325  ;;  %v4413_v63 = vld [vmem:[#allocation4 + $0x18] sm:$0xff] }
 0x9a2   : > { %v4383_v12 = vmul.f32 %v4326_v43, %v4255_v34  ;;  %4660 = vperm.xlu1 %6536, %v9028_v6   ;;  %v4351_v14 = vpop.permute.xlu0 %4350  ;;  %v4410_v6 = vld [vmem:[#allocation4] sm:$0xff] }
 0x9a4   : > { %4399 = vst.msk [vmem:[#allocation4 + $0x28] sm:$0xff] %vm2279_vm6, %v4383_v12 }
 0x9a6   : > { %6537 = vset.pattern.permute.xlu1 %v6641_v57  ;;  %v4191_v5 = vpop.permute.xlu1 %4190  ;;  %v4361_v25 = vpop.permute.xlu0 %4360  ;;  %v4259_v36 = vld [vmem:[#allocation4 + $0x48] sm:$0xff] }
 0x9a7   : > { %v4228_v32 = vmul.f32 %v4191_v5, %v4100_v29  ;;  %4530 = vperm.xlu1 %6537, %v9053_v1  }
 0x9a9   : > { %4244 = vst.msk [vmem:[#allocation4 + $0x50] sm:$0xff] %vm1376_vm4, %v4228_v32 }
 0x9aa   : > { %v4196_v28 = vpop.permute.xlu1 %4195  ;;  %v9151_v15 = vpop.permute.xlu0 %4370 }
 0x9ab   : > { %v4229_v33 = vmul.f32 %v4196_v28, %v4101_v24  ;;  %4535 = vperm.xlu1 %6537, %v9083_v9   ;;  %v4415_v2 = vld [vmem:[#allocation4 + $0x28] sm:$0xff] }
 0x9ad   : > { %4245 = vst.msk [vmem:[#allocation4 + $0x58] sm:$0xff] %vm1376_vm4, %v4229_v33 }
 0x9af   : > { %v4461_v18 = vpop.permute.xlu0 %4460  ;;  %6538 = vset.pattern.permute.xlu1 %v6642_v49  ;;  %v4466_v57 = vpop.permute.xlu1 %4465 }
 0x9b0   : > { %v4260_v3 = vld [vmem:[#allocation4 + $0x50] sm:$0xff]  ;;  %v4538_v22 = vmul.f32 %v4461_v18, %v4410_v6  ;;  %v4539_v1 = vmul.f32 %v4466_v57, %v4411_v27  ;;  %4675 = vperm.xlu1 %6538, %v9056_v39  }
 0x9b1   : > { %v4388_v54 = vmul.f32 %v4351_v14, %v4260_v3 }
 0x9b2   : > { %4554 = vst.msk [vmem:[#allocation4] sm:$0xff] %vm3166_vm8, %v4538_v22  ;;  %4555 = vst.msk [vmem:[#allocation4 + $0x8] sm:$0xff] %vm3166_vm8, %v4539_v1  ;;  %v4416_v22 = vld [vmem:[#allocation4 + $0x30] sm:$0xff] }
 0x9b3   : > { %4404 = vst.msk [vmem:[#allocation4 + $0x50] sm:$0xff] %vm2279_vm6, %v4388_v54  ;;  %v4471_v17 = vpop.permute.xlu0 %4470 }
 0x9b4   : > { %v4540_v11 = vmul.f32 %v4471_v17, %v4412_v35  ;;  %4685 = vperm.xlu1 %6538, %v9069_v51   ;;  %v4336_v49 = vpop.permute.xlu1 %4335  ;;  %v4261_v6 = vld [vmem:[#allocation4 + $0x58] sm:$0xff] }
 0x9b5   : > { %v4385_v47 = vmul.f32 %v4336_v49, %v4257_v41 }
 0x9b6   : > { %4556 = vst.msk [vmem:[#allocation4 + $0x10] sm:$0xff] %vm3166_vm8, %v4540_v11 }
 0x9b7   : > { %4401 = vst.msk [vmem:[#allocation4 + $0x38] sm:$0xff] %vm2279_vm6, %v4385_v47  ;;  %v4481_v39 = vpop.permute.xlu0 %4480 }
 0x9b8   : > { %v4542_v50 = vmul.f32 %v4481_v39, %v4414_v10  ;;  %4695 = vperm.xlu1 %6538, %v9083_v9  }
 0x9b9   : > { %v4201_v53 = vpop.permute.xlu1 %4200  ;;  %v4571_v56 = vld [vmem:[#allocation4 + $0x8] sm:$0xff]  ;;  %v4570_v5 = vld [vmem:[#allocation4] sm:$0xff] }
 0x9ba   : > { %4558 = vst.msk [vmem:[#allocation4 + $0x20] sm:$0xff] %vm3166_vm8, %v4542_v50  ;;  %v4230_v19 = vmul.f32 %v4201_v53, %v4102_v16 }
 0x9bb   : > { %v4521_v8 = vpop.permute.xlu0 %4520 }
 0x9bc   : > { %4246 = vst.msk [vmem:[#allocation4 + $0x60] sm:$0xff] %vm1376_vm4, %v4230_v19 }
 0x9bd   : > { %v4206_v51 = vpop.permute.xlu1 %4205  ;;  %v4572_v16 = vld [vmem:[#allocation4 + $0x10] sm:$0xff] }
 0x9be   : > { %v4231_v31 = vmul.f32 %v4206_v51, %v4103_v40  ;;  %v4417_v49 = vld [vmem:[#allocation4 + $0x38] sm:$0xff] }
 0x9c0   : > { %4247 = vst.msk [vmem:[#allocation4 + $0x68] sm:$0xff] %vm1376_vm4, %v4231_v31  ;;  %v4626_v26 = vpop.permute.xlu0 %4625 }
 0x9c1   : > { %v4699_v4 = vmul.f32 %v4626_v26, %v4571_v56  ;;  %v4418_v56 = vld [vmem:[#allocation4 + $0x40] sm:$0xff] }
 0x9c2   : > { %v4476_v38 = vpop.permute.xlu1 %4475 }
 0x9c3   : > { %v4262_v59 = vld [vmem:[#allocation4 + $0x60] sm:$0xff]  ;;  %4715 = vst.msk [vmem:[#allocation4 + $0x8] sm:$0xff] %vm4053_vm9, %v4699_v4  ;;  %v4541_v9 = vmul.f32 %v4476_v38, %v4413_v63 }
 0x9c4   : > { %v4390_v20 = vmul.f32 %v4361_v25, %v4262_v59  ;;  %v4636_v0 = vpop.permute.xlu0 %4635 }
 0x9c5   : > { %4557 = vst.msk [vmem:[#allocation4 + $0x18] sm:$0xff] %vm3166_vm8, %v4541_v9 }
 0x9c6   : > { %4406 = vst.msk [vmem:[#allocation4 + $0x60] sm:$0xff] %vm2279_vm6, %v4390_v20 }
 0x9c7   : > { %v4346_v58 = vpop.permute.xlu1 %4345  ;;  %v4263_v40 = vld [vmem:[#allocation4 + $0x68] sm:$0xff] }
 0x9c8   : > { %v4387_v60 = vmul.f32 %v4346_v58, %v4259_v36  ;;  %v4646_v52 = vpop.permute.xlu0 %4645 }
 0x9ca   : > { %4403 = vst.msk [vmem:[#allocation4 + $0x48] sm:$0xff] %vm2279_vm6, %v4387_v60  ;;  %v4731_v27 = vld [vmem:[#allocation4 + $0x8] sm:$0xff] }
 0x9cc   : > { %v4573_v46 = vld [vmem:[#allocation4 + $0x18] sm:$0xff]  ;;  %v4651_v44 = vpop.permute.xlu0 %4650  ;;  %v4211_v30 = vpop.permute.xlu1 %4210 }
 0x9cd   : > { %v4422_v13 = vld [vmem:[#allocation4 + $0x60] sm:$0xff]  ;;  %v4701_v23 = vmul.f32 %v4636_v0, %v4573_v46  ;;  %v4232_v55 = vmul.f32 %v4211_v30, %v4104_v42 }
 0x9ce   : > { %v4550_v48 = vmul.f32 %v4521_v8, %v4422_v13 }
 0x9cf   : > { %4717 = vst.msk [vmem:[#allocation4 + $0x18] sm:$0xff] %vm4053_vm9, %v4701_v23 }
 0x9d0   : > { %4248 = vst.msk [vmem:[#allocation4 + $0x70] sm:$0xff] %vm1376_vm4, %v4232_v55  ;;  %v9174_v21 = vpop.permute.xlu0 %4665  ;;  %v4216_v7 = vpop.permute.xlu1 %4215 }
 0x9d1   : > { %4566 = vst.msk [vmem:[#allocation4 + $0x60] sm:$0xff] %vm3166_vm8, %v4550_v48  ;;  %v4233_v37 = vmul.f32 %v4216_v7, %v4105_v45  ;;  %v4419_v0 = vld [vmem:[#allocation4 + $0x48] sm:$0xff]  ;;  %v4420_v7 = vld [vmem:[#allocation4 + $0x50] sm:$0xff] }
 0x9d3   : > { %4249 = vst.msk [vmem:[#allocation4 + $0x78] sm:$0xff] %vm1376_vm4, %v4233_v37 }
 0x9d4   : > { %v9177_v62 = vpop.permute.xlu0 %4670 }
 0x9d5   : > { %v4486_v61 = vpop.permute.xlu1 %4485 }
 0x9d6   : > { %v4543_v34 = vmul.f32 %v4486_v61, %v4415_v2  ;;  %v4733_v31 = vld [vmem:[#allocation4 + $0x18] sm:$0xff] }
 0x9d7   : > { %v4264_v43 = vld [vmem:[#allocation4 + $0x70] sm:$0xff] }
 0x9d8   : > { %v4392_v12 = vmul.f32 %v9151_v15, %v4264_v43  ;;  %v4582_v14 = vld [vmem:[#allocation4 + $0x60] sm:$0xff]  ;;  %4559 = vst.msk [vmem:[#allocation4 + $0x28] sm:$0xff] %vm3166_vm8, %v4543_v34  ;;  %v4681_v29 = vpop.permute.xlu0 %4680 }
 0x9d9   : > { %v4710_v25 = vmul.f32 %v4681_v29, %v4582_v14  ;;  %v9187_v15 = vld [vmem:[%s9358_s4] ss:$0 sm:$0xff] }
 0x9da   : > { %4408 = vst.msk [vmem:[#allocation4 + $0x70] sm:$0xff] %vm2279_vm6, %v4392_v12  ;;  %v4621_v32 = vpop.permute.xlu1 %4620  ;;  %v4754_v54 = vadd.f32 %v9187_v15, %v4731_v27  ;;  %v4756_v38 = vadd.f32 %v9187_v15, %v4733_v31  ;;  %v4265_v30 = vld [vmem:[#allocation4 + $0x78] sm:$0xff] }
 0x9db   : > { %4726 = vst.msk [vmem:[#allocation4 + $0x60] sm:$0xff] %vm4053_vm9, %v4710_v25  ;;  %v4698_v24 = vmul.f32 %v4621_v32, %v4570_v5 }
 0x9dc   : > { %v4770_v47 = vmax.f32 %v4754_v54, 0.0  ;;  %v4772_v58 = vmax.f32 %v4756_v38, 0.0 }
 0x9dd   : > { %4714 = vst.msk [vmem:[#allocation4] sm:$0xff] %vm4053_vm9, %v4698_v24 }
 0x9df   : > { %v4575_v28 = vld [vmem:[#allocation4 + $0x28] sm:$0xff]  ;;  %v4356_v33 = vpop.permute.xlu1 %4355 }
 0x9e0   : > { %v4703_v18 = vmul.f32 %v4646_v52, %v4575_v28  ;;  %v4389_v57 = vmul.f32 %v4356_v33, %v4261_v6  ;;  %v4574_v52 = vld [vmem:[#allocation4 + $0x20] sm:$0xff] }
 0x9e2   : > { %4719 = vst.msk [vmem:[#allocation4 + $0x28] sm:$0xff] %vm4053_vm9, %v4703_v18 }
 0x9e3   : > { %4405 = vst.msk [vmem:[#allocation4 + $0x58] sm:$0xff] %vm2279_vm6, %v4389_v57 }
 0x9e4   : > { %v4491_v3 = vpop.permute.xlu1 %4490  ;;  %v4730_v1 = vld [vmem:[#allocation4] sm:$0xff] }
 0x9e5   : > { %v4544_v41 = vmul.f32 %v4491_v3, %v4416_v22  ;;  %v4753_v17 = vadd.f32 %v9187_v15, %v4730_v1 }
 0x9e7   : > { %4560 = vst.msk [vmem:[#allocation4 + $0x30] sm:$0xff] %vm3166_vm8, %v4544_v41  ;;  %v4769_v35 = vmax.f32 %v4753_v17, 0.0 }
 0x9e8   : > { %v4496_v11 = vpop.permute.xlu1 %4495 }
 0x9e9   : > { %v4545_v10 = vmul.f32 %v4496_v11, %v4417_v49  ;;  %5965 = vmatprep.mubr.msk.f32.mxu0 %vm4789_vm10, %v4769_v35  ;;  %v4735_v55 = vld [vmem:[#allocation4 + $0x28] sm:$0xff] }
 0x9ea   : > { %5966 = vmatmul.mubr.msk.f32.vlgmr.msra.gmra.mxu0 %vm4789_vm10, %v4770_v47  ;;  %v4758_v61 = vadd.f32 %v9187_v15, %v4735_v55  ;;  %v4421_v14 = vld [vmem:[#allocation4 + $0x58] sm:$0xff] }
 0x9eb   : > { %4561 = vst.msk [vmem:[#allocation4 + $0x38] sm:$0xff] %vm3166_vm8, %v4545_v10 }
 0x9ec   : > { %v4774_v29 = vmax.f32 %v4758_v61, 0.0 }
 0x9ed   : > { %v4631_v39 = vpop.permute.xlu1 %4630 }
 0x9ee   : > { %v4576_v50 = vld [vmem:[#allocation4 + $0x30] sm:$0xff]  ;;  %v4700_v53 = vmul.f32 %v4631_v39, %v4572_v16 }
 0x9ef   : > { %v4704_v19 = vmul.f32 %v4651_v44, %v4576_v50 }
 0x9f0   : > { %4716 = vst.msk [vmem:[#allocation4 + $0x10] sm:$0xff] %vm4053_vm9, %v4700_v53 }
 0x9f1   : > { %4720 = vst.msk [vmem:[#allocation4 + $0x30] sm:$0xff] %vm4053_vm9, %v4704_v19 }
 0x9f2   : > { %v4366_v8 = vpop.permute.xlu1 %4365  ;;  %v4577_v24 = vld [vmem:[#allocation4 + $0x38] sm:$0xff] }
 0x9f3   : > { %v4391_v51 = vmul.f32 %v4366_v8, %v4263_v40 }
 0x9f5   : > { %4407 = vst.msk [vmem:[#allocation4 + $0x68] sm:$0xff] %vm2279_vm6, %v4391_v51  ;;  %v5065_v51 = vld [vmem:[%s9360_s6 + $0x8] sm:$0xff] }
 0x9f6   : > { %5989 = vmatprep.subr.mxu1 %v5065_v51 }
 0x9f7   : > { %v4501_v26 = vpop.permute.xlu1 %4500  ;;  %v4732_v4 = vld [vmem:[#allocation4 + $0x10] sm:$0xff]  ;;  %5990 = vmatpush3.msra.mxu1 %v5065_v51 }
 0x9f8   : > { %v4546_v63 = vmul.f32 %v4501_v26, %v4418_v56  ;;  %v4755_v59 = vadd.f32 %v9187_v15, %v4732_v4  ;;  %v4736_v48 = vld [vmem:[#allocation4 + $0x30] sm:$0xff]  ;;  %v4691_v4 = vpop.permute.xlu0 %4690 }
 0x9f9   : > { %v4759_v34 = vadd.f32 %v9187_v15, %v4736_v48 }
 0x9fa   : > { %4562 = vst.msk [vmem:[#allocation4 + $0x40] sm:$0xff] %vm3166_vm8, %v4546_v63  ;;  %v4771_v9 = vmax.f32 %v4755_v59, 0.0 }
 0x9fb   : > { %v4506_v20 = vpop.permute.xlu1 %4505  ;;  %v4775_v25 = vmax.f32 %v4759_v34, 0.0 }
 0x9fc   : > { %v4547_v36 = vmul.f32 %v4506_v20, %v4419_v0  ;;  %5968 = vmatprep.mubr.msk.f32.mxu0 %vm4789_vm10, %v4771_v9  ;;  %v4423_v57 = vld [vmem:[#allocation4 + $0x68] sm:$0xff]  ;;  %v5064_v9 = vld [vmem:[%s9360_s6] sm:$0xff] }
 0x9fd   : > { %5969 = vmatmul.mubr.msk.f32.gmra.mxu0 %vm4789_vm10, %v4772_v58  ;;  %5991 = vmatprep.subr.mxu1 %v5064_v9 }
 0x9fe   : > { %4563 = vst.msk [vmem:[#allocation4 + $0x48] sm:$0xff] %vm3166_vm8, %v4547_v36  ;;  %5992 = vmatpush3.msra.mxu1 %v5064_v9 }
 0xa00   : > { %v4641_v60 = vpop.permute.xlu1 %4640 }
 0xa01   : > { %v4702_v42 = vmul.f32 %v4641_v60, %v4574_v52  ;;  %v4578_v22 = vld [vmem:[#allocation4 + $0x40] sm:$0xff] }
 0xa02   : > { %v4742_v60 = vld [vmem:[#allocation4 + $0x60] sm:$0xff] }
 0xa03   : > { %4718 = vst.msk [vmem:[#allocation4 + $0x20] sm:$0xff] %vm4053_vm9, %v4702_v42 }
 0xa05   : > { %v4579_v46 = vld [vmem:[#allocation4 + $0x48] sm:$0xff]  ;;  %v4376_v44 = vpop.permute.xlu1 %4375 }
 0xa06   : > { %v4707_v13 = vmul.f32 %v9174_v21, %v4579_v46  ;;  %v4393_v23 = vmul.f32 %v4376_v44, %v4265_v30  ;;  %v4765_v30 = vadd.f32 %v9187_v15, %v4742_v60 }
 0xa08   : > { %4723 = vst.msk [vmem:[#allocation4 + $0x48] sm:$0xff] %vm4053_vm9, %v4707_v13  ;;  %v4781_v48 = vmax.f32 %v4765_v30, 0.0 }
 0xa09   : > { %4409 = vst.msk [vmem:[#allocation4 + $0x78] sm:$0xff] %vm2279_vm6, %v4393_v23 }
 0xa0a   : > { %v4511_v45 = vpop.permute.xlu1 %4510  ;;  %v4734_v37 = vld [vmem:[#allocation4 + $0x20] sm:$0xff] }
 0xa0b   : > { %v4548_v2 = vmul.f32 %v4511_v45, %v4420_v7  ;;  %v4757_v43 = vadd.f32 %v9187_v15, %v4734_v37 }
 0xa0d   : > { %4564 = vst.msk [vmem:[#allocation4 + $0x50] sm:$0xff] %vm3166_vm8, %v4548_v2  ;;  %v4773_v21 = vmax.f32 %v4757_v43, 0.0 }
 0xa0e   : > { %v4516_v12 = vpop.permute.xlu1 %4515 }
 0xa0f   : > { %v4549_v5 = vmul.f32 %v4516_v12, %v4421_v14  ;;  %5971 = vmatprep.mubr.msk.f32.mxu0 %vm4789_vm10, %v4773_v21  ;;  %v4739_v49 = vld [vmem:[#allocation4 + $0x48] sm:$0xff] }
 0xa10   : > { %5972 = vmatmul.mubr.msk.f32.gmra.mxu0 %vm4789_vm10, %v4774_v29  ;;  %v4425_v39 = vld [vmem:[#allocation4 + $0x78] sm:$0xff]  ;;  %v4762_v53 = vadd.f32 %v9187_v15, %v4739_v49 }
 0xa11   : > { %4565 = vst.msk [vmem:[#allocation4 + $0x58] sm:$0xff] %vm3166_vm8, %v4549_v5  ;;  %5974 = vmatprep.mubr.msk.f32.mxu0 %vm4789_vm10, %v4775_v25 }
 0xa12   : > { %v4778_v56 = vmax.f32 %v4762_v53, 0.0 }
 0xa13   : > { %v4656_v32 = vpop.permute.xlu1 %4655 }
 0xa14   : > { %v4580_v28 = vld [vmem:[#allocation4 + $0x50] sm:$0xff]  ;;  %v4705_v33 = vmul.f32 %v4656_v32, %v4577_v24 }
 0xa15   : > { %v4708_v6 = vmul.f32 %v9177_v62, %v4580_v28  ;;  %v4424_v62 = vld [vmem:[#allocation4 + $0x70] sm:$0xff] }
 0xa16   : > { %4721 = vst.msk [vmem:[#allocation4 + $0x38] sm:$0xff] %vm4053_vm9, %v4705_v33 }
 0xa17   : > { %4724 = vst.msk [vmem:[#allocation4 + $0x50] sm:$0xff] %vm4053_vm9, %v4708_v6 }
 0xa18   : > { %v4526_v18 = vpop.permute.xlu1 %4525  ;;  %v4581_v26 = vld [vmem:[#allocation4 + $0x58] sm:$0xff] }
 0xa19   : > { %v4551_v27 = vmul.f32 %v4526_v18, %v4423_v57 }
 0xa1b   : > { %4567 = vst.msk [vmem:[#allocation4 + $0x68] sm:$0xff] %vm3166_vm8, %v4551_v27 }
 0xa1d   : > { %v4661_v3 = vpop.permute.xlu1 %4660  ;;  %v4737_v1 = vld [vmem:[#allocation4 + $0x38] sm:$0xff] }
 0xa1e   : > { %v4706_v54 = vmul.f32 %v4661_v3, %v4578_v22  ;;  %v4760_v41 = vadd.f32 %v9187_v15, %v4737_v1  ;;  %v4740_v47 = vld [vmem:[#allocation4 + $0x50] sm:$0xff] }
 0xa1f   : > { %v4763_v8 = vadd.f32 %v9187_v15, %v4740_v47 }
 0xa20   : > { %4722 = vst.msk [vmem:[#allocation4 + $0x40] sm:$0xff] %vm4053_vm9, %v4706_v54  ;;  %v4776_v17 = vmax.f32 %v4760_v41, 0.0 }
 0xa21   : > { %v4779_v59 = vmax.f32 %v4763_v8, 0.0 }
 0xa22   : > { %v4531_v35 = vpop.permute.xlu1 %4530  ;;  %5975 = vmatmul.mubr.msk.f32.gmra.mxu0 %vm4789_vm10, %v4776_v17  ;;  %v4583_v58 = vld [vmem:[#allocation4 + $0x68] sm:$0xff] }
 0xa23   : > { %v4552_v11 = vmul.f32 %v4531_v35, %v4424_v62 }
 0xa25   : > { %4568 = vst.msk [vmem:[#allocation4 + $0x70] sm:$0xff] %vm3166_vm8, %v4552_v11 }
 0xa26   : > { %v4536_v10 = vpop.permute.xlu1 %4535 }
 0xa27   : > { %v4553_v16 = vmul.f32 %v4536_v10, %v4425_v39  ;;  %v4738_v50 = vld [vmem:[#allocation4 + $0x40] sm:$0xff] }
 0xa28   : > { %v4761_v19 = vadd.f32 %v9187_v15, %v4738_v50 }
 0xa29   : > { %4569 = vst.msk [vmem:[#allocation4 + $0x78] sm:$0xff] %vm3166_vm8, %v4553_v16 }
 0xa2a   : > { %v4777_v40 = vmax.f32 %v4761_v19, 0.0 }
 0xa2b   : > { %v4676_v31 = vpop.permute.xlu1 %4675 }
 0xa2c   : > { %v4584_v38 = vld [vmem:[#allocation4 + $0x70] sm:$0xff]  ;;  %v4709_v63 = vmul.f32 %v4676_v31, %v4581_v26  ;;  %5977 = vmatprep.mubr.msk.f32.mxu0 %vm4789_vm10, %v4777_v40 }
 0xa2d   : > { %v4712_v20 = vmul.f32 %v4691_v4, %v4584_v38  ;;  %5978 = vmatmul.mubr.msk.f32.gmra.mxu0 %vm4789_vm10, %v4778_v56 }
 0xa2e   : > { %4725 = vst.msk [vmem:[#allocation4 + $0x58] sm:$0xff] %vm4053_vm9, %v4709_v63  ;;  %5980 = vmatprep.mubr.msk.f32.mxu0 %vm4789_vm10, %v4779_v59 }
 0xa2f   : > { %4728 = vst.msk [vmem:[#allocation4 + $0x70] sm:$0xff] %vm4053_vm9, %v4712_v20  ;;  %v4686_v0 = vpop.permute.xlu1 %4685 }
 0xa30   : > { %v4711_v36 = vmul.f32 %v4686_v0, %v4583_v58  ;;  %v4585_v42 = vld [vmem:[#allocation4 + $0x78] sm:$0xff] }
 0xa32   : > { %4727 = vst.msk [vmem:[#allocation4 + $0x68] sm:$0xff] %vm4053_vm9, %v4711_v36 }
 0xa33   : > { %v4696_v52 = vpop.permute.xlu1 %4695 }
 0xa34   : > { %v4713_v46 = vmul.f32 %v4696_v52, %v4585_v42 }
 0xa35   : > { %v4741_v44 = vld [vmem:[#allocation4 + $0x58] sm:$0xff] }
 0xa36   : > { %4729 = vst.msk [vmem:[#allocation4 + $0x78] sm:$0xff] %vm4053_vm9, %v4713_v46  ;;  %v4764_v13 = vadd.f32 %v9187_v15, %v4741_v44  ;;  %v4744_v23 = vld [vmem:[#allocation4 + $0x70] sm:$0xff] }
 0xa37   : > { %v4767_v7 = vadd.f32 %v9187_v15, %v4744_v23 }
 0xa38   : > { %v4780_v55 = vmax.f32 %v4764_v13, 0.0 }
 0xa39   : > { %v4743_v45 = vld [vmem:[#allocation4 + $0x68] sm:$0xff]  ;;  %v4783_v2 = vmax.f32 %v4767_v7, 0.0 }
 0xa3a   : > { %5981 = vmatmul.mubr.msk.f32.gmra.mxu0 %vm4789_vm10, %v4780_v55  ;;  %v4766_v37 = vadd.f32 %v9187_v15, %v4743_v45 }
 0xa3b   : > { %5983 = vmatprep.mubr.msk.f32.mxu0 %vm4789_vm10, %v4781_v48 }
 0xa3c   : > { %v4782_v61 = vmax.f32 %v4766_v37, 0.0 }
 0xa3d   : > { %v4745_v43 = vld [vmem:[#allocation4 + $0x78] sm:$0xff] }
 0xa3e   : > { %5984 = vmatmul.mubr.msk.f32.gmra.mxu0 %vm4789_vm10, %v4782_v61  ;;  %v4768_v34 = vadd.f32 %v9187_v15, %v4745_v43 }
 0xa3f   : > { %5986 = vmatprep.mubr.msk.f32.mxu0 %vm4789_vm10, %v4783_v2 }
 0xa40   : > { %v4784_v21 = vmax.f32 %v4768_v34, 0.0 }
 0xa42   : > { %5987 = vmatmul.mubr.msk.f32.gmra.mxu0 %vm4789_vm10, %v4784_v21 }
 0xaaa   : > { %v5967_v12 = vpop.f32.mrf.mxu0 }
 0xaab   : > { %v5513_v14 = vpack.c.bf16 %v5967_v12, %v5967_v12 }
 0xaac   : > { %v4904_v29 = vpop.f32.mrf.mxu0 }
 0xaad   : > { %5049 = vst.msk [vmem:[%s6773_s22 + $0x4] sm:$0xf] %vm5047_vm11, %v5513_v14  ;;  %v5512_v5 = vpack.c.bf16 %v4904_v29, %v4904_v29  ;;  %5993 = vmatprep.mubr.msk.f32.mxu1 %vm5066_vm12, %v4904_v29 }
 0xaae   : > { %5994 = vmatmul.mubr.msk.f32.vlgmr.msra.gmra.mxu1 %vm5066_vm12, %v5967_v12 }
 0xaaf   : > { %5048 = vst.msk [vmem:[%s6773_s22] sm:$0xf] %vm5047_vm11, %v5512_v5 }
 0xabd   : > { %v5970_v15 = vpop.f32.mrf.mxu0 }
 0xabe   : > { %v5515_v25 = vpack.c.bf16 %v5970_v15, %v5970_v15 }
 0xabf   : > { %v4914_v32 = vpop.f32.mrf.mxu0 }
 0xac0   : > { %5051 = vst.msk [vmem:[%s6773_s22 + $0xc] sm:$0xf] %vm5047_vm11, %v5515_v25  ;;  %v5514_v24 = vpack.c.bf16 %v4914_v32, %v4914_v32  ;;  %5996 = vmatprep.mubr.msk.f32.mxu1 %vm5066_vm12, %v4914_v32 }
 0xac1   : > { %5997 = vmatmul.mubr.msk.f32.gmra.mxu1 %vm5066_vm12, %v5970_v15 }
 0xac2   : > { %5050 = vst.msk [vmem:[%s6773_s22 + $0x8] sm:$0xf] %vm5047_vm11, %v5514_v24 }
 0xad0   : > { %v5973_v28 = vpop.f32.mrf.mxu0 }
 0xad1   : > { %v5517_v33 = vpack.c.bf16 %v5973_v28, %v5973_v28 }
 0xad2   : > { %v4924_v6 = vpop.f32.mrf.mxu0 }
 0xad3   : > { %5053 = vst.msk [vmem:[%s6773_s22 + $0x14] sm:$0xf] %vm5047_vm11, %v5517_v33  ;;  %v5516_v18 = vpack.c.bf16 %v4924_v6, %v4924_v6  ;;  %5999 = vmatprep.mubr.msk.f32.mxu1 %vm5066_vm12, %v4924_v6 }
 0xad4   : > { %6000 = vmatmul.mubr.msk.f32.gmra.mxu1 %vm5066_vm12, %v5973_v28 }
 0xad5   : > { %5052 = vst.msk [vmem:[%s6773_s22 + $0x10] sm:$0xf] %vm5047_vm11, %v5516_v18 }
 0xae2   : > { %v5976_v57 = vpop.f32.mrf.mxu0 }
 0xae3   : > { %v5519_v27 = vpack.c.bf16 %v5976_v57, %v5976_v57 }
 0xae4   : > { %v4934_v3 = vpop.f32.mrf.mxu0 }
 0xae5   : > { %5055 = vst.msk [vmem:[%s6773_s22 + $0x1c] sm:$0xf] %vm5047_vm11, %v5519_v27  ;;  %v5518_v22 = vpack.c.bf16 %v4934_v3, %v4934_v3  ;;  %6002 = vmatprep.mubr.msk.f32.mxu1 %vm5066_vm12, %v4934_v3 }
 0xae6   : > { %6003 = vmatmul.mubr.msk.f32.gmra.mxu1 %vm5066_vm12, %v5976_v57 }
 0xae7   : > { %5054 = vst.msk [vmem:[%s6773_s22 + $0x18] sm:$0xf] %vm5047_vm11, %v5518_v22 }
 0xaed   : > { %v5979_v1 = vpop.f32.mrf.mxu0 }
 0xaee   : > { %v5521_v54 = vpack.c.bf16 %v5979_v1, %v5979_v1 }
 0xaef   : > { %v4944_v41 = vpop.f32.mrf.mxu0 }
 0xaf0   : > { %5057 = vst.msk [vmem:[%s6773_s22 + $0x24] sm:$0xf] %vm5047_vm11, %v5521_v54  ;;  %v5520_v17 = vpack.c.bf16 %v4944_v41, %v4944_v41  ;;  %6005 = vmatprep.mubr.msk.f32.mxu1 %vm5066_vm12, %v4944_v41 }
 0xaf1   : > { %6006 = vmatmul.mubr.msk.f32.gmra.mxu1 %vm5066_vm12, %v5979_v1 }
 0xaf2   : > { %5056 = vst.msk [vmem:[%s6773_s22 + $0x20] sm:$0xf] %vm5047_vm11, %v5520_v17 }
 0xafa   : > { %v5982_v35 = vpop.f32.mrf.mxu0 }
 0xafb   : > { %v5523_v62 = vpack.c.bf16 %v5982_v35, %v5982_v35 }
 0xafc   : > { %v4954_v11 = vpop.f32.mrf.mxu0 }
 0xafd   : > { %5059 = vst.msk [vmem:[%s6773_s22 + $0x2c] sm:$0xf] %vm5047_vm11, %v5523_v62  ;;  %v5522_v49 = vpack.c.bf16 %v4954_v11, %v4954_v11  ;;  %6008 = vmatprep.mubr.msk.f32.mxu1 %vm5066_vm12, %v4954_v11 }
 0xafe   : > { %v5985_v47 = vpop.f32.mrf.mxu0  ;;  %6009 = vmatmul.mubr.msk.f32.gmra.mxu1 %vm5066_vm12, %v5982_v35 }
 0xaff   : > { %5058 = vst.msk [vmem:[%s6773_s22 + $0x28] sm:$0xf] %vm5047_vm11, %v5522_v49  ;;  %v5525_v10 = vpack.c.bf16 %v5985_v47, %v5985_v47 }
 0xb00   : > { %v4964_v39 = vpop.f32.mrf.mxu0 }
 0xb01   : > { %5061 = vst.msk [vmem:[%s6773_s22 + $0x34] sm:$0xf] %vm5047_vm11, %v5525_v10  ;;  %v5524_v16 = vpack.c.bf16 %v4964_v39, %v4964_v39  ;;  %6011 = vmatprep.mubr.msk.f32.mxu1 %vm5066_vm12, %v4964_v39 }
 0xb02   : > { %v5988_v50 = vpop.f32.mrf.mxu0  ;;  %6012 = vmatmul.mubr.msk.f32.gmra.mxu1 %vm5066_vm12, %v5985_v47 }
 0xb03   : > { %5060 = vst.msk [vmem:[%s6773_s22 + $0x30] sm:$0xf] %vm5047_vm11, %v5524_v16  ;;  %v5527_v53 = vpack.c.bf16 %v5988_v50, %v5988_v50 }
 0xb04   : > { %v4974_v19 = vpop.f32.mrf.mxu0 }
 0xb05   : > { %5063 = vst.msk [vmem:[%s6773_s22 + $0x3c] sm:$0xf] %vm5047_vm11, %v5527_v53  ;;  %v5526_v8 = vpack.c.bf16 %v4974_v19, %v4974_v19  ;;  %6014 = vmatprep.mubr.msk.f32.mxu1 %vm5066_vm12, %v4974_v19 }
 0xb06   : > { %6015 = vmatmul.mubr.msk.f32.gmra.mxu1 %vm5066_vm12, %v5988_v50 }
 0xb07   : > { %5062 = vst.msk [vmem:[%s6773_s22 + $0x38] sm:$0xf] %vm5047_vm11, %v5526_v8 }
 0xb6e   : > { %v5995_v40 = vpop.f32.mrf.mxu1 }
 0xb6f   : > { %5262 = vst.msk [vmem:[%s6768_s13 + $0x8] sm:$0xff] %vm5260_vm13, %v5995_v40 }
 0xb70   : > { %v5181_v51 = vpop.f32.mrf.mxu1 }
 0xb71   : > { %5261 = vst.msk [vmem:[%s6768_s13] sm:$0xff] %vm5260_vm13, %v5181_v51 }
 0xb81   : > { %v5998_v31 = vpop.f32.mrf.mxu1 }
 0xb82   : > { %5264 = vst.msk [vmem:[%s6768_s13 + $0x18] sm:$0xff] %vm5260_vm13, %v5998_v31 }
 0xb83   : > { %v5191_v26 = vpop.f32.mrf.mxu1 }
 0xb84   : > { %5263 = vst.msk [vmem:[%s6768_s13 + $0x10] sm:$0xff] %vm5260_vm13, %v5191_v26 }
 0xb94   : > { %v6001_v56 = vpop.f32.mrf.mxu1 }
 0xb95   : > { %5266 = vst.msk [vmem:[%s6768_s13 + $0x28] sm:$0xff] %vm5260_vm13, %v6001_v56 }
 0xb96   : > { %v5201_v4 = vpop.f32.mrf.mxu1 }
 0xb97   : > { %5265 = vst.msk [vmem:[%s6768_s13 + $0x20] sm:$0xff] %vm5260_vm13, %v5201_v4 }
 0xba6   : > { %v6004_v38 = vpop.f32.mrf.mxu1 }
 0xba7   : > { %5268 = vst.msk [vmem:[%s6768_s13 + $0x38] sm:$0xff] %vm5260_vm13, %v6004_v38 }
 0xba8   : > { %v5211_v63 = vpop.f32.mrf.mxu1 }
 0xba9   : > { %5267 = vst.msk [vmem:[%s6768_s13 + $0x30] sm:$0xff] %vm5260_vm13, %v5211_v63 }
 0xbb1   : > { %v6007_v59 = vpop.f32.mrf.mxu1 }
 0xbb2   : > { %5270 = vst.msk [vmem:[%s6768_s13 + $0x48] sm:$0xff] %vm5260_vm13, %v6007_v59 }
 0xbb3   : > { %v5221_v9 = vpop.f32.mrf.mxu1 }
 0xbb4   : > { %5269 = vst.msk [vmem:[%s6768_s13 + $0x40] sm:$0xff] %vm5260_vm13, %v5221_v9 }
 0xbbe   : > { %v6010_v20 = vpop.f32.mrf.mxu1 }
 0xbbf   : > { %5272 = vst.msk [vmem:[%s6768_s13 + $0x58] sm:$0xff] %vm5260_vm13, %v6010_v20 }
 0xbc0   : > { %v5231_v0 = vpop.f32.mrf.mxu1 }
 0xbc1   : > { %5271 = vst.msk [vmem:[%s6768_s13 + $0x50] sm:$0xff] %vm5260_vm13, %v5231_v0 }
 0xbc2   : > { %v6013_v58 = vpop.f32.mrf.mxu1 }
 0xbc3   : > { %5274 = vst.msk [vmem:[%s6768_s13 + $0x68] sm:$0xff] %vm5260_vm13, %v6013_v58 }
 0xbc4   : > { %v5241_v36 = vpop.f32.mrf.mxu1 }
 0xbc5   : > { %5273 = vst.msk [vmem:[%s6768_s13 + $0x60] sm:$0xff] %vm5260_vm13, %v5241_v36 }
 0xbc6   : > { %v6016_v60 = vpop.f32.mrf.mxu1 }
 0xbc7   : > { %5276 = vst.msk [vmem:[%s6768_s13 + $0x78] sm:$0xff] %vm5260_vm13, %v6016_v60 }
 0xbc8   : > { %v5251_v52 = vpop.f32.mrf.mxu1 }
 0xbc9   : > { %5275 = vst.msk [vmem:[%s6768_s13 + $0x70] sm:$0xff] %vm5260_vm13, %v5251_v52 }
 0xbca PF: > { %s19_s11 = sadd.s32 1, %s6625_s11   ;;  %s9823_s30 = sld [smem:[#allocation6_spill]] }
 0xbcb   : > { %p16_p1 = scmp.ge.s32.totalorder %s19_s11, 6   ;;  %s9824_s22 = sld [smem:[#allocation7_spill]] }
 0xbcc   : > { %s9825_s10 = sld [smem:[#allocation8_spill]]  ;;  %s9826_s27 = smov %s6605_s28 }
 0xbcd   : > { %s9827_s28 = smov %s6739_s18  ;;  %s9828_s29 = smov %s6617_s9 }
 0xbce   :  { %18 = sbr.rel (!%p16_p1) target bundleno = 7 (0x7), region = 150 }
 0xbd1   : > { %s9829_s9 = smov %s9824_s22 }

</bundles_post_ra>
